<compile_context>
chip_gen: v6e
topology: v6e:2x2x1
jax: 0.10.0
libtpu: 0.0.40
codegen_flags: <defaults>
</compile_context>

<pallas_src>
import functools
import math

import jax
import jax.numpy as jnp
from jax.experimental import pallas as pl
from jax.experimental.pallas import tpu as pltpu

_VMEM_LIMIT = 32 * 1024 * 1024


def _round_up(x, m):
    return ((x + m - 1) // m) * m


def _pad2(a, rows, cols):
    pr, pc = rows - a.shape[0], cols - a.shape[1]
    if pr == 0 and pc == 0:
        return a
    return jnp.pad(a, ((0, pr), (0, pc)))


def _pick_tile(dim, pref, align):
    """(tile, padded_dim): largest multiple of `align` <= pref dividing dim;
    full dim when it fits; otherwise pad (rare)."""
    if dim <= pref:
        return dim, dim
    if dim % align == 0:
        t = (pref // align) * align
        while t >= align:
            if dim % t == 0:
                return t, dim
            t -= align
    return pref, _round_up(dim, pref)


# ----------------------------- standalone LayerNorm -----------------------------

def _ln_kernel(x_ref, g_ref, b_ref, o_ref):
    x = x_ref[...].astype(jnp.float32)
    mu = jnp.mean(x, axis=-1, keepdims=True)
    var = jnp.mean(jnp.square(x - mu), axis=-1, keepdims=True)
    y = (x - mu) * jax.lax.rsqrt(var + 1e-5) * g_ref[...] + b_ref[...]
    o_ref[...] = y.astype(o_ref.dtype)


def layer_norm(x, g, b, *, out_dtype=jnp.bfloat16, tm=256):
    """Single LN pass (used so the LM head does not recompute LN per column block)."""
    M, K = x.shape
    tm_e, Mp = _pick_tile(M, tm, 8)
    xp = x if Mp == M else jnp.pad(x, ((0, Mp - M), (0, 0)))
    out = pl.pallas_call(
        _ln_kernel,
        grid=(Mp // tm_e,),
        in_specs=[pl.BlockSpec((tm_e, K), lambda i: (i, 0)),
                  pl.BlockSpec((1, K), lambda i: (0, 0)),
                  pl.BlockSpec((1, K), lambda i: (0, 0))],
        out_specs=pl.BlockSpec((tm_e, K), lambda i: (i, 0)),
        out_shape=jax.ShapeDtypeStruct((Mp, K), out_dtype),
        compiler_params=pltpu.CompilerParams(
            dimension_semantics=("parallel",), vmem_limit_bytes=_VMEM_LIMIT),
    )(xp, g.reshape(1, K).astype(jnp.float32), b.reshape(1, K).astype(jnp.float32))
    return out if Mp == M else out[:M]


# --------------- fused [LayerNorm] -> matmul -> [bias/gelu/residual] ---------------

def _fused_linear_kernel(*refs, activation, has_bias, has_ln, has_res,
                         multi_k, use_acc):
    it = iter(refs)
    x_ref = next(it)
    w_ref = next(it)
    b_ref = next(it) if has_bias else None
    if has_ln:
        g_ref = next(it)
        beta_ref = next(it)
    r_ref = next(it) if has_res else None
    o_ref = next(it)
    acc_ref = next(it) if use_acc else None

    x = x_ref[...]
    if has_ln:
        xf = x.astype(jnp.float32)
        mu = jnp.mean(xf, axis=-1, keepdims=True)
        var = jnp.mean(jnp.square(xf - mu), axis=-1, keepdims=True)
        xf = (xf - mu) * jax.lax.rsqrt(var + 1e-5) * g_ref[...] + beta_ref[...]
        xb = xf.astype(jnp.bfloat16)
    else:
        xb = x.astype(jnp.bfloat16)        # no f32 round trip for bf16 activations

    part = jnp.dot(xb, w_ref[...].astype(jnp.bfloat16),
                   preferred_element_type=jnp.float32)

    def epilogue(y):
        if has_bias:
            y = y + b_ref[...].astype(jnp.float32)
        if activation == "gelu_new":
            y = 0.5 * y * (1.0 + jnp.tanh(0.7978845608028654 *
                                          (y + 0.044715 * y * y * y)))
        if has_res:
            y = y + r_ref[...].astype(jnp.float32)
        return y

    if not multi_k:
        o_ref[...] = epilogue(part).astype(o_ref.dtype)
        return

    if use_acc:                                   # multi-K, non-f32 output
        @pl.when(pl.program_id(2) == 0)
        def _init():
            acc_ref[...] = jnp.zeros_like(acc_ref)
        acc_ref[...] += part

        @pl.when(pl.program_id(2) == pl.num_programs(2) - 1)
        def _finalize():
            o_ref[...] = epilogue(acc_ref[...]).astype(o_ref.dtype)
    else:                                          # multi-K, f32 output: accumulate in o_ref
        @pl.when(pl.program_id(2) == 0)
        def _first():
            o_ref[...] = part

        @pl.when(pl.program_id(2) > 0)
        def _accum():
            o_ref[...] += part

        @pl.when(pl.program_id(2) == pl.num_programs(2) - 1)
        def _final():
            o_ref[...] = epilogue(o_ref[...]).astype(o_ref.dtype)


def fused_linear(x, w, b=None, *, ln_g=None, ln_b=None, activation=None,
                 residual=None, out_dtype=jnp.float32,
                 tm=256, tn=512, tk=512, w_buffers=None):
    """y = [gelu]( LN?(x) @ w + b ) [+ residual];  x:[M,K], w:[K,N] -> [M,N] out_dtype."""
    M, K = x.shape
    N = w.shape[1]
    has_ln = ln_g is not None

    # Wide-N (LM head) or huge-K (v7x VMEM guard): pre-normalize once in a tiny
    # standalone LN pass instead of recomputing LN for every output-column block
    # / forcing a full-row [tm, K] f32 x tile.
    if has_ln and (pl.cdiv(N, tn) > 8 or K > 4096):
        x = layer_norm(x, ln_g, ln_b, out_dtype=jnp.bfloat16, tm=tm)
        ln_g = ln_b = None
        has_ln = False

    has_bias = b is not None
    has_res = residual is not None

    tm_e, Mp = _pick_tile(M, tm, 8)
    tn_e, Np = _pick_tile(N, tn, 128)
    if has_ln:
        tk_e, Kp = K, K            # fused LayerNorm needs the whole row resident
    else:
        tk_e, Kp = _pick_tile(K, tk, 128)

    grid_k = Kp // tk_e
    multi_k = grid_k > 1
    use_acc = multi_k and jnp.dtype(out_dtype) != jnp.dtype(jnp.float32)

    inputs = [_pad2(x, Mp, Kp), _pad2(w, Kp, Np)]
    w_kwargs = {}
    if w_buffers is not None and grid_k * (Np // tn_e) >= 3:
        # Deeper weight pipeline for weight-DMA-bound linears (LM head).
        w_kwargs["pipeline_mode"] = pl.Buffered(w_buffers)
    in_specs = [
        pl.BlockSpec((tm_e, tk_e), lambda i, j, k: (i, k)),
        pl.BlockSpec((tk_e, tn_e), lambda i, j, k: (k, j), **w_kwargs),
    ]
    if has_bias:
        inputs.append(_pad2(b.reshape(1, N).astype(jnp.float32), 1, Np))
        in_specs.append(pl.BlockSpec((1, tn_e), lambda i, j, k: (0, j)))
    if has_ln:
        inputs.append(ln_g.reshape(1, K).astype(jnp.float32))
        inputs.append(ln_b.reshape(1, K).astype(jnp.float32))
        in_specs.append(pl.BlockSpec((1, tk_e), lambda i, j, k: (0, k)))
        in_specs.append(pl.BlockSpec((1, tk_e), lambda i, j, k: (0, k)))
    if has_res:
        inputs.append(_pad2(residual, Mp, Np))
        in_specs.append(pl.BlockSpec((tm_e, tn_e), lambda i, j, k: (i, j)))

    out = pl.pallas_call(
        functools.partial(_fused_linear_kernel, activation=activation,
                          has_bias=has_bias, has_ln=has_ln, has_res=has_res,
                          multi_k=multi_k, use_acc=use_acc),
        grid=(Mp // tm_e, Np // tn_e, grid_k),
        in_specs=in_specs,
        out_specs=pl.BlockSpec((tm_e, tn_e), lambda i, j, k: (i, j)),
        out_shape=jax.ShapeDtypeStruct((Mp, Np), out_dtype),
        scratch_shapes=([pltpu.VMEM((tm_e, tn_e), jnp.float32)] if use_acc else []),
        compiler_params=pltpu.CompilerParams(
            dimension_semantics=("parallel", "parallel", "arbitrary"),
            vmem_limit_bytes=_VMEM_LIMIT),
    )(*inputs)
    if Mp != M or Np != N:
        out = out[:M, :N]
    return out


# ------------------------------ attention core ------------------------------

def _pick_hpb(n_head, dh):
    """Smallest divisor hpb of n_head with lane-aligned head-group width, else None."""
    for hpb in range(1, n_head + 1):
        if n_head % hpb == 0 and (hpb * dh) % 128 == 0:
            return hpb
    return None


def _pick_tq(Tq):
    if Tq <= 256:
        return Tq
    for t in (256, 128, 64, 32, 16, 8):
        if Tq % t == 0:
            return t
    return Tq


def _mha_kernel(*refs, hpb, dh, scale, causal, has_pad):
    if has_pad:
        q_ref, k_ref, v_ref, pad_ref, o_ref, acc_ref = refs
    else:
        q_ref, k_ref, v_ref, o_ref, acc_ref = refs
    tq, Tk = q_ref.shape[1], k_ref.shape[1]
    row_off = pl.program_id(2) * tq           # absolute query-row offset of this q tile

    bias = None
    if causal:
        row = jax.lax.broadcasted_iota(jnp.int32, (tq, Tk), 0) + row_off
        col = jax.lax.broadcasted_iota(jnp.int32, (tq, Tk), 1)
        bias = jnp.where(col <= row, 0.0, -1e9)
    if has_pad:
        pad = pad_ref[0].astype(jnp.float32)                  # [1, Tk]
        bias = pad if bias is None else bias + pad

    q = q_ref[0].astype(jnp.bfloat16)                         # [tq, hpb*dh]
    k = k_ref[0].astype(jnp.bfloat16)
    v = v_ref[0].astype(jnp.bfloat16)

    # TODO(synk): for dh < 128 on v6e/v7x, batch all hpb heads' QK^T / PV into a
    # single dot_general to keep MXU cadence (per-head dots under-fill the
    # 256-wide MXU); per-head loop kept for layout simplicity here.
    for h in range(hpb):
        qh = q[:, h * dh:(h + 1) * dh]
        kh = k[:, h * dh:(h + 1) * dh]
        vh = v[:, h * dh:(h + 1) * dh]
        s = jax.lax.dot_general(qh, kh, (((1,), (1,)), ((), ())),
                                preferred_element_type=jnp.float32) * scale
        if bias is not None:
            s = s + bias
        m = jnp.max(s, axis=-1, keepdims=True)
        p = jnp.exp(s - m)
        p = p * pl.reciprocal(jnp.sum(p, axis=-1, keepdims=True), approx=True)
        # write each head's PV into the VMEM slab as it is produced (no concat,
        # each head's score/prob temporaries die before the next head starts)
        acc_ref[:, h * dh:(h + 1) * dh] = jnp.dot(
            p.astype(jnp.bfloat16), vh, preferred_element_type=jnp.float32)
    o_ref[0] = acc_ref[...].astype(o_ref.dtype)               # single lane-dense store


def attention(q_src, k_src, v_src, q_col, k_col, v_col, *, n_head, dh,
              causal, pad_add=None, out_dtype=jnp.bfloat16):
    """Multi-head attention reading q/k/v directly out of (possibly fused, possibly
    shared) projection tensors at column offsets q_col/k_col/v_col — no jnp.split.

    q_src:[B,Tq,*], k_src/v_src:[B,Tk,*]; pad_add:[B,1,Tk] additive; out [B,Tq,H]."""
    H = n_head * dh
    hpb = _pick_hpb(n_head, dh)
    if hpb is None:
        # H per head group cannot be 128-lane aligned: fall back to contiguous
        # [B,T,H] slices (extra copy) with all heads in one group.
        q_src = jax.lax.slice_in_dim(q_src, q_col, q_col + H, axis=2); q_col = 0
        k_src = jax.lax.slice_in_dim(k_src, k_col, k_col + H, axis=2); k_col = 0
        v_src = jax.lax.slice_in_dim(v_src, v_col, v_col + H, axis=2); v_col = 0
        hpb = n_head
    hw = hpb * dh
    G = n_head // hpb
    qb, kb, vb = q_col // hw, k_col // hw, v_col // hw

    B, Tq = q_src.shape[0], q_src.shape[1]
    Tk = k_src.shape[1]
    tq = _pick_tq(Tq)
    scale = 1.0 / math.sqrt(dh)

    in_specs = [
        pl.BlockSpec((1, tq, hw), lambda b, g, qi: (b, qi, qb + g)),
        pl.BlockSpec((1, Tk, hw), lambda b, g, qi: (b, 0, kb + g)),
        pl.BlockSpec((1, Tk, hw), lambda b, g, qi: (b, 0, vb + g)),
    ]
    inputs = [q_src, k_src, v_src]
    if pad_add is not None:
        in_specs.append(pl.BlockSpec((1, 1, Tk), lambda b, g, qi: (b, 0, 0)))
        inputs.append(pad_add)

    return pl.pallas_call(
        functools.partial(_mha_kernel, hpb=hpb, dh=dh, scale=scale,
                          causal=causal, has_pad=pad_add is not None),
        grid=(B, G, Tq // tq),
        in_specs=in_specs,
        out_specs=pl.BlockSpec((1, tq, hw), lambda b, g, qi: (b, qi, g)),
        out_shape=jax.ShapeDtypeStruct((B, Tq, H), out_dtype),
        scratch_shapes=[pltpu.VMEM((tq, hw), jnp.float32)],
        compiler_params=pltpu.CompilerParams(
            dimension_semantics=("parallel", "parallel", "parallel"),
            vmem_limit_bytes=_VMEM_LIMIT),
    )(*inputs)


# ------------------------------ model forward -------------------------------

def transformer_decoder_forward(params, cfg, image_embeddings, target_tokens):
    """Teacher-forcing forward; returns logits[:, :-1, :]."""
    n_head = cfg["n_head"]
    n_layer = cfg["n_layer"]
    B, S_img, E = image_embeddings.shape
    V, H = params["wte"].shape
    dh = H // n_head

    # image_projection (nn.Linear) -> bf16 intermediate
    proj_img = fused_linear(image_embeddings.reshape(B * S_img, E),
                            params["img_w"], params["img_b"],
                            out_dtype=jnp.bfloat16)                      # [B*S, H]

    # prepend BOS, embed tokens
    bos = jnp.full((B, 1), cfg["bos_token_id"], dtype=target_tokens.dtype)
    input_tokens = jnp.concatenate([bos, target_tokens], axis=1)         # [B, T]
    T = input_tokens.shape[1]
    input_emb = jnp.take(params["wte"], input_tokens, axis=0)            # [B, T, H] f32

    # default attention_mask = (tokens != pad_token_id), pad_token_id -> 0;
    # kept as a tiny [B,1,T] additive row (causal part is generated in-kernel).
    pad_add = jnp.where(input_tokens != 0, 0.0, -1e9).astype(jnp.float32)[:, None, :]

    # ---- stage 1 ----------------------------------------------------------
    # All layers' GPT-2 self-attention QKV projections of the SAME token
    # embeddings, batched into one matmul: [B,T, n_layer*3H].
    qkv_all = fused_linear(input_emb.reshape(B * T, H),
                           params["attn_qkv_w_all"], params["attn_qkv_b_all"],
                           out_dtype=jnp.bfloat16).reshape(B, T, n_layer * 3 * H)
    # All layers' cross-attention K/V projections of the image tokens, batched:
    kv_all = fused_linear(proj_img, params["cross_kv_w_all"], params["cross_kv_b_all"],
                          out_dtype=jnp.bfloat16).reshape(B, S_img, n_layer * 2 * H)

    # running = input_emb + sum_l cross_l, accumulated via the fused residual path.
    running = input_emb.reshape(B * T, H)                                # f32 carry
    for l in range(n_layer):
        blk = params["blocks"][l]
        cr = params["cross"][l]
        # GPT2Attention called directly on the token embeddings (no ln_1, no
        # residual — matches torch's layer.attn(...)).  The 0/1 causal mask the
        # torch code passes only adds a per-row constant to un-masked logits
        # (GPT2Attention already applies its own causal mask), which cancels in
        # softmax; the reference applies no pad mask in this stage either.
        a = attention(qkv_all, qkv_all, qkv_all,
                      l * 3 * H, l * 3 * H + H, l * 3 * H + 2 * H,
                      n_head=n_head, dh=dh, causal=True)                 # [B,T,H] bf16
        hs = fused_linear(a.reshape(B * T, H), blk["c_proj_w"], blk["c_proj_b"],
                          out_dtype=jnp.bfloat16)
        # nn.MultiheadAttention(hs, proj_img, proj_img): no mask at all.
        q = fused_linear(hs, cr["wq"], cr["bq"],
                         out_dtype=jnp.bfloat16).reshape(B, T, H)
        o = attention(q, kv_all, kv_all, 0, l * 2 * H, l * 2 * H + H,
                      n_head=n_head, dh=dh, causal=False)
        running = fused_linear(o.reshape(B * T, H), cr["wo"], cr["bo"],
                               residual=running)                         # f32 carry

    x = running.reshape(B, T, H)

    # ---- stage 2: full GPT-2 LM forward on inputs_embeds = x ---------------
    h = x + params["wpe"][:T][None]
    for l in range(n_layer):
        blk = params["blocks"][l]
        hf = h.reshape(B * T, H)
        qkv = fused_linear(hf, blk["c_attn_w"], blk["c_attn_b"],
                           ln_g=blk["ln1_g"], ln_b=blk["ln1_b"],
                           out_dtype=jnp.bfloat16).reshape(B, T, 3 * H)  # ln_1 fused
        a = attention(qkv, qkv, qkv, 0, H, 2 * H, n_head=n_head, dh=dh,
                      causal=True, pad_add=pad_add)
        hf = fused_linear(a.reshape(B * T, H), blk["c_proj_w"], blk["c_proj_b"],
                          residual=hf)                                   # residual fused
        m = fused_linear(hf, blk["fc_w"], blk["fc_b"],
                         ln_g=blk["ln2_g"], ln_b=blk["ln2_b"],
                         activation="gelu_new", out_dtype=jnp.bfloat16)  # ln_2 fused
        hf = fused_linear(m, blk["proj_w"], blk["proj_b"], residual=hf)  # residual fused
        h = hf.reshape(B, T, H)

    # ln_f + tied LM head (no bias); drop the discarded last position BEFORE the
    # big matmul; pre-transposed wte^T; wide-N calls pre-normalize once (see
    # fused_linear) and get a wider tn + deeper weight pipeline.
    h_in = h[:, :-1, :].reshape(B * (T - 1), H)
    logits = fused_linear(h_in, params["wte_T"], None,
                          ln_g=params["lnf_g"], ln_b=params["lnf_b"],
                          out_dtype=jnp.float32, tn=1024, w_buffers=3)
    return logits.reshape(B, T - 1, V)


# ------------------------------- param init --------------------------------

def init_params(key, *, embedding_dim, hidden_dim, n_head, n_layer, vocab_size, max_pos):
    del n_head  # shapes do not depend on head count here
    H = hidden_dim
    ks = iter(jax.random.split(key, 256))

    def nrm(shape, scale=0.02):
        return (scale * jax.random.normal(next(ks), shape)).astype(jnp.float32)

    def wt(shape, scale=0.02):
        # matmul weights live in bf16; biases / LN params / embeddings stay f32
        return nrm(shape, scale).astype(jnp.bfloat16)

    wte = nrm((vocab_size, H))
    params = {
        "img_w": wt((embedding_dim, H)),
        "img_b": nrm((H,)),
        "wte": wte,                                # f32, used for embedding gather
        "wte_T": wte.T.astype(jnp.bfloat16),       # tied LM head, transposed once
        "wpe": nrm((max_pos, H), 0.01),
        "lnf_g": jnp.ones((H,), jnp.float32),
        "lnf_b": jnp.zeros((H,), jnp.float32),
        # declared by the torch module but never used in forward():
        "image_positional_embedding": nrm((1, 1, H), 1.0),
        "blocks": [],
        "cross": [],
    }
    for _ in range(n_layer):
        params["blocks"].append({
            "ln1_g": jnp.ones((H,), jnp.float32), "ln1_b": jnp.zeros((H,), jnp.float32),
            "c_attn_w": wt((H, 3 * H)), "c_attn_b": nrm((3 * H,)),
            "c_proj_w": wt((H, H)), "c_proj_b": nrm((H,)),
            "ln2_g": jnp.ones((H,), jnp.float32), "ln2_b": jnp.zeros((H,), jnp.float32),
            "fc_w": wt((H, 4 * H)), "fc_b": nrm((4 * H,)),
            "proj_w": wt((4 * H, H)), "proj_b": nrm((H,)),
        })
        params["cross"].append({
            "wq": wt((H, H)), "bq": nrm((H,)),
            "wkv": wt((H, 2 * H)), "bkv": nrm((2 * H,)),
            "wo": wt((H, H)), "bo": nrm((H,)),
        })
    # Batched projections (same input for every layer -> one big matmul each):
    params["attn_qkv_w_all"] = jnp.concatenate(
        [b["c_attn_w"] for b in params["blocks"]], axis=1)          # [H, 3H*L]
    params["attn_qkv_b_all"] = jnp.concatenate(
        [b["c_attn_b"] for b in params["blocks"]], axis=0)          # [3H*L]
    params["cross_kv_w_all"] = jnp.concatenate(
        [c["wkv"] for c in params["cross"]], axis=1)                # [H, 2H*L]
    params["cross_kv_b_all"] = jnp.concatenate(
        [c["bkv"] for c in params["cross"]], axis=0)                # [2H*L]
    return params


# ----------------------------------- main -----------------------------------

if __name__ == "__main__":
    # small synthetic GPT-2 config (hidden=128 so head-group blocks are 128-lane aligned)
    EMB_DIM, HIDDEN, N_HEAD, N_LAYER, VOCAB, MAX_POS = 16, 128, 4, 2, 64, 64
    B, S_IMG, T_TGT = 2, 4, 7
    cfg = {"n_head": N_HEAD, "n_layer": N_LAYER, "bos_token_id": VOCAB - 1}

    key = jax.random.PRNGKey(0)
    k_par, k_img, k_tok = jax.random.split(key, 3)
    params = init_params(k_par, embedding_dim=EMB_DIM, hidden_dim=HIDDEN,
                         n_head=N_HEAD, n_layer=N_LAYER,
                         vocab_size=VOCAB, max_pos=MAX_POS)

    image_embeddings = jax.random.normal(k_img, (B, S_IMG, EMB_DIM), jnp.float32)
    target_tokens = jax.random.randint(k_tok, (B, T_TGT), 1, VOCAB - 1)

    fwd = jax.jit(lambda img, tok: transformer_decoder_forward(params, cfg, img, tok))
    logits = fwd(image_embeddings, target_tokens)
    jax.block_until_ready(logits)

    assert logits.shape == (B, T_TGT, VOCAB), logits.shape
    assert bool(jnp.all(jnp.isfinite(logits)))
    print("KERNEL_OK")
</pallas_src>

<mosaic_0001>
module attributes {stable_mosaic.version = 11 : i64} {
  func.func @_fused_linear_kernel(%arg0: i32, %arg1: i32, %arg2: i32, %arg3: memref<8x16xf32, #tpu.memory_space<vmem>>, %arg4: memref<16x128xbf16, #tpu.memory_space<vmem>>, %arg5: memref<1x128xf32, #tpu.memory_space<vmem>>, %arg6: memref<8x128xbf16, #tpu.memory_space<vmem>>) attributes {dimension_semantics = [#tpu.dimension_semantics<parallel>, #tpu.dimension_semantics<parallel>, #tpu.dimension_semantics<arbitrary>], iteration_bounds = array<i64: 1, 1, 1>, scalar_prefetch = 0 : i64, scratch_operands = 0 : i64, tpu.core_type = #tpu.core_type<tc>, window_params = [{transform_indices = @transform_0, window_bounds = array<i64: 8, 16>}, {transform_indices = @transform_1, window_bounds = array<i64: 16, 128>}, {transform_indices = @transform_2, window_bounds = array<i64: 1, 128>}, {transform_indices = @transform_3, window_bounds = array<i64: 8, 128>}]} {
    %c0 = arith.constant 0 : index
    %c0_0 = arith.constant 0 : index
    %0 = vector.load %arg3[%c0, %c0_0] : memref<8x16xf32, #tpu.memory_space<vmem>>, vector<8x16xf32>
    %1 = arith.truncf %0 : vector<8x16xf32> to vector<8x16xbf16>
    %c0_1 = arith.constant 0 : index
    %c0_2 = arith.constant 0 : index
    %2 = vector.load %arg4[%c0_1, %c0_2] : memref<16x128xbf16, #tpu.memory_space<vmem>>, vector<16x128xbf16>
    %cst = arith.constant dense<0.000000e+00> : vector<8x128xf32>
    %3 = tpu.matmul %1, %2, %cst {dimension_numbers = #tpu.dot_dimension_numbers<[1], [0], [0], [1], [0, 0, 1, 1], [], []>} : vector<8x16xbf16>, vector<16x128xbf16>, vector<8x128xf32> -> vector<8x128xf32>
    %c0_3 = arith.constant 0 : index
    %c0_4 = arith.constant 0 : index
    %4 = vector.load %arg5[%c0_3, %c0_4] : memref<1x128xf32, #tpu.memory_space<vmem>>, vector<1x128xf32>
    %5 = vector.broadcast %4 : vector<1x128xf32> to vector<8x128xf32>
    %6 = arith.addf %3, %5 : vector<8x128xf32>
    %7 = arith.truncf %6 : vector<8x128xf32> to vector<8x128xbf16>
    %c0_5 = arith.constant 0 : index
    %c0_6 = arith.constant 0 : index
    %8 = vector.load %arg6[%c0_5, %c0_6] : memref<8x128xbf16, #tpu.memory_space<vmem>>, vector<8x128xbf16>
    tpu.vector_store %arg6[%c0_5, %c0_6], %7 {strides = array<i32>} : memref<8x128xbf16, #tpu.memory_space<vmem>>, vector<8x128xbf16>,
    return
  }
  func.func @transform_0(%arg0: i32, %arg1: i32, %arg2: i32) -> (i32, i32) {
    %c0_i32 = arith.constant 0 : i32
    return %arg0, %arg2 : i32, i32
  }
  func.func @transform_1(%arg0: i32, %arg1: i32, %arg2: i32) -> (i32, i32) {
    %c0_i32 = arith.constant 0 : i32
    return %arg2, %arg1 : i32, i32
  }
  func.func @transform_2(%arg0: i32, %arg1: i32, %arg2: i32) -> (i32, i32) {
    %c0_i32 = arith.constant 0 : i32
    %c0_i32_0 = arith.constant 0 : i32
    return %c0_i32, %arg1 : i32, i32
  }
  func.func @transform_3(%arg0: i32, %arg1: i32, %arg2: i32) -> (i32, i32) {
    %c0_i32 = arith.constant 0 : i32
    return %arg0, %arg1 : i32, i32
  }
}

module attributes {stable_mosaic.version = 11 : i64} {
  func.func @_fused_linear_kernel(%arg0: i32, %arg1: i32, %arg2: i32, %arg3: memref<8x128xbf16, #tpu.memory_space<vmem>>, %arg4: memref<128x512xbf16, #tpu.memory_space<vmem>>, %arg5: memref<1x512xf32, #tpu.memory_space<vmem>>, %arg6: memref<8x512xbf16, #tpu.memory_space<vmem>>) attributes {dimension_semantics = [#tpu.dimension_semantics<parallel>, #tpu.dimension_semantics<parallel>, #tpu.dimension_semantics<arbitrary>], iteration_bounds = array<i64: 1, 1, 1>, scalar_prefetch = 0 : i64, scratch_operands = 0 : i64, tpu.core_type = #tpu.core_type<tc>, window_params = [{transform_indices = @transform_0, window_bounds = array<i64: 8, 128>}, {transform_indices = @transform_1, window_bounds = array<i64: 128, 512>}, {transform_indices = @transform_2, window_bounds = array<i64: 1, 512>}, {transform_indices = @transform_3, window_bounds = array<i64: 8, 512>}]} {
    %c0 = arith.constant 0 : index
    %c0_0 = arith.constant 0 : index
    %0 = vector.load %arg3[%c0, %c0_0] : memref<8x128xbf16, #tpu.memory_space<vmem>>, vector<8x128xbf16>
    %c0_1 = arith.constant 0 : index
    %c0_2 = arith.constant 0 : index
    %1 = vector.load %arg4[%c0_1, %c0_2] : memref<128x512xbf16, #tpu.memory_space<vmem>>, vector<128x512xbf16>
    %cst = arith.constant dense<0.000000e+00> : vector<8x512xf32>
    %2 = tpu.matmul %0, %1, %cst {dimension_numbers = #tpu.dot_dimension_numbers<[1], [0], [0], [1], [0, 0, 1, 1], [], []>} : vector<8x128xbf16>, vector<128x512xbf16>, vector<8x512xf32> -> vector<8x512xf32>
    %c0_3 = arith.constant 0 : index
    %c0_4 = arith.constant 0 : index
    %3 = vector.load %arg5[%c0_3, %c0_4] : memref<1x512xf32, #tpu.memory_space<vmem>>, vector<1x512xf32>
    %4 = vector.broadcast %3 : vector<1x512xf32> to vector<8x512xf32>
    %5 = arith.addf %2, %4 : vector<8x512xf32>
    %6 = arith.truncf %5 : vector<8x512xf32> to vector<8x512xbf16>
    %c0_5 = arith.constant 0 : index
    %c0_6 = arith.constant 0 : index
    %7 = vector.load %arg6[%c0_5, %c0_6] : memref<8x512xbf16, #tpu.memory_space<vmem>>, vector<8x512xbf16>
    tpu.vector_store %arg6[%c0_5, %c0_6], %6 {strides = array<i32>} : memref<8x512xbf16, #tpu.memory_space<vmem>>, vector<8x512xbf16>,
    return
  }
  func.func @transform_0(%arg0: i32, %arg1: i32, %arg2: i32) -> (i32, i32) {
    %c0_i32 = arith.constant 0 : i32
    return %arg0, %arg2 : i32, i32
  }
  func.func @transform_1(%arg0: i32, %arg1: i32, %arg2: i32) -> (i32, i32) {
    %c0_i32 = arith.constant 0 : i32
    return %arg2, %arg1 : i32, i32
  }
  func.func @transform_2(%arg0: i32, %arg1: i32, %arg2: i32) -> (i32, i32) {
    %c0_i32 = arith.constant 0 : i32
    %c0_i32_0 = arith.constant 0 : i32
    return %c0_i32, %arg1 : i32, i32
  }
  func.func @transform_3(%arg0: i32, %arg1: i32, %arg2: i32) -> (i32, i32) {
    %c0_i32 = arith.constant 0 : i32
    return %arg0, %arg1 : i32, i32
  }
}

module attributes {stable_mosaic.version = 11 : i64} {
  func.func @_mha_kernel(%arg0: i32, %arg1: i32, %arg2: i32, %arg3: memref<1x8x128xbf16, #tpu.memory_space<vmem>>, %arg4: memref<1x8x128xbf16, #tpu.memory_space<vmem>>, %arg5: memref<1x8x128xbf16, #tpu.memory_space<vmem>>, %arg6: memref<1x8x128xbf16, #tpu.memory_space<vmem>>, %arg7: memref<8x128xf32, #tpu.memory_space<vmem>>) attributes {dimension_semantics = [#tpu.dimension_semantics<parallel>, #tpu.dimension_semantics<parallel>, #tpu.dimension_semantics<parallel>], iteration_bounds = array<i64: 2, 1, 1>, scalar_prefetch = 0 : i64, scratch_operands = 1 : i64, tpu.core_type = #tpu.core_type<tc>, window_params = [{transform_indices = @transform_0, window_bounds = array<i64: 1, 8, 128>}, {transform_indices = @transform_1, window_bounds = array<i64: 1, 8, 128>}, {transform_indices = @transform_2, window_bounds = array<i64: 1, 8, 128>}, {transform_indices = @transform_3, window_bounds = array<i64: 1, 8, 128>}]} {
    %c8_i32 = arith.constant 8 : i32
    %0 = arith.muli %arg2, %c8_i32 : i32
    %1 = tpu.iota {dimensions = array<i32: 0>} : vector<8x8xi32>
    %2 = vector.broadcast %0 : i32 to vector<8x8xi32>
    %3 = arith.addi %1, %2 : vector<8x8xi32>
    %4 = tpu.iota {dimensions = array<i32: 1>} : vector<8x8xi32>
    %5 = arith.cmpi sle, %4, %3 : vector<8x8xi32>
    %cst = arith.constant 0.000000e+00 : f32
    %cst_0 = arith.constant -1.000000e+09 : f32
    %6 = vector.broadcast %cst : f32 to vector<8x8xf32>
    %7 = vector.broadcast %cst_0 : f32 to vector<8x8xf32>
    %8 = arith.select %5, %6, %7 : vector<8x8xi1>, vector<8x8xf32>
    %c0 = arith.constant 0 : index
    %c0_1 = arith.constant 0 : index
    %c0_2 = arith.constant 0 : index
    %9 = vector.load %arg3[%c0, %c0_1, %c0_2] : memref<1x8x128xbf16, #tpu.memory_space<vmem>>, vector<1x8x128xbf16>
    %10 = vector.shape_cast %9 : vector<1x8x128xbf16> to vector<8x128xbf16>
    %c0_3 = arith.constant 0 : index
    %c0_4 = arith.constant 0 : index
    %c0_5 = arith.constant 0 : index
    %11 = vector.load %arg4[%c0_3, %c0_4, %c0_5] : memref<1x8x128xbf16, #tpu.memory_space<vmem>>, vector<1x8x128xbf16>
    %12 = vector.shape_cast %11 : vector<1x8x128xbf16> to vector<8x128xbf16>
    %c0_6 = arith.constant 0 : index
    %c0_7 = arith.constant 0 : index
    %c0_8 = arith.constant 0 : index
    %13 = vector.load %arg5[%c0_6, %c0_7, %c0_8] : memref<1x8x128xbf16, #tpu.memory_space<vmem>>, vector<1x8x128xbf16>
    %14 = vector.shape_cast %13 : vector<1x8x128xbf16> to vector<8x128xbf16>
    %15 = vector.extract_strided_slice %10 {offsets = [0, 0], sizes = [8, 32], strides = [1, 1]} : vector<8x128xbf16> to vector<8x32xbf16>
    %16 = vector.extract_strided_slice %12 {offsets = [0, 0], sizes = [8, 32], strides = [1, 1]} : vector<8x128xbf16> to vector<8x32xbf16>
    %17 = vector.extract_strided_slice %14 {offsets = [0, 0], sizes = [8, 32], strides = [1, 1]} : vector<8x128xbf16> to vector<8x32xbf16>
    %cst_9 = arith.constant dense<0.000000e+00> : vector<8x8xf32>
    %18 = tpu.matmul %15, %16, %cst_9 {dimension_numbers = #tpu.dot_dimension_numbers<[1], [1], [0], [0], [0, 0, 1, 0], [], []>} : vector<8x32xbf16>, vector<8x32xbf16>, vector<8x8xf32> -> vector<8x8xf32>
    %cst_10 = arith.constant 0.176776692 : f32
    %19 = vector.broadcast %cst_10 : f32 to vector<8x8xf32>
    %20 = arith.mulf %18, %19 : vector<8x8xf32>
    %21 = arith.addf %20, %8 : vector<8x8xf32>
    %cst_11 = arith.constant dense<0xFF800000> : vector<8xf32>
    %22 = vector.multi_reduction <maximumf>, %21, %cst_11 [1] : vector<8x8xf32> to vector<8xf32>
    %23 = vector.shape_cast %22 : vector<8xf32> to vector<8x1xf32>
    %24 = vector.broadcast %23 : vector<8x1xf32> to vector<8x8xf32>
    %25 = arith.subf %21, %24 : vector<8x8xf32>
    %26 = math.exp %25 : vector<8x8xf32>
    %cst_12 = arith.constant dense<0.000000e+00> : vector<8xf32>
    %27 = vector.multi_reduction <add>, %26, %cst_12 [1] : vector<8x8xf32> to vector<8xf32>
    %28 = vector.shape_cast %27 : vector<8xf32> to vector<8x1xf32>
    %29 = tpu.reciprocal %28 {approx = true} : vector<8x1xf32> -> vector<8x1xf32>
    %30 = vector.broadcast %29 : vector<8x1xf32> to vector<8x8xf32>
    %31 = arith.mulf %26, %30 : vector<8x8xf32>
    %32 = arith.truncf %31 : vector<8x8xf32> to vector<8x8xbf16>
    %cst_13 = arith.constant dense<0.000000e+00> : vector<8x32xf32>
    %33 = tpu.matmul %32, %17, %cst_13 {dimension_numbers = #tpu.dot_dimension_numbers<[1], [0], [0], [1], [0, 0, 1, 1], [], []>} : vector<8x8xbf16>, vector<8x32xbf16>, vector<8x32xf32> -> vector<8x32xf32>
    %c0_14 = arith.constant 0 : index
    %c0_15 = arith.constant 0 : index
    %34 = vector.load %arg7[%c0_14, %c0_15] : memref<8x128xf32, #tpu.memory_space<vmem>>, vector<8x32xf32>
    tpu.vector_store %arg7[%c0_14, %c0_15], %33 {strides = array<i32>} : memref<8x128xf32, #tpu.memory_space<vmem>>, vector<8x32xf32>,
    %35 = vector.extract_strided_slice %10 {offsets = [0, 32], sizes = [8, 32], strides = [1, 1]} : vector<8x128xbf16> to vector<8x32xbf16>
    %36 = vector.extract_strided_slice %12 {offsets = [0, 32], sizes = [8, 32], strides = [1, 1]} : vector<8x128xbf16> to vector<8x32xbf16>
    %37 = vector.extract_strided_slice %14 {offsets = [0, 32], sizes = [8, 32], strides = [1, 1]} : vector<8x128xbf16> to vector<8x32xbf16>
    %cst_16 = arith.constant dense<0.000000e+00> : vector<8x8xf32>
    %38 = tpu.matmul %35, %36, %cst_16 {dimension_numbers = #tpu.dot_dimension_numbers<[1], [1], [0], [0], [0, 0, 1, 0], [], []>} : vector<8x32xbf16>, vector<8x32xbf16>, vector<8x8xf32> -> vector<8x8xf32>
    %cst_17 = arith.constant 0.176776692 : f32
    %39 = vector.broadcast %cst_17 : f32 to vector<8x8xf32>
    %40 = arith.mulf %38, %39 : vector<8x8xf32>
    %41 = arith.addf %40, %8 : vector<8x8xf32>
    %cst_18 = arith.constant dense<0xFF800000> : vector<8xf32>
    %42 = vector.multi_reduction <maximumf>, %41, %cst_18 [1] : vector<8x8xf32> to vector<8xf32>
    %43 = vector.shape_cast %42 : vector<8xf32> to vector<8x1xf32>
    %44 = vector.broadcast %43 : vector<8x1xf32> to vector<8x8xf32>
    %45 = arith.subf %41, %44 : vector<8x8xf32>
    %46 = math.exp %45 : vector<8x8xf32>
    %cst_19 = arith.constant dense<0.000000e+00> : vector<8xf32>
    %47 = vector.multi_reduction <add>, %46, %cst_19 [1] : vector<8x8xf32> to vector<8xf32>
    %48 = vector.shape_cast %47 : vector<8xf32> to vector<8x1xf32>
    %49 = tpu.reciprocal %48 {approx = true} : vector<8x1xf32> -> vector<8x1xf32>
    %50 = vector.broadcast %49 : vector<8x1xf32> to vector<8x8xf32>
    %51 = arith.mulf %46, %50 : vector<8x8xf32>
    %52 = arith.truncf %51 : vector<8x8xf32> to vector<8x8xbf16>
    %cst_20 = arith.constant dense<0.000000e+00> : vector<8x32xf32>
    %53 = tpu.matmul %52, %37, %cst_20 {dimension_numbers = #tpu.dot_dimension_numbers<[1], [0], [0], [1], [0, 0, 1, 1], [], []>} : vector<8x8xbf16>, vector<8x32xbf16>, vector<8x32xf32> -> vector<8x32xf32>
    %c0_21 = arith.constant 0 : index
    %c32 = arith.constant 32 : index
    %54 = vector.load %arg7[%c0_21, %c32] : memref<8x128xf32, #tpu.memory_space<vmem>>, vector<8x32xf32>
    tpu.vector_store %arg7[%c0_21, %c32], %53 {strides = array<i32>} : memref<8x128xf32, #tpu.memory_space<vmem>>, vector<8x32xf32>,
    %55 = vector.extract_strided_slice %10 {offsets = [0, 64], sizes = [8, 32], strides = [1, 1]} : vector<8x128xbf16> to vector<8x32xbf16>
    %56 = vector.extract_strided_slice %12 {offsets = [0, 64], sizes = [8, 32], strides = [1, 1]} : vector<8x128xbf16> to vector<8x32xbf16>
    %57 = vector.extract_strided_slice %14 {offsets = [0, 64], sizes = [8, 32], strides = [1, 1]} : vector<8x128xbf16> to vector<8x32xbf16>
    %cst_22 = arith.constant dense<0.000000e+00> : vector<8x8xf32>
    %58 = tpu.matmul %55, %56, %cst_22 {dimension_numbers = #tpu.dot_dimension_numbers<[1], [1], [0], [0], [0, 0, 1, 0], [], []>} : vector<8x32xbf16>, vector<8x32xbf16>, vector<8x8xf32> -> vector<8x8xf32>
    %cst_23 = arith.constant 0.176776692 : f32
    %59 = vector.broadcast %cst_23 : f32 to vector<8x8xf32>
    %60 = arith.mulf %58, %59 : vector<8x8xf32>
    %61 = arith.addf %60, %8 : vector<8x8xf32>
    %cst_24 = arith.constant dense<0xFF800000> : vector<8xf32>
    %62 = vector.multi_reduction <maximumf>, %61, %cst_24 [1] : vector<8x8xf32> to vector<8xf32>
    %63 = vector.shape_cast %62 : vector<8xf32> to vector<8x1xf32>
    %64 = vector.broadcast %63 : vector<8x1xf32> to vector<8x8xf32>
    %65 = arith.subf %61, %64 : vector<8x8xf32>
    %66 = math.exp %65 : vector<8x8xf32>
    %cst_25 = arith.constant dense<0.000000e+00> : vector<8xf32>
    %67 = vector.multi_reduction <add>, %66, %cst_25 [1] : vector<8x8xf32> to vector<8xf32>
    %68 = vector.shape_cast %67 : vector<8xf32> to vector<8x1xf32>
    %69 = tpu.reciprocal %68 {approx = true} : vector<8x1xf32> -> vector<8x1xf32>
    %70 = vector.broadcast %69 : vector<8x1xf32> to vector<8x8xf32>
    %71 = arith.mulf %66, %70 : vector<8x8xf32>
    %72 = arith.truncf %71 : vector<8x8xf32> to vector<8x8xbf16>
    %cst_26 = arith.constant dense<0.000000e+00> : vector<8x32xf32>
    %73 = tpu.matmul %72, %57, %cst_26 {dimension_numbers = #tpu.dot_dimension_numbers<[1], [0], [0], [1], [0, 0, 1, 1], [], []>} : vector<8x8xbf16>, vector<8x32xbf16>, vector<8x32xf32> -> vector<8x32xf32>
    %c0_27 = arith.constant 0 : index
    %c64 = arith.constant 64 : index
    %74 = vector.load %arg7[%c0_27, %c64] : memref<8x128xf32, #tpu.memory_space<vmem>>, vector<8x32xf32>
    tpu.vector_store %arg7[%c0_27, %c64], %73 {strides = array<i32>} : memref<8x128xf32, #tpu.memory_space<vmem>>, vector<8x32xf32>,
    %75 = vector.extract_strided_slice %10 {offsets = [0, 96], sizes = [8, 32], strides = [1, 1]} : vector<8x128xbf16> to vector<8x32xbf16>
    %76 = vector.extract_strided_slice %12 {offsets = [0, 96], sizes = [8, 32], strides = [1, 1]} : vector<8x128xbf16> to vector<8x32xbf16>
    %77 = vector.extract_strided_slice %14 {offsets = [0, 96], sizes = [8, 32], strides = [1, 1]} : vector<8x128xbf16> to vector<8x32xbf16>
    %cst_28 = arith.constant dense<0.000000e+00> : vector<8x8xf32>
    %78 = tpu.matmul %75, %76, %cst_28 {dimension_numbers = #tpu.dot_dimension_numbers<[1], [1], [0], [0], [0, 0, 1, 0], [], []>} : vector<8x32xbf16>, vector<8x32xbf16>, vector<8x8xf32> -> vector<8x8xf32>
    %cst_29 = arith.constant 0.176776692 : f32
    %79 = vector.broadcast %cst_29 : f32 to vector<8x8xf32>
    %80 = arith.mulf %78, %79 : vector<8x8xf32>
    %81 = arith.addf %80, %8 : vector<8x8xf32>
    %cst_30 = arith.constant dense<0xFF800000> : vector<8xf32>
    %82 = vector.multi_reduction <maximumf>, %81, %cst_30 [1] : vector<8x8xf32> to vector<8xf32>
    %83 = vector.shape_cast %82 : vector<8xf32> to vector<8x1xf32>
    %84 = vector.broadcast %83 : vector<8x1xf32> to vector<8x8xf32>
    %85 = arith.subf %81, %84 : vector<8x8xf32>
    %86 = math.exp %85 : vector<8x8xf32>
    %cst_31 = arith.constant dense<0.000000e+00> : vector<8xf32>
    %87 = vector.multi_reduction <add>, %86, %cst_31 [1] : vector<8x8xf32> to vector<8xf32>
    %88 = vector.shape_cast %87 : vector<8xf32> to vector<8x1xf32>
    %89 = tpu.reciprocal %88 {approx = true} : vector<8x1xf32> -> vector<8x1xf32>
    %90 = vector.broadcast %89 : vector<8x1xf32> to vector<8x8xf32>
    %91 = arith.mulf %86, %90 : vector<8x8xf32>
    %92 = arith.truncf %91 : vector<8x8xf32> to vector<8x8xbf16>
    %cst_32 = arith.constant dense<0.000000e+00> : vector<8x32xf32>
    %93 = tpu.matmul %92, %77, %cst_32 {dimension_numbers = #tpu.dot_dimension_numbers<[1], [0], [0], [1], [0, 0, 1, 1], [], []>} : vector<8x8xbf16>, vector<8x32xbf16>, vector<8x32xf32> -> vector<8x32xf32>
    %c0_33 = arith.constant 0 : index
    %c96 = arith.constant 96 : index
    %94 = vector.load %arg7[%c0_33, %c96] : memref<8x128xf32, #tpu.memory_space<vmem>>, vector<8x32xf32>
    tpu.vector_store %arg7[%c0_33, %c96], %93 {strides = array<i32>} : memref<8x128xf32, #tpu.memory_space<vmem>>, vector<8x32xf32>,
    %c0_34 = arith.constant 0 : index
    %c0_35 = arith.constant 0 : index
    %95 = vector.load %arg7[%c0_34, %c0_35] : memref<8x128xf32, #tpu.memory_space<vmem>>, vector<8x128xf32>
    %96 = arith.truncf %95 : vector<8x128xf32> to vector<8x128xbf16>
    %c0_36 = arith.constant 0 : index
    %c0_37 = arith.constant 0 : index
    %c0_38 = arith.constant 0 : index
    %97 = vector.load %arg6[%c0_36, %c0_37, %c0_38] : memref<1x8x128xbf16, #tpu.memory_space<vmem>>, vector<1x8x128xbf16>
    %98 = vector.shape_cast %97 : vector<1x8x128xbf16> to vector<8x128xbf16>
    %99 = vector.shape_cast %96 : vector<8x128xbf16> to vector<1x8x128xbf16>
    tpu.vector_store %arg6[%c0_36, %c0_37, %c0_38], %99 {strides = array<i32>} : memref<1x8x128xbf16, #tpu.memory_space<vmem>>, vector<1x8x128xbf16>,
    return
  }
  func.func @transform_0(%arg0: i32, %arg1: i32, %arg2: i32) -> (i32, i32, i32) {
    %c0_i32 = arith.constant 0 : i32
    %0 = arith.addi %c0_i32, %arg1 : i32
    %c0_i32_0 = arith.constant 0 : i32
    return %arg0, %arg2, %0 : i32, i32, i32
  }
  func.func @transform_1(%arg0: i32, %arg1: i32, %arg2: i32) -> (i32, i32, i32) {
    %c1_i32 = arith.constant 1 : i32
    %0 = arith.addi %c1_i32, %arg1 : i32
    %c0_i32 = arith.constant 0 : i32
    %c0_i32_0 = arith.constant 0 : i32
    return %arg0, %c0_i32, %0 : i32, i32, i32
  }
  func.func @transform_2(%arg0: i32, %arg1: i32, %arg2: i32) -> (i32, i32, i32) {
    %c2_i32 = arith.constant 2 : i32
    %0 = arith.addi %c2_i32, %arg1 : i32
    %c0_i32 = arith.constant 0 : i32
    %c0_i32_0 = arith.constant 0 : i32
    return %arg0, %c0_i32, %0 : i32, i32, i32
  }
  func.func @transform_3(%arg0: i32, %arg1: i32, %arg2: i32) -> (i32, i32, i32) {
    %c0_i32 = arith.constant 0 : i32
    return %arg0, %arg2, %arg1 : i32, i32, i32
  }
}

module attributes {stable_mosaic.version = 11 : i64} {
  func.func @_fused_linear_kernel(%arg0: i32, %arg1: i32, %arg2: i32, %arg3: memref<16x128xf32, #tpu.memory_space<vmem>>, %arg4: memref<128x384xbf16, #tpu.memory_space<vmem>>, %arg5: memref<1x384xf32, #tpu.memory_space<vmem>>, %arg6: memref<16x384xbf16, #tpu.memory_space<vmem>>) attributes {dimension_semantics = [#tpu.dimension_semantics<parallel>, #tpu.dimension_semantics<parallel>, #tpu.dimension_semantics<arbitrary>], iteration_bounds = array<i64: 1, 2, 1>, scalar_prefetch = 0 : i64, scratch_operands = 0 : i64, tpu.core_type = #tpu.core_type<tc>, window_params = [{transform_indices = @transform_0, window_bounds = array<i64: 16, 128>}, {transform_indices = @transform_1, window_bounds = array<i64: 128, 384>}, {transform_indices = @transform_2, window_bounds = array<i64: 1, 384>}, {transform_indices = @transform_3, window_bounds = array<i64: 16, 384>}]} {
    %c0 = arith.constant 0 : index
    %c0_0 = arith.constant 0 : index
    %0 = vector.load %arg3[%c0, %c0_0] : memref<16x128xf32, #tpu.memory_space<vmem>>, vector<16x128xf32>
    %1 = arith.truncf %0 : vector<16x128xf32> to vector<16x128xbf16>
    %c0_1 = arith.constant 0 : index
    %c0_2 = arith.constant 0 : index
    %2 = vector.load %arg4[%c0_1, %c0_2] : memref<128x384xbf16, #tpu.memory_space<vmem>>, vector<128x384xbf16>
    %cst = arith.constant dense<0.000000e+00> : vector<16x384xf32>
    %3 = tpu.matmul %1, %2, %cst {dimension_numbers = #tpu.dot_dimension_numbers<[1], [0], [0], [1], [0, 0, 1, 1], [], []>} : vector<16x128xbf16>, vector<128x384xbf16>, vector<16x384xf32> -> vector<16x384xf32>
    %c0_3 = arith.constant 0 : index
    %c0_4 = arith.constant 0 : index
    %4 = vector.load %arg5[%c0_3, %c0_4] : memref<1x384xf32, #tpu.memory_space<vmem>>, vector<1x384xf32>
    %5 = vector.broadcast %4 : vector<1x384xf32> to vector<16x384xf32>
    %6 = arith.addf %3, %5 : vector<16x384xf32>
    %7 = arith.truncf %6 : vector<16x384xf32> to vector<16x384xbf16>
    %c0_5 = arith.constant 0 : index
    %c0_6 = arith.constant 0 : index
    %8 = vector.load %arg6[%c0_5, %c0_6] : memref<16x384xbf16, #tpu.memory_space<vmem>>, vector<16x384xbf16>
    tpu.vector_store %arg6[%c0_5, %c0_6], %7 {strides = array<i32>} : memref<16x384xbf16, #tpu.memory_space<vmem>>, vector<16x384xbf16>,
    return
  }
  func.func @transform_0(%arg0: i32, %arg1: i32, %arg2: i32) -> (i32, i32) {
    %c0_i32 = arith.constant 0 : i32
    return %arg0, %arg2 : i32, i32
  }
  func.func @transform_1(%arg0: i32, %arg1: i32, %arg2: i32) -> (i32, i32) {
    %c0_i32 = arith.constant 0 : i32
    return %arg2, %arg1 : i32, i32
  }
  func.func @transform_2(%arg0: i32, %arg1: i32, %arg2: i32) -> (i32, i32) {
    %c0_i32 = arith.constant 0 : i32
    %c0_i32_0 = arith.constant 0 : i32
    return %c0_i32, %arg1 : i32, i32
  }
  func.func @transform_3(%arg0: i32, %arg1: i32, %arg2: i32) -> (i32, i32) {
    %c0_i32 = arith.constant 0 : i32
    return %arg0, %arg1 : i32, i32
  }
}

module attributes {stable_mosaic.version = 11 : i64} {
  func.func @_fused_linear_kernel(%arg0: i32, %arg1: i32, %arg2: i32, %arg3: memref<16x128xbf16, #tpu.memory_space<vmem>>, %arg4: memref<128x128xbf16, #tpu.memory_space<vmem>>, %arg5: memref<1x128xf32, #tpu.memory_space<vmem>>, %arg6: memref<16x128xbf16, #tpu.memory_space<vmem>>) attributes {dimension_semantics = [#tpu.dimension_semantics<parallel>, #tpu.dimension_semantics<parallel>, #tpu.dimension_semantics<arbitrary>], iteration_bounds = array<i64: 1, 1, 1>, scalar_prefetch = 0 : i64, scratch_operands = 0 : i64, tpu.core_type = #tpu.core_type<tc>, window_params = [{transform_indices = @transform_0, window_bounds = array<i64: 16, 128>}, {transform_indices = @transform_1, window_bounds = array<i64: 128, 128>}, {transform_indices = @transform_2, window_bounds = array<i64: 1, 128>}, {transform_indices = @transform_3, window_bounds = array<i64: 16, 128>}]} {
    %c0 = arith.constant 0 : index
    %c0_0 = arith.constant 0 : index
    %0 = vector.load %arg3[%c0, %c0_0] : memref<16x128xbf16, #tpu.memory_space<vmem>>, vector<16x128xbf16>
    %c0_1 = arith.constant 0 : index
    %c0_2 = arith.constant 0 : index
    %1 = vector.load %arg4[%c0_1, %c0_2] : memref<128x128xbf16, #tpu.memory_space<vmem>>, vector<128x128xbf16>
    %cst = arith.constant dense<0.000000e+00> : vector<16x128xf32>
    %2 = tpu.matmul %0, %1, %cst {dimension_numbers = #tpu.dot_dimension_numbers<[1], [0], [0], [1], [0, 0, 1, 1], [], []>} : vector<16x128xbf16>, vector<128x128xbf16>, vector<16x128xf32> -> vector<16x128xf32>
    %c0_3 = arith.constant 0 : index
    %c0_4 = arith.constant 0 : index
    %3 = vector.load %arg5[%c0_3, %c0_4] : memref<1x128xf32, #tpu.memory_space<vmem>>, vector<1x128xf32>
    %4 = vector.broadcast %3 : vector<1x128xf32> to vector<16x128xf32>
    %5 = arith.addf %2, %4 : vector<16x128xf32>
    %6 = arith.truncf %5 : vector<16x128xf32> to vector<16x128xbf16>
    %c0_5 = arith.constant 0 : index
    %c0_6 = arith.constant 0 : index
    %7 = vector.load %arg6[%c0_5, %c0_6] : memref<16x128xbf16, #tpu.memory_space<vmem>>, vector<16x128xbf16>
    tpu.vector_store %arg6[%c0_5, %c0_6], %6 {strides = array<i32>} : memref<16x128xbf16, #tpu.memory_space<vmem>>, vector<16x128xbf16>,
    return
  }
  func.func @transform_0(%arg0: i32, %arg1: i32, %arg2: i32) -> (i32, i32) {
    %c0_i32 = arith.constant 0 : i32
    return %arg0, %arg2 : i32, i32
  }
  func.func @transform_1(%arg0: i32, %arg1: i32, %arg2: i32) -> (i32, i32) {
    %c0_i32 = arith.constant 0 : i32
    return %arg2, %arg1 : i32, i32
  }
  func.func @transform_2(%arg0: i32, %arg1: i32, %arg2: i32) -> (i32, i32) {
    %c0_i32 = arith.constant 0 : i32
    %c0_i32_0 = arith.constant 0 : i32
    return %c0_i32, %arg1 : i32, i32
  }
  func.func @transform_3(%arg0: i32, %arg1: i32, %arg2: i32) -> (i32, i32) {
    %c0_i32 = arith.constant 0 : i32
    return %arg0, %arg1 : i32, i32
  }
}

module attributes {stable_mosaic.version = 11 : i64} {
  func.func @_mha_kernel(%arg0: i32, %arg1: i32, %arg2: i32, %arg3: memref<1x8x128xbf16, #tpu.memory_space<vmem>>, %arg4: memref<1x8x128xbf16, #tpu.memory_space<vmem>>, %arg5: memref<1x8x128xbf16, #tpu.memory_space<vmem>>, %arg6: memref<1x8x128xbf16, #tpu.memory_space<vmem>>, %arg7: memref<8x128xf32, #tpu.memory_space<vmem>>) attributes {dimension_semantics = [#tpu.dimension_semantics<parallel>, #tpu.dimension_semantics<parallel>, #tpu.dimension_semantics<parallel>], iteration_bounds = array<i64: 2, 1, 1>, scalar_prefetch = 0 : i64, scratch_operands = 1 : i64, tpu.core_type = #tpu.core_type<tc>, window_params = [{transform_indices = @transform_0, window_bounds = array<i64: 1, 8, 128>}, {transform_indices = @transform_1, window_bounds = array<i64: 1, 8, 128>}, {transform_indices = @transform_2, window_bounds = array<i64: 1, 8, 128>}, {transform_indices = @transform_3, window_bounds = array<i64: 1, 8, 128>}]} {
    %c8_i32 = arith.constant 8 : i32
    %0 = arith.muli %arg2, %c8_i32 : i32
    %1 = tpu.iota {dimensions = array<i32: 0>} : vector<8x8xi32>
    %2 = vector.broadcast %0 : i32 to vector<8x8xi32>
    %3 = arith.addi %1, %2 : vector<8x8xi32>
    %4 = tpu.iota {dimensions = array<i32: 1>} : vector<8x8xi32>
    %5 = arith.cmpi sle, %4, %3 : vector<8x8xi32>
    %cst = arith.constant 0.000000e+00 : f32
    %cst_0 = arith.constant -1.000000e+09 : f32
    %6 = vector.broadcast %cst : f32 to vector<8x8xf32>
    %7 = vector.broadcast %cst_0 : f32 to vector<8x8xf32>
    %8 = arith.select %5, %6, %7 : vector<8x8xi1>, vector<8x8xf32>
    %c0 = arith.constant 0 : index
    %c0_1 = arith.constant 0 : index
    %c0_2 = arith.constant 0 : index
    %9 = vector.load %arg3[%c0, %c0_1, %c0_2] : memref<1x8x128xbf16, #tpu.memory_space<vmem>>, vector<1x8x128xbf16>
    %10 = vector.shape_cast %9 : vector<1x8x128xbf16> to vector<8x128xbf16>
    %c0_3 = arith.constant 0 : index
    %c0_4 = arith.constant 0 : index
    %c0_5 = arith.constant 0 : index
    %11 = vector.load %arg4[%c0_3, %c0_4, %c0_5] : memref<1x8x128xbf16, #tpu.memory_space<vmem>>, vector<1x8x128xbf16>
    %12 = vector.shape_cast %11 : vector<1x8x128xbf16> to vector<8x128xbf16>
    %c0_6 = arith.constant 0 : index
    %c0_7 = arith.constant 0 : index
    %c0_8 = arith.constant 0 : index
    %13 = vector.load %arg5[%c0_6, %c0_7, %c0_8] : memref<1x8x128xbf16, #tpu.memory_space<vmem>>, vector<1x8x128xbf16>
    %14 = vector.shape_cast %13 : vector<1x8x128xbf16> to vector<8x128xbf16>
    %15 = vector.extract_strided_slice %10 {offsets = [0, 0], sizes = [8, 32], strides = [1, 1]} : vector<8x128xbf16> to vector<8x32xbf16>
    %16 = vector.extract_strided_slice %12 {offsets = [0, 0], sizes = [8, 32], strides = [1, 1]} : vector<8x128xbf16> to vector<8x32xbf16>
    %17 = vector.extract_strided_slice %14 {offsets = [0, 0], sizes = [8, 32], strides = [1, 1]} : vector<8x128xbf16> to vector<8x32xbf16>
    %cst_9 = arith.constant dense<0.000000e+00> : vector<8x8xf32>
    %18 = tpu.matmul %15, %16, %cst_9 {dimension_numbers = #tpu.dot_dimension_numbers<[1], [1], [0], [0], [0, 0, 1, 0], [], []>} : vector<8x32xbf16>, vector<8x32xbf16>, vector<8x8xf32> -> vector<8x8xf32>
    %cst_10 = arith.constant 0.176776692 : f32
    %19 = vector.broadcast %cst_10 : f32 to vector<8x8xf32>
    %20 = arith.mulf %18, %19 : vector<8x8xf32>
    %21 = arith.addf %20, %8 : vector<8x8xf32>
    %cst_11 = arith.constant dense<0xFF800000> : vector<8xf32>
    %22 = vector.multi_reduction <maximumf>, %21, %cst_11 [1] : vector<8x8xf32> to vector<8xf32>
    %23 = vector.shape_cast %22 : vector<8xf32> to vector<8x1xf32>
    %24 = vector.broadcast %23 : vector<8x1xf32> to vector<8x8xf32>
    %25 = arith.subf %21, %24 : vector<8x8xf32>
    %26 = math.exp %25 : vector<8x8xf32>
    %cst_12 = arith.constant dense<0.000000e+00> : vector<8xf32>
    %27 = vector.multi_reduction <add>, %26, %cst_12 [1] : vector<8x8xf32> to vector<8xf32>
    %28 = vector.shape_cast %27 : vector<8xf32> to vector<8x1xf32>
    %29 = tpu.reciprocal %28 {approx = true} : vector<8x1xf32> -> vector<8x1xf32>
    %30 = vector.broadcast %29 : vector<8x1xf32> to vector<8x8xf32>
    %31 = arith.mulf %26, %30 : vector<8x8xf32>
    %32 = arith.truncf %31 : vector<8x8xf32> to vector<8x8xbf16>
    %cst_13 = arith.constant dense<0.000000e+00> : vector<8x32xf32>
    %33 = tpu.matmul %32, %17, %cst_13 {dimension_numbers = #tpu.dot_dimension_numbers<[1], [0], [0], [1], [0, 0, 1, 1], [], []>} : vector<8x8xbf16>, vector<8x32xbf16>, vector<8x32xf32> -> vector<8x32xf32>
    %c0_14 = arith.constant 0 : index
    %c0_15 = arith.constant 0 : index
    %34 = vector.load %arg7[%c0_14, %c0_15] : memref<8x128xf32, #tpu.memory_space<vmem>>, vector<8x32xf32>
    tpu.vector_store %arg7[%c0_14, %c0_15], %33 {strides = array<i32>} : memref<8x128xf32, #tpu.memory_space<vmem>>, vector<8x32xf32>,
    %35 = vector.extract_strided_slice %10 {offsets = [0, 32], sizes = [8, 32], strides = [1, 1]} : vector<8x128xbf16> to vector<8x32xbf16>
    %36 = vector.extract_strided_slice %12 {offsets = [0, 32], sizes = [8, 32], strides = [1, 1]} : vector<8x128xbf16> to vector<8x32xbf16>
    %37 = vector.extract_strided_slice %14 {offsets = [0, 32], sizes = [8, 32], strides = [1, 1]} : vector<8x128xbf16> to vector<8x32xbf16>
    %cst_16 = arith.constant dense<0.000000e+00> : vector<8x8xf32>
    %38 = tpu.matmul %35, %36, %cst_16 {dimension_numbers = #tpu.dot_dimension_numbers<[1], [1], [0], [0], [0, 0, 1, 0], [], []>} : vector<8x32xbf16>, vector<8x32xbf16>, vector<8x8xf32> -> vector<8x8xf32>
    %cst_17 = arith.constant 0.176776692 : f32
    %39 = vector.broadcast %cst_17 : f32 to vector<8x8xf32>
    %40 = arith.mulf %38, %39 : vector<8x8xf32>
    %41 = arith.addf %40, %8 : vector<8x8xf32>
    %cst_18 = arith.constant dense<0xFF800000> : vector<8xf32>
    %42 = vector.multi_reduction <maximumf>, %41, %cst_18 [1] : vector<8x8xf32> to vector<8xf32>
    %43 = vector.shape_cast %42 : vector<8xf32> to vector<8x1xf32>
    %44 = vector.broadcast %43 : vector<8x1xf32> to vector<8x8xf32>
    %45 = arith.subf %41, %44 : vector<8x8xf32>
    %46 = math.exp %45 : vector<8x8xf32>
    %cst_19 = arith.constant dense<0.000000e+00> : vector<8xf32>
    %47 = vector.multi_reduction <add>, %46, %cst_19 [1] : vector<8x8xf32> to vector<8xf32>
    %48 = vector.shape_cast %47 : vector<8xf32> to vector<8x1xf32>
    %49 = tpu.reciprocal %48 {approx = true} : vector<8x1xf32> -> vector<8x1xf32>
    %50 = vector.broadcast %49 : vector<8x1xf32> to vector<8x8xf32>
    %51 = arith.mulf %46, %50 : vector<8x8xf32>
    %52 = arith.truncf %51 : vector<8x8xf32> to vector<8x8xbf16>
    %cst_20 = arith.constant dense<0.000000e+00> : vector<8x32xf32>
    %53 = tpu.matmul %52, %37, %cst_20 {dimension_numbers = #tpu.dot_dimension_numbers<[1], [0], [0], [1], [0, 0, 1, 1], [], []>} : vector<8x8xbf16>, vector<8x32xbf16>, vector<8x32xf32> -> vector<8x32xf32>
    %c0_21 = arith.constant 0 : index
    %c32 = arith.constant 32 : index
    %54 = vector.load %arg7[%c0_21, %c32] : memref<8x128xf32, #tpu.memory_space<vmem>>, vector<8x32xf32>
    tpu.vector_store %arg7[%c0_21, %c32], %53 {strides = array<i32>} : memref<8x128xf32, #tpu.memory_space<vmem>>, vector<8x32xf32>,
    %55 = vector.extract_strided_slice %10 {offsets = [0, 64], sizes = [8, 32], strides = [1, 1]} : vector<8x128xbf16> to vector<8x32xbf16>
    %56 = vector.extract_strided_slice %12 {offsets = [0, 64], sizes = [8, 32], strides = [1, 1]} : vector<8x128xbf16> to vector<8x32xbf16>
    %57 = vector.extract_strided_slice %14 {offsets = [0, 64], sizes = [8, 32], strides = [1, 1]} : vector<8x128xbf16> to vector<8x32xbf16>
    %cst_22 = arith.constant dense<0.000000e+00> : vector<8x8xf32>
    %58 = tpu.matmul %55, %56, %cst_22 {dimension_numbers = #tpu.dot_dimension_numbers<[1], [1], [0], [0], [0, 0, 1, 0], [], []>} : vector<8x32xbf16>, vector<8x32xbf16>, vector<8x8xf32> -> vector<8x8xf32>
    %cst_23 = arith.constant 0.176776692 : f32
    %59 = vector.broadcast %cst_23 : f32 to vector<8x8xf32>
    %60 = arith.mulf %58, %59 : vector<8x8xf32>
    %61 = arith.addf %60, %8 : vector<8x8xf32>
    %cst_24 = arith.constant dense<0xFF800000> : vector<8xf32>
    %62 = vector.multi_reduction <maximumf>, %61, %cst_24 [1] : vector<8x8xf32> to vector<8xf32>
    %63 = vector.shape_cast %62 : vector<8xf32> to vector<8x1xf32>
    %64 = vector.broadcast %63 : vector<8x1xf32> to vector<8x8xf32>
    %65 = arith.subf %61, %64 : vector<8x8xf32>
    %66 = math.exp %65 : vector<8x8xf32>
    %cst_25 = arith.constant dense<0.000000e+00> : vector<8xf32>
    %67 = vector.multi_reduction <add>, %66, %cst_25 [1] : vector<8x8xf32> to vector<8xf32>
    %68 = vector.shape_cast %67 : vector<8xf32> to vector<8x1xf32>
    %69 = tpu.reciprocal %68 {approx = true} : vector<8x1xf32> -> vector<8x1xf32>
    %70 = vector.broadcast %69 : vector<8x1xf32> to vector<8x8xf32>
    %71 = arith.mulf %66, %70 : vector<8x8xf32>
    %72 = arith.truncf %71 : vector<8x8xf32> to vector<8x8xbf16>
    %cst_26 = arith.constant dense<0.000000e+00> : vector<8x32xf32>
    %73 = tpu.matmul %72, %57, %cst_26 {dimension_numbers = #tpu.dot_dimension_numbers<[1], [0], [0], [1], [0, 0, 1, 1], [], []>} : vector<8x8xbf16>, vector<8x32xbf16>, vector<8x32xf32> -> vector<8x32xf32>
    %c0_27 = arith.constant 0 : index
    %c64 = arith.constant 64 : index
    %74 = vector.load %arg7[%c0_27, %c64] : memref<8x128xf32, #tpu.memory_space<vmem>>, vector<8x32xf32>
    tpu.vector_store %arg7[%c0_27, %c64], %73 {strides = array<i32>} : memref<8x128xf32, #tpu.memory_space<vmem>>, vector<8x32xf32>,
    %75 = vector.extract_strided_slice %10 {offsets = [0, 96], sizes = [8, 32], strides = [1, 1]} : vector<8x128xbf16> to vector<8x32xbf16>
    %76 = vector.extract_strided_slice %12 {offsets = [0, 96], sizes = [8, 32], strides = [1, 1]} : vector<8x128xbf16> to vector<8x32xbf16>
    %77 = vector.extract_strided_slice %14 {offsets = [0, 96], sizes = [8, 32], strides = [1, 1]} : vector<8x128xbf16> to vector<8x32xbf16>
    %cst_28 = arith.constant dense<0.000000e+00> : vector<8x8xf32>
    %78 = tpu.matmul %75, %76, %cst_28 {dimension_numbers = #tpu.dot_dimension_numbers<[1], [1], [0], [0], [0, 0, 1, 0], [], []>} : vector<8x32xbf16>, vector<8x32xbf16>, vector<8x8xf32> -> vector<8x8xf32>
    %cst_29 = arith.constant 0.176776692 : f32
    %79 = vector.broadcast %cst_29 : f32 to vector<8x8xf32>
    %80 = arith.mulf %78, %79 : vector<8x8xf32>
    %81 = arith.addf %80, %8 : vector<8x8xf32>
    %cst_30 = arith.constant dense<0xFF800000> : vector<8xf32>
    %82 = vector.multi_reduction <maximumf>, %81, %cst_30 [1] : vector<8x8xf32> to vector<8xf32>
    %83 = vector.shape_cast %82 : vector<8xf32> to vector<8x1xf32>
    %84 = vector.broadcast %83 : vector<8x1xf32> to vector<8x8xf32>
    %85 = arith.subf %81, %84 : vector<8x8xf32>
    %86 = math.exp %85 : vector<8x8xf32>
    %cst_31 = arith.constant dense<0.000000e+00> : vector<8xf32>
    %87 = vector.multi_reduction <add>, %86, %cst_31 [1] : vector<8x8xf32> to vector<8xf32>
    %88 = vector.shape_cast %87 : vector<8xf32> to vector<8x1xf32>
    %89 = tpu.reciprocal %88 {approx = true} : vector<8x1xf32> -> vector<8x1xf32>
    %90 = vector.broadcast %89 : vector<8x1xf32> to vector<8x8xf32>
    %91 = arith.mulf %86, %90 : vector<8x8xf32>
    %92 = arith.truncf %91 : vector<8x8xf32> to vector<8x8xbf16>
    %cst_32 = arith.constant dense<0.000000e+00> : vector<8x32xf32>
    %93 = tpu.matmul %92, %77, %cst_32 {dimension_numbers = #tpu.dot_dimension_numbers<[1], [0], [0], [1], [0, 0, 1, 1], [], []>} : vector<8x8xbf16>, vector<8x32xbf16>, vector<8x32xf32> -> vector<8x32xf32>
    %c0_33 = arith.constant 0 : index
    %c96 = arith.constant 96 : index
    %94 = vector.load %arg7[%c0_33, %c96] : memref<8x128xf32, #tpu.memory_space<vmem>>, vector<8x32xf32>
    tpu.vector_store %arg7[%c0_33, %c96], %93 {strides = array<i32>} : memref<8x128xf32, #tpu.memory_space<vmem>>, vector<8x32xf32>,
    %c0_34 = arith.constant 0 : index
    %c0_35 = arith.constant 0 : index
    %95 = vector.load %arg7[%c0_34, %c0_35] : memref<8x128xf32, #tpu.memory_space<vmem>>, vector<8x128xf32>
    %96 = arith.truncf %95 : vector<8x128xf32> to vector<8x128xbf16>
    %c0_36 = arith.constant 0 : index
    %c0_37 = arith.constant 0 : index
    %c0_38 = arith.constant 0 : index
    %97 = vector.load %arg6[%c0_36, %c0_37, %c0_38] : memref<1x8x128xbf16, #tpu.memory_space<vmem>>, vector<1x8x128xbf16>
    %98 = vector.shape_cast %97 : vector<1x8x128xbf16> to vector<8x128xbf16>
    %99 = vector.shape_cast %96 : vector<8x128xbf16> to vector<1x8x128xbf16>
    tpu.vector_store %arg6[%c0_36, %c0_37, %c0_38], %99 {strides = array<i32>} : memref<1x8x128xbf16, #tpu.memory_space<vmem>>, vector<1x8x128xbf16>,
    return
  }
  func.func @transform_0(%arg0: i32, %arg1: i32, %arg2: i32) -> (i32, i32, i32) {
    %c3_i32 = arith.constant 3 : i32
    %0 = arith.addi %c3_i32, %arg1 : i32
    %c0_i32 = arith.constant 0 : i32
    return %arg0, %arg2, %0 : i32, i32, i32
  }
  func.func @transform_1(%arg0: i32, %arg1: i32, %arg2: i32) -> (i32, i32, i32) {
    %c4_i32 = arith.constant 4 : i32
    %0 = arith.addi %c4_i32, %arg1 : i32
    %c0_i32 = arith.constant 0 : i32
    %c0_i32_0 = arith.constant 0 : i32
    return %arg0, %c0_i32, %0 : i32, i32, i32
  }
  func.func @transform_2(%arg0: i32, %arg1: i32, %arg2: i32) -> (i32, i32, i32) {
    %c5_i32 = arith.constant 5 : i32
    %0 = arith.addi %c5_i32, %arg1 : i32
    %c0_i32 = arith.constant 0 : i32
    %c0_i32_0 = arith.constant 0 : i32
    return %arg0, %c0_i32, %0 : i32, i32, i32
  }
  func.func @transform_3(%arg0: i32, %arg1: i32, %arg2: i32) -> (i32, i32, i32) {
    %c0_i32 = arith.constant 0 : i32
    return %arg0, %arg2, %arg1 : i32, i32, i32
  }
}

module attributes {stable_mosaic.version = 11 : i64} {
  func.func @_mha_kernel(%arg0: i32, %arg1: i32, %arg2: i32, %arg3: memref<1x8x128xbf16, #tpu.memory_space<vmem>>, %arg4: memref<1x4x128xbf16, #tpu.memory_space<vmem>>, %arg5: memref<1x4x128xbf16, #tpu.memory_space<vmem>>, %arg6: memref<1x8x128xbf16, #tpu.memory_space<vmem>>, %arg7: memref<8x128xf32, #tpu.memory_space<vmem>>) attributes {dimension_semantics = [#tpu.dimension_semantics<parallel>, #tpu.dimension_semantics<parallel>, #tpu.dimension_semantics<parallel>], iteration_bounds = array<i64: 2, 1, 1>, scalar_prefetch = 0 : i64, scratch_operands = 1 : i64, tpu.core_type = #tpu.core_type<tc>, window_params = [{transform_indices = @transform_0, window_bounds = array<i64: 1, 8, 128>}, {transform_indices = @transform_1, window_bounds = array<i64: 1, 4, 128>}, {transform_indices = @transform_2, window_bounds = array<i64: 1, 4, 128>}, {transform_indices = @transform_3, window_bounds = array<i64: 1, 8, 128>}]} {
    %c0 = arith.constant 0 : index
    %c0_0 = arith.constant 0 : index
    %c0_1 = arith.constant 0 : index
    %0 = vector.load %arg3[%c0, %c0_0, %c0_1] : memref<1x8x128xbf16, #tpu.memory_space<vmem>>, vector<1x8x128xbf16>
    %1 = vector.shape_cast %0 : vector<1x8x128xbf16> to vector<8x128xbf16>
    %c0_2 = arith.constant 0 : index
    %c0_3 = arith.constant 0 : index
    %c0_4 = arith.constant 0 : index
    %2 = vector.load %arg4[%c0_2, %c0_3, %c0_4] : memref<1x4x128xbf16, #tpu.memory_space<vmem>>, vector<1x4x128xbf16>
    %3 = vector.shape_cast %2 : vector<1x4x128xbf16> to vector<4x128xbf16>
    %c0_5 = arith.constant 0 : index
    %c0_6 = arith.constant 0 : index
    %c0_7 = arith.constant 0 : index
    %4 = vector.load %arg5[%c0_5, %c0_6, %c0_7] : memref<1x4x128xbf16, #tpu.memory_space<vmem>>, vector<1x4x128xbf16>
    %5 = vector.shape_cast %4 : vector<1x4x128xbf16> to vector<4x128xbf16>
    %6 = vector.extract_strided_slice %1 {offsets = [0, 0], sizes = [8, 32], strides = [1, 1]} : vector<8x128xbf16> to vector<8x32xbf16>
    %7 = vector.extract_strided_slice %3 {offsets = [0, 0], sizes = [4, 32], strides = [1, 1]} : vector<4x128xbf16> to vector<4x32xbf16>
    %8 = vector.extract_strided_slice %5 {offsets = [0, 0], sizes = [4, 32], strides = [1, 1]} : vector<4x128xbf16> to vector<4x32xbf16>
    %cst = arith.constant dense<0.000000e+00> : vector<8x4xf32>
    %9 = tpu.matmul %6, %7, %cst {dimension_numbers = #tpu.dot_dimension_numbers<[1], [1], [0], [0], [0, 0, 1, 0], [], []>} : vector<8x32xbf16>, vector<4x32xbf16>, vector<8x4xf32> -> vector<8x4xf32>
    %cst_8 = arith.constant 0.176776692 : f32
    %10 = vector.broadcast %cst_8 : f32 to vector<8x4xf32>
    %11 = arith.mulf %9, %10 : vector<8x4xf32>
    %cst_9 = arith.constant dense<0xFF800000> : vector<8xf32>
    %12 = vector.multi_reduction <maximumf>, %11, %cst_9 [1] : vector<8x4xf32> to vector<8xf32>
    %13 = vector.shape_cast %12 : vector<8xf32> to vector<8x1xf32>
    %14 = vector.broadcast %13 : vector<8x1xf32> to vector<8x4xf32>
    %15 = arith.subf %11, %14 : vector<8x4xf32>
    %16 = math.exp %15 : vector<8x4xf32>
    %cst_10 = arith.constant dense<0.000000e+00> : vector<8xf32>
    %17 = vector.multi_reduction <add>, %16, %cst_10 [1] : vector<8x4xf32> to vector<8xf32>
    %18 = vector.shape_cast %17 : vector<8xf32> to vector<8x1xf32>
    %19 = tpu.reciprocal %18 {approx = true} : vector<8x1xf32> -> vector<8x1xf32>
    %20 = vector.broadcast %19 : vector<8x1xf32> to vector<8x4xf32>
    %21 = arith.mulf %16, %20 : vector<8x4xf32>
    %22 = arith.truncf %21 : vector<8x4xf32> to vector<8x4xbf16>
    %cst_11 = arith.constant dense<0.000000e+00> : vector<8x32xf32>
    %23 = tpu.matmul %22, %8, %cst_11 {dimension_numbers = #tpu.dot_dimension_numbers<[1], [0], [0], [1], [0, 0, 1, 1], [], []>} : vector<8x4xbf16>, vector<4x32xbf16>, vector<8x32xf32> -> vector<8x32xf32>
    %c0_12 = arith.constant 0 : index
    %c0_13 = arith.constant 0 : index
    %24 = vector.load %arg7[%c0_12, %c0_13] : memref<8x128xf32, #tpu.memory_space<vmem>>, vector<8x32xf32>
    tpu.vector_store %arg7[%c0_12, %c0_13], %23 {strides = array<i32>} : memref<8x128xf32, #tpu.memory_space<vmem>>, vector<8x32xf32>,
    %25 = vector.extract_strided_slice %1 {offsets = [0, 32], sizes = [8, 32], strides = [1, 1]} : vector<8x128xbf16> to vector<8x32xbf16>
    %26 = vector.extract_strided_slice %3 {offsets = [0, 32], sizes = [4, 32], strides = [1, 1]} : vector<4x128xbf16> to vector<4x32xbf16>
    %27 = vector.extract_strided_slice %5 {offsets = [0, 32], sizes = [4, 32], strides = [1, 1]} : vector<4x128xbf16> to vector<4x32xbf16>
    %cst_14 = arith.constant dense<0.000000e+00> : vector<8x4xf32>
    %28 = tpu.matmul %25, %26, %cst_14 {dimension_numbers = #tpu.dot_dimension_numbers<[1], [1], [0], [0], [0, 0, 1, 0], [], []>} : vector<8x32xbf16>, vector<4x32xbf16>, vector<8x4xf32> -> vector<8x4xf32>
    %cst_15 = arith.constant 0.176776692 : f32
    %29 = vector.broadcast %cst_15 : f32 to vector<8x4xf32>
    %30 = arith.mulf %28, %29 : vector<8x4xf32>
    %cst_16 = arith.constant dense<0xFF800000> : vector<8xf32>
    %31 = vector.multi_reduction <maximumf>, %30, %cst_16 [1] : vector<8x4xf32> to vector<8xf32>
    %32 = vector.shape_cast %31 : vector<8xf32> to vector<8x1xf32>
    %33 = vector.broadcast %32 : vector<8x1xf32> to vector<8x4xf32>
    %34 = arith.subf %30, %33 : vector<8x4xf32>
    %35 = math.exp %34 : vector<8x4xf32>
    %cst_17 = arith.constant dense<0.000000e+00> : vector<8xf32>
    %36 = vector.multi_reduction <add>, %35, %cst_17 [1] : vector<8x4xf32> to vector<8xf32>
    %37 = vector.shape_cast %36 : vector<8xf32> to vector<8x1xf32>
    %38 = tpu.reciprocal %37 {approx = true} : vector<8x1xf32> -> vector<8x1xf32>
    %39 = vector.broadcast %38 : vector<8x1xf32> to vector<8x4xf32>
    %40 = arith.mulf %35, %39 : vector<8x4xf32>
    %41 = arith.truncf %40 : vector<8x4xf32> to vector<8x4xbf16>
    %cst_18 = arith.constant dense<0.000000e+00> : vector<8x32xf32>
    %42 = tpu.matmul %41, %27, %cst_18 {dimension_numbers = #tpu.dot_dimension_numbers<[1], [0], [0], [1], [0, 0, 1, 1], [], []>} : vector<8x4xbf16>, vector<4x32xbf16>, vector<8x32xf32> -> vector<8x32xf32>
    %c0_19 = arith.constant 0 : index
    %c32 = arith.constant 32 : index
    %43 = vector.load %arg7[%c0_19, %c32] : memref<8x128xf32, #tpu.memory_space<vmem>>, vector<8x32xf32>
    tpu.vector_store %arg7[%c0_19, %c32], %42 {strides = array<i32>} : memref<8x128xf32, #tpu.memory_space<vmem>>, vector<8x32xf32>,
    %44 = vector.extract_strided_slice %1 {offsets = [0, 64], sizes = [8, 32], strides = [1, 1]} : vector<8x128xbf16> to vector<8x32xbf16>
    %45 = vector.extract_strided_slice %3 {offsets = [0, 64], sizes = [4, 32], strides = [1, 1]} : vector<4x128xbf16> to vector<4x32xbf16>
    %46 = vector.extract_strided_slice %5 {offsets = [0, 64], sizes = [4, 32], strides = [1, 1]} : vector<4x128xbf16> to vector<4x32xbf16>
    %cst_20 = arith.constant dense<0.000000e+00> : vector<8x4xf32>
    %47 = tpu.matmul %44, %45, %cst_20 {dimension_numbers = #tpu.dot_dimension_numbers<[1], [1], [0], [0], [0, 0, 1, 0], [], []>} : vector<8x32xbf16>, vector<4x32xbf16>, vector<8x4xf32> -> vector<8x4xf32>
    %cst_21 = arith.constant 0.176776692 : f32
    %48 = vector.broadcast %cst_21 : f32 to vector<8x4xf32>
    %49 = arith.mulf %47, %48 : vector<8x4xf32>
    %cst_22 = arith.constant dense<0xFF800000> : vector<8xf32>
    %50 = vector.multi_reduction <maximumf>, %49, %cst_22 [1] : vector<8x4xf32> to vector<8xf32>
    %51 = vector.shape_cast %50 : vector<8xf32> to vector<8x1xf32>
    %52 = vector.broadcast %51 : vector<8x1xf32> to vector<8x4xf32>
    %53 = arith.subf %49, %52 : vector<8x4xf32>
    %54 = math.exp %53 : vector<8x4xf32>
    %cst_23 = arith.constant dense<0.000000e+00> : vector<8xf32>
    %55 = vector.multi_reduction <add>, %54, %cst_23 [1] : vector<8x4xf32> to vector<8xf32>
    %56 = vector.shape_cast %55 : vector<8xf32> to vector<8x1xf32>
    %57 = tpu.reciprocal %56 {approx = true} : vector<8x1xf32> -> vector<8x1xf32>
    %58 = vector.broadcast %57 : vector<8x1xf32> to vector<8x4xf32>
    %59 = arith.mulf %54, %58 : vector<8x4xf32>
    %60 = arith.truncf %59 : vector<8x4xf32> to vector<8x4xbf16>
    %cst_24 = arith.constant dense<0.000000e+00> : vector<8x32xf32>
    %61 = tpu.matmul %60, %46, %cst_24 {dimension_numbers = #tpu.dot_dimension_numbers<[1], [0], [0], [1], [0, 0, 1, 1], [], []>} : vector<8x4xbf16>, vector<4x32xbf16>, vector<8x32xf32> -> vector<8x32xf32>
    %c0_25 = arith.constant 0 : index
    %c64 = arith.constant 64 : index
    %62 = vector.load %arg7[%c0_25, %c64] : memref<8x128xf32, #tpu.memory_space<vmem>>, vector<8x32xf32>
    tpu.vector_store %arg7[%c0_25, %c64], %61 {strides = array<i32>} : memref<8x128xf32, #tpu.memory_space<vmem>>, vector<8x32xf32>,
    %63 = vector.extract_strided_slice %1 {offsets = [0, 96], sizes = [8, 32], strides = [1, 1]} : vector<8x128xbf16> to vector<8x32xbf16>
    %64 = vector.extract_strided_slice %3 {offsets = [0, 96], sizes = [4, 32], strides = [1, 1]} : vector<4x128xbf16> to vector<4x32xbf16>
    %65 = vector.extract_strided_slice %5 {offsets = [0, 96], sizes = [4, 32], strides = [1, 1]} : vector<4x128xbf16> to vector<4x32xbf16>
    %cst_26 = arith.constant dense<0.000000e+00> : vector<8x4xf32>
    %66 = tpu.matmul %63, %64, %cst_26 {dimension_numbers = #tpu.dot_dimension_numbers<[1], [1], [0], [0], [0, 0, 1, 0], [], []>} : vector<8x32xbf16>, vector<4x32xbf16>, vector<8x4xf32> -> vector<8x4xf32>
    %cst_27 = arith.constant 0.176776692 : f32
    %67 = vector.broadcast %cst_27 : f32 to vector<8x4xf32>
    %68 = arith.mulf %66, %67 : vector<8x4xf32>
    %cst_28 = arith.constant dense<0xFF800000> : vector<8xf32>
    %69 = vector.multi_reduction <maximumf>, %68, %cst_28 [1] : vector<8x4xf32> to vector<8xf32>
    %70 = vector.shape_cast %69 : vector<8xf32> to vector<8x1xf32>
    %71 = vector.broadcast %70 : vector<8x1xf32> to vector<8x4xf32>
    %72 = arith.subf %68, %71 : vector<8x4xf32>
    %73 = math.exp %72 : vector<8x4xf32>
    %cst_29 = arith.constant dense<0.000000e+00> : vector<8xf32>
    %74 = vector.multi_reduction <add>, %73, %cst_29 [1] : vector<8x4xf32> to vector<8xf32>
    %75 = vector.shape_cast %74 : vector<8xf32> to vector<8x1xf32>
    %76 = tpu.reciprocal %75 {approx = true} : vector<8x1xf32> -> vector<8x1xf32>
    %77 = vector.broadcast %76 : vector<8x1xf32> to vector<8x4xf32>
    %78 = arith.mulf %73, %77 : vector<8x4xf32>
    %79 = arith.truncf %78 : vector<8x4xf32> to vector<8x4xbf16>
    %cst_30 = arith.constant dense<0.000000e+00> : vector<8x32xf32>
    %80 = tpu.matmul %79, %65, %cst_30 {dimension_numbers = #tpu.dot_dimension_numbers<[1], [0], [0], [1], [0, 0, 1, 1], [], []>} : vector<8x4xbf16>, vector<4x32xbf16>, vector<8x32xf32> -> vector<8x32xf32>
    %c0_31 = arith.constant 0 : index
    %c96 = arith.constant 96 : index
    %81 = vector.load %arg7[%c0_31, %c96] : memref<8x128xf32, #tpu.memory_space<vmem>>, vector<8x32xf32>
    tpu.vector_store %arg7[%c0_31, %c96], %80 {strides = array<i32>} : memref<8x128xf32, #tpu.memory_space<vmem>>, vector<8x32xf32>,
    %c0_32 = arith.constant 0 : index
    %c0_33 = arith.constant 0 : index
    %82 = vector.load %arg7[%c0_32, %c0_33] : memref<8x128xf32, #tpu.memory_space<vmem>>, vector<8x128xf32>
    %83 = arith.truncf %82 : vector<8x128xf32> to vector<8x128xbf16>
    %c0_34 = arith.constant 0 : index
    %c0_35 = arith.constant 0 : index
    %c0_36 = arith.constant 0 : index
    %84 = vector.load %arg6[%c0_34, %c0_35, %c0_36] : memref<1x8x128xbf16, #tpu.memory_space<vmem>>, vector<1x8x128xbf16>
    %85 = vector.shape_cast %84 : vector<1x8x128xbf16> to vector<8x128xbf16>
    %86 = vector.shape_cast %83 : vector<8x128xbf16> to vector<1x8x128xbf16>
    tpu.vector_store %arg6[%c0_34, %c0_35, %c0_36], %86 {strides = array<i32>} : memref<1x8x128xbf16, #tpu.memory_space<vmem>>, vector<1x8x128xbf16>,
    return
  }
  func.func @transform_0(%arg0: i32, %arg1: i32, %arg2: i32) -> (i32, i32, i32) {
    %c0_i32 = arith.constant 0 : i32
    %0 = arith.addi %c0_i32, %arg1 : i32
    %c0_i32_0 = arith.constant 0 : i32
    return %arg0, %arg2, %0 : i32, i32, i32
  }
  func.func @transform_1(%arg0: i32, %arg1: i32, %arg2: i32) -> (i32, i32, i32) {
    %c0_i32 = arith.constant 0 : i32
    %0 = arith.addi %c0_i32, %arg1 : i32
    %c0_i32_0 = arith.constant 0 : i32
    %c0_i32_1 = arith.constant 0 : i32
    return %arg0, %c0_i32_0, %0 : i32, i32, i32
  }
  func.func @transform_2(%arg0: i32, %arg1: i32, %arg2: i32) -> (i32, i32, i32) {
    %c1_i32 = arith.constant 1 : i32
    %0 = arith.addi %c1_i32, %arg1 : i32
    %c0_i32 = arith.constant 0 : i32
    %c0_i32_0 = arith.constant 0 : i32
    return %arg0, %c0_i32, %0 : i32, i32, i32
  }
  func.func @transform_3(%arg0: i32, %arg1: i32, %arg2: i32) -> (i32, i32, i32) {
    %c0_i32 = arith.constant 0 : i32
    return %arg0, %arg2, %arg1 : i32, i32, i32
  }
}

module attributes {stable_mosaic.version = 11 : i64} {
  func.func @_mha_kernel(%arg0: i32, %arg1: i32, %arg2: i32, %arg3: memref<1x8x128xbf16, #tpu.memory_space<vmem>>, %arg4: memref<1x4x128xbf16, #tpu.memory_space<vmem>>, %arg5: memref<1x4x128xbf16, #tpu.memory_space<vmem>>, %arg6: memref<1x8x128xbf16, #tpu.memory_space<vmem>>, %arg7: memref<8x128xf32, #tpu.memory_space<vmem>>) attributes {dimension_semantics = [#tpu.dimension_semantics<parallel>, #tpu.dimension_semantics<parallel>, #tpu.dimension_semantics<parallel>], iteration_bounds = array<i64: 2, 1, 1>, scalar_prefetch = 0 : i64, scratch_operands = 1 : i64, tpu.core_type = #tpu.core_type<tc>, window_params = [{transform_indices = @transform_0, window_bounds = array<i64: 1, 8, 128>}, {transform_indices = @transform_1, window_bounds = array<i64: 1, 4, 128>}, {transform_indices = @transform_2, window_bounds = array<i64: 1, 4, 128>}, {transform_indices = @transform_3, window_bounds = array<i64: 1, 8, 128>}]} {
    %c0 = arith.constant 0 : index
    %c0_0 = arith.constant 0 : index
    %c0_1 = arith.constant 0 : index
    %0 = vector.load %arg3[%c0, %c0_0, %c0_1] : memref<1x8x128xbf16, #tpu.memory_space<vmem>>, vector<1x8x128xbf16>
    %1 = vector.shape_cast %0 : vector<1x8x128xbf16> to vector<8x128xbf16>
    %c0_2 = arith.constant 0 : index
    %c0_3 = arith.constant 0 : index
    %c0_4 = arith.constant 0 : index
    %2 = vector.load %arg4[%c0_2, %c0_3, %c0_4] : memref<1x4x128xbf16, #tpu.memory_space<vmem>>, vector<1x4x128xbf16>
    %3 = vector.shape_cast %2 : vector<1x4x128xbf16> to vector<4x128xbf16>
    %c0_5 = arith.constant 0 : index
    %c0_6 = arith.constant 0 : index
    %c0_7 = arith.constant 0 : index
    %4 = vector.load %arg5[%c0_5, %c0_6, %c0_7] : memref<1x4x128xbf16, #tpu.memory_space<vmem>>, vector<1x4x128xbf16>
    %5 = vector.shape_cast %4 : vector<1x4x128xbf16> to vector<4x128xbf16>
    %6 = vector.extract_strided_slice %1 {offsets = [0, 0], sizes = [8, 32], strides = [1, 1]} : vector<8x128xbf16> to vector<8x32xbf16>
    %7 = vector.extract_strided_slice %3 {offsets = [0, 0], sizes = [4, 32], strides = [1, 1]} : vector<4x128xbf16> to vector<4x32xbf16>
    %8 = vector.extract_strided_slice %5 {offsets = [0, 0], sizes = [4, 32], strides = [1, 1]} : vector<4x128xbf16> to vector<4x32xbf16>
    %cst = arith.constant dense<0.000000e+00> : vector<8x4xf32>
    %9 = tpu.matmul %6, %7, %cst {dimension_numbers = #tpu.dot_dimension_numbers<[1], [1], [0], [0], [0, 0, 1, 0], [], []>} : vector<8x32xbf16>, vector<4x32xbf16>, vector<8x4xf32> -> vector<8x4xf32>
    %cst_8 = arith.constant 0.176776692 : f32
    %10 = vector.broadcast %cst_8 : f32 to vector<8x4xf32>
    %11 = arith.mulf %9, %10 : vector<8x4xf32>
    %cst_9 = arith.constant dense<0xFF800000> : vector<8xf32>
    %12 = vector.multi_reduction <maximumf>, %11, %cst_9 [1] : vector<8x4xf32> to vector<8xf32>
    %13 = vector.shape_cast %12 : vector<8xf32> to vector<8x1xf32>
    %14 = vector.broadcast %13 : vector<8x1xf32> to vector<8x4xf32>
    %15 = arith.subf %11, %14 : vector<8x4xf32>
    %16 = math.exp %15 : vector<8x4xf32>
    %cst_10 = arith.constant dense<0.000000e+00> : vector<8xf32>
    %17 = vector.multi_reduction <add>, %16, %cst_10 [1] : vector<8x4xf32> to vector<8xf32>
    %18 = vector.shape_cast %17 : vector<8xf32> to vector<8x1xf32>
    %19 = tpu.reciprocal %18 {approx = true} : vector<8x1xf32> -> vector<8x1xf32>
    %20 = vector.broadcast %19 : vector<8x1xf32> to vector<8x4xf32>
    %21 = arith.mulf %16, %20 : vector<8x4xf32>
    %22 = arith.truncf %21 : vector<8x4xf32> to vector<8x4xbf16>
    %cst_11 = arith.constant dense<0.000000e+00> : vector<8x32xf32>
    %23 = tpu.matmul %22, %8, %cst_11 {dimension_numbers = #tpu.dot_dimension_numbers<[1], [0], [0], [1], [0, 0, 1, 1], [], []>} : vector<8x4xbf16>, vector<4x32xbf16>, vector<8x32xf32> -> vector<8x32xf32>
    %c0_12 = arith.constant 0 : index
    %c0_13 = arith.constant 0 : index
    %24 = vector.load %arg7[%c0_12, %c0_13] : memref<8x128xf32, #tpu.memory_space<vmem>>, vector<8x32xf32>
    tpu.vector_store %arg7[%c0_12, %c0_13], %23 {strides = array<i32>} : memref<8x128xf32, #tpu.memory_space<vmem>>, vector<8x32xf32>,
    %25 = vector.extract_strided_slice %1 {offsets = [0, 32], sizes = [8, 32], strides = [1, 1]} : vector<8x128xbf16> to vector<8x32xbf16>
    %26 = vector.extract_strided_slice %3 {offsets = [0, 32], sizes = [4, 32], strides = [1, 1]} : vector<4x128xbf16> to vector<4x32xbf16>
    %27 = vector.extract_strided_slice %5 {offsets = [0, 32], sizes = [4, 32], strides = [1, 1]} : vector<4x128xbf16> to vector<4x32xbf16>
    %cst_14 = arith.constant dense<0.000000e+00> : vector<8x4xf32>
    %28 = tpu.matmul %25, %26, %cst_14 {dimension_numbers = #tpu.dot_dimension_numbers<[1], [1], [0], [0], [0, 0, 1, 0], [], []>} : vector<8x32xbf16>, vector<4x32xbf16>, vector<8x4xf32> -> vector<8x4xf32>
    %cst_15 = arith.constant 0.176776692 : f32
    %29 = vector.broadcast %cst_15 : f32 to vector<8x4xf32>
    %30 = arith.mulf %28, %29 : vector<8x4xf32>
    %cst_16 = arith.constant dense<0xFF800000> : vector<8xf32>
    %31 = vector.multi_reduction <maximumf>, %30, %cst_16 [1] : vector<8x4xf32> to vector<8xf32>
    %32 = vector.shape_cast %31 : vector<8xf32> to vector<8x1xf32>
    %33 = vector.broadcast %32 : vector<8x1xf32> to vector<8x4xf32>
    %34 = arith.subf %30, %33 : vector<8x4xf32>
    %35 = math.exp %34 : vector<8x4xf32>
    %cst_17 = arith.constant dense<0.000000e+00> : vector<8xf32>
    %36 = vector.multi_reduction <add>, %35, %cst_17 [1] : vector<8x4xf32> to vector<8xf32>
    %37 = vector.shape_cast %36 : vector<8xf32> to vector<8x1xf32>
    %38 = tpu.reciprocal %37 {approx = true} : vector<8x1xf32> -> vector<8x1xf32>
    %39 = vector.broadcast %38 : vector<8x1xf32> to vector<8x4xf32>
    %40 = arith.mulf %35, %39 : vector<8x4xf32>
    %41 = arith.truncf %40 : vector<8x4xf32> to vector<8x4xbf16>
    %cst_18 = arith.constant dense<0.000000e+00> : vector<8x32xf32>
    %42 = tpu.matmul %41, %27, %cst_18 {dimension_numbers = #tpu.dot_dimension_numbers<[1], [0], [0], [1], [0, 0, 1, 1], [], []>} : vector<8x4xbf16>, vector<4x32xbf16>, vector<8x32xf32> -> vector<8x32xf32>
    %c0_19 = arith.constant 0 : index
    %c32 = arith.constant 32 : index
    %43 = vector.load %arg7[%c0_19, %c32] : memref<8x128xf32, #tpu.memory_space<vmem>>, vector<8x32xf32>
    tpu.vector_store %arg7[%c0_19, %c32], %42 {strides = array<i32>} : memref<8x128xf32, #tpu.memory_space<vmem>>, vector<8x32xf32>,
    %44 = vector.extract_strided_slice %1 {offsets = [0, 64], sizes = [8, 32], strides = [1, 1]} : vector<8x128xbf16> to vector<8x32xbf16>
    %45 = vector.extract_strided_slice %3 {offsets = [0, 64], sizes = [4, 32], strides = [1, 1]} : vector<4x128xbf16> to vector<4x32xbf16>
    %46 = vector.extract_strided_slice %5 {offsets = [0, 64], sizes = [4, 32], strides = [1, 1]} : vector<4x128xbf16> to vector<4x32xbf16>
    %cst_20 = arith.constant dense<0.000000e+00> : vector<8x4xf32>
    %47 = tpu.matmul %44, %45, %cst_20 {dimension_numbers = #tpu.dot_dimension_numbers<[1], [1], [0], [0], [0, 0, 1, 0], [], []>} : vector<8x32xbf16>, vector<4x32xbf16>, vector<8x4xf32> -> vector<8x4xf32>
    %cst_21 = arith.constant 0.176776692 : f32
    %48 = vector.broadcast %cst_21 : f32 to vector<8x4xf32>
    %49 = arith.mulf %47, %48 : vector<8x4xf32>
    %cst_22 = arith.constant dense<0xFF800000> : vector<8xf32>
    %50 = vector.multi_reduction <maximumf>, %49, %cst_22 [1] : vector<8x4xf32> to vector<8xf32>
    %51 = vector.shape_cast %50 : vector<8xf32> to vector<8x1xf32>
    %52 = vector.broadcast %51 : vector<8x1xf32> to vector<8x4xf32>
    %53 = arith.subf %49, %52 : vector<8x4xf32>
    %54 = math.exp %53 : vector<8x4xf32>
    %cst_23 = arith.constant dense<0.000000e+00> : vector<8xf32>
    %55 = vector.multi_reduction <add>, %54, %cst_23 [1] : vector<8x4xf32> to vector<8xf32>
    %56 = vector.shape_cast %55 : vector<8xf32> to vector<8x1xf32>
    %57 = tpu.reciprocal %56 {approx = true} : vector<8x1xf32> -> vector<8x1xf32>
    %58 = vector.broadcast %57 : vector<8x1xf32> to vector<8x4xf32>
    %59 = arith.mulf %54, %58 : vector<8x4xf32>
    %60 = arith.truncf %59 : vector<8x4xf32> to vector<8x4xbf16>
    %cst_24 = arith.constant dense<0.000000e+00> : vector<8x32xf32>
    %61 = tpu.matmul %60, %46, %cst_24 {dimension_numbers = #tpu.dot_dimension_numbers<[1], [0], [0], [1], [0, 0, 1, 1], [], []>} : vector<8x4xbf16>, vector<4x32xbf16>, vector<8x32xf32> -> vector<8x32xf32>
    %c0_25 = arith.constant 0 : index
    %c64 = arith.constant 64 : index
    %62 = vector.load %arg7[%c0_25, %c64] : memref<8x128xf32, #tpu.memory_space<vmem>>, vector<8x32xf32>
    tpu.vector_store %arg7[%c0_25, %c64], %61 {strides = array<i32>} : memref<8x128xf32, #tpu.memory_space<vmem>>, vector<8x32xf32>,
    %63 = vector.extract_strided_slice %1 {offsets = [0, 96], sizes = [8, 32], strides = [1, 1]} : vector<8x128xbf16> to vector<8x32xbf16>
    %64 = vector.extract_strided_slice %3 {offsets = [0, 96], sizes = [4, 32], strides = [1, 1]} : vector<4x128xbf16> to vector<4x32xbf16>
    %65 = vector.extract_strided_slice %5 {offsets = [0, 96], sizes = [4, 32], strides = [1, 1]} : vector<4x128xbf16> to vector<4x32xbf16>
    %cst_26 = arith.constant dense<0.000000e+00> : vector<8x4xf32>
    %66 = tpu.matmul %63, %64, %cst_26 {dimension_numbers = #tpu.dot_dimension_numbers<[1], [1], [0], [0], [0, 0, 1, 0], [], []>} : vector<8x32xbf16>, vector<4x32xbf16>, vector<8x4xf32> -> vector<8x4xf32>
    %cst_27 = arith.constant 0.176776692 : f32
    %67 = vector.broadcast %cst_27 : f32 to vector<8x4xf32>
    %68 = arith.mulf %66, %67 : vector<8x4xf32>
    %cst_28 = arith.constant dense<0xFF800000> : vector<8xf32>
    %69 = vector.multi_reduction <maximumf>, %68, %cst_28 [1] : vector<8x4xf32> to vector<8xf32>
    %70 = vector.shape_cast %69 : vector<8xf32> to vector<8x1xf32>
    %71 = vector.broadcast %70 : vector<8x1xf32> to vector<8x4xf32>
    %72 = arith.subf %68, %71 : vector<8x4xf32>
    %73 = math.exp %72 : vector<8x4xf32>
    %cst_29 = arith.constant dense<0.000000e+00> : vector<8xf32>
    %74 = vector.multi_reduction <add>, %73, %cst_29 [1] : vector<8x4xf32> to vector<8xf32>
    %75 = vector.shape_cast %74 : vector<8xf32> to vector<8x1xf32>
    %76 = tpu.reciprocal %75 {approx = true} : vector<8x1xf32> -> vector<8x1xf32>
    %77 = vector.broadcast %76 : vector<8x1xf32> to vector<8x4xf32>
    %78 = arith.mulf %73, %77 : vector<8x4xf32>
    %79 = arith.truncf %78 : vector<8x4xf32> to vector<8x4xbf16>
    %cst_30 = arith.constant dense<0.000000e+00> : vector<8x32xf32>
    %80 = tpu.matmul %79, %65, %cst_30 {dimension_numbers = #tpu.dot_dimension_numbers<[1], [0], [0], [1], [0, 0, 1, 1], [], []>} : vector<8x4xbf16>, vector<4x32xbf16>, vector<8x32xf32> -> vector<8x32xf32>
    %c0_31 = arith.constant 0 : index
    %c96 = arith.constant 96 : index
    %81 = vector.load %arg7[%c0_31, %c96] : memref<8x128xf32, #tpu.memory_space<vmem>>, vector<8x32xf32>
    tpu.vector_store %arg7[%c0_31, %c96], %80 {strides = array<i32>} : memref<8x128xf32, #tpu.memory_space<vmem>>, vector<8x32xf32>,
    %c0_32 = arith.constant 0 : index
    %c0_33 = arith.constant 0 : index
    %82 = vector.load %arg7[%c0_32, %c0_33] : memref<8x128xf32, #tpu.memory_space<vmem>>, vector<8x128xf32>
    %83 = arith.truncf %82 : vector<8x128xf32> to vector<8x128xbf16>
    %c0_34 = arith.constant 0 : index
    %c0_35 = arith.constant 0 : index
    %c0_36 = arith.constant 0 : index
    %84 = vector.load %arg6[%c0_34, %c0_35, %c0_36] : memref<1x8x128xbf16, #tpu.memory_space<vmem>>, vector<1x8x128xbf16>
    %85 = vector.shape_cast %84 : vector<1x8x128xbf16> to vector<8x128xbf16>
    %86 = vector.shape_cast %83 : vector<8x128xbf16> to vector<1x8x128xbf16>
    tpu.vector_store %arg6[%c0_34, %c0_35, %c0_36], %86 {strides = array<i32>} : memref<1x8x128xbf16, #tpu.memory_space<vmem>>, vector<1x8x128xbf16>,
    return
  }
  func.func @transform_0(%arg0: i32, %arg1: i32, %arg2: i32) -> (i32, i32, i32) {
    %c0_i32 = arith.constant 0 : i32
    %0 = arith.addi %c0_i32, %arg1 : i32
    %c0_i32_0 = arith.constant 0 : i32
    return %arg0, %arg2, %0 : i32, i32, i32
  }
  func.func @transform_1(%arg0: i32, %arg1: i32, %arg2: i32) -> (i32, i32, i32) {
    %c2_i32 = arith.constant 2 : i32
    %0 = arith.addi %c2_i32, %arg1 : i32
    %c0_i32 = arith.constant 0 : i32
    %c0_i32_0 = arith.constant 0 : i32
    return %arg0, %c0_i32, %0 : i32, i32, i32
  }
  func.func @transform_2(%arg0: i32, %arg1: i32, %arg2: i32) -> (i32, i32, i32) {
    %c3_i32 = arith.constant 3 : i32
    %0 = arith.addi %c3_i32, %arg1 : i32
    %c0_i32 = arith.constant 0 : i32
    %c0_i32_0 = arith.constant 0 : i32
    return %arg0, %c0_i32, %0 : i32, i32, i32
  }
  func.func @transform_3(%arg0: i32, %arg1: i32, %arg2: i32) -> (i32, i32, i32) {
    %c0_i32 = arith.constant 0 : i32
    return %arg0, %arg2, %arg1 : i32, i32, i32
  }
}

module attributes {stable_mosaic.version = 11 : i64} {
  func.func @_fused_linear_kernel(%arg0: i32, %arg1: i32, %arg2: i32, %arg3: memref<16x128xbf16, #tpu.memory_space<vmem>>, %arg4: memref<128x128xbf16, #tpu.memory_space<vmem>>, %arg5: memref<1x128xf32, #tpu.memory_space<vmem>>, %arg6: memref<16x128xf32, #tpu.memory_space<vmem>>, %arg7: memref<16x128xf32, #tpu.memory_space<vmem>>) attributes {dimension_semantics = [#tpu.dimension_semantics<parallel>, #tpu.dimension_semantics<parallel>, #tpu.dimension_semantics<arbitrary>], iteration_bounds = array<i64: 1, 1, 1>, scalar_prefetch = 0 : i64, scratch_operands = 0 : i64, tpu.core_type = #tpu.core_type<tc>, window_params = [{transform_indices = @transform_0, window_bounds = array<i64: 16, 128>}, {transform_indices = @transform_1, window_bounds = array<i64: 128, 128>}, {transform_indices = @transform_2, window_bounds = array<i64: 1, 128>}, {transform_indices = @transform_3, window_bounds = array<i64: 16, 128>}, {transform_indices = @transform_4, window_bounds = array<i64: 16, 128>}]} {
    %c0 = arith.constant 0 : index
    %c0_0 = arith.constant 0 : index
    %0 = vector.load %arg3[%c0, %c0_0] : memref<16x128xbf16, #tpu.memory_space<vmem>>, vector<16x128xbf16>
    %c0_1 = arith.constant 0 : index
    %c0_2 = arith.constant 0 : index
    %1 = vector.load %arg4[%c0_1, %c0_2] : memref<128x128xbf16, #tpu.memory_space<vmem>>, vector<128x128xbf16>
    %cst = arith.constant dense<0.000000e+00> : vector<16x128xf32>
    %2 = tpu.matmul %0, %1, %cst {dimension_numbers = #tpu.dot_dimension_numbers<[1], [0], [0], [1], [0, 0, 1, 1], [], []>} : vector<16x128xbf16>, vector<128x128xbf16>, vector<16x128xf32> -> vector<16x128xf32>
    %c0_3 = arith.constant 0 : index
    %c0_4 = arith.constant 0 : index
    %3 = vector.load %arg5[%c0_3, %c0_4] : memref<1x128xf32, #tpu.memory_space<vmem>>, vector<1x128xf32>
    %4 = vector.broadcast %3 : vector<1x128xf32> to vector<16x128xf32>
    %5 = arith.addf %2, %4 : vector<16x128xf32>
    %c0_5 = arith.constant 0 : index
    %c0_6 = arith.constant 0 : index
    %6 = vector.load %arg6[%c0_5, %c0_6] : memref<16x128xf32, #tpu.memory_space<vmem>>, vector<16x128xf32>
    %7 = arith.addf %5, %6 : vector<16x128xf32>
    %c0_7 = arith.constant 0 : index
    %c0_8 = arith.constant 0 : index
    %8 = vector.load %arg7[%c0_7, %c0_8] : memref<16x128xf32, #tpu.memory_space<vmem>>, vector<16x128xf32>
    tpu.vector_store %arg7[%c0_7, %c0_8], %7 {strides = array<i32>} : memref<16x128xf32, #tpu.memory_space<vmem>>, vector<16x128xf32>,
    return
  }
  func.func @transform_0(%arg0: i32, %arg1: i32, %arg2: i32) -> (i32, i32) {
    %c0_i32 = arith.constant 0 : i32
    return %arg0, %arg2 : i32, i32
  }
  func.func @transform_1(%arg0: i32, %arg1: i32, %arg2: i32) -> (i32, i32) {
    %c0_i32 = arith.constant 0 : i32
    return %arg2, %arg1 : i32, i32
  }
  func.func @transform_2(%arg0: i32, %arg1: i32, %arg2: i32) -> (i32, i32) {
    %c0_i32 = arith.constant 0 : i32
    %c0_i32_0 = arith.constant 0 : i32
    return %c0_i32, %arg1 : i32, i32
  }
  func.func @transform_3(%arg0: i32, %arg1: i32, %arg2: i32) -> (i32, i32) {
    %c0_i32 = arith.constant 0 : i32
    return %arg0, %arg1 : i32, i32
  }
  func.func @transform_4(%arg0: i32, %arg1: i32, %arg2: i32) -> (i32, i32) {
    %c0_i32 = arith.constant 0 : i32
    return %arg0, %arg1 : i32, i32
  }
}

module attributes {stable_mosaic.version = 11 : i64} {
  func.func @_fused_linear_kernel(%arg0: i32, %arg1: i32, %arg2: i32, %arg3: memref<16x128xf32, #tpu.memory_space<vmem>>, %arg4: memref<128x384xbf16, #tpu.memory_space<vmem>>, %arg5: memref<1x384xf32, #tpu.memory_space<vmem>>, %arg6: memref<1x128xf32, #tpu.memory_space<vmem>>, %arg7: memref<1x128xf32, #tpu.memory_space<vmem>>, %arg8: memref<16x384xbf16, #tpu.memory_space<vmem>>) attributes {dimension_semantics = [#tpu.dimension_semantics<parallel>, #tpu.dimension_semantics<parallel>, #tpu.dimension_semantics<arbitrary>], iteration_bounds = array<i64: 1, 1, 1>, scalar_prefetch = 0 : i64, scratch_operands = 0 : i64, tpu.core_type = #tpu.core_type<tc>, window_params = [{transform_indices = @transform_0, window_bounds = array<i64: 16, 128>}, {transform_indices = @transform_1, window_bounds = array<i64: 128, 384>}, {transform_indices = @transform_2, window_bounds = array<i64: 1, 384>}, {transform_indices = @transform_3, window_bounds = array<i64: 1, 128>}, {transform_indices = @transform_4, window_bounds = array<i64: 1, 128>}, {transform_indices = @transform_5, window_bounds = array<i64: 16, 384>}]} {
    %c0 = arith.constant 0 : index
    %c0_0 = arith.constant 0 : index
    %0 = vector.load %arg3[%c0, %c0_0] : memref<16x128xf32, #tpu.memory_space<vmem>>, vector<16x128xf32>
    %cst = arith.constant dense<0.000000e+00> : vector<16xf32>
    %1 = vector.multi_reduction <add>, %0, %cst [1] : vector<16x128xf32> to vector<16xf32>
    %2 = vector.shape_cast %1 : vector<16xf32> to vector<16x1xf32>
    %cst_1 = arith.constant 1.280000e+02 : f32
    %3 = vector.broadcast %cst_1 : f32 to vector<16x1xf32>
    %4 = arith.divf %2, %3 : vector<16x1xf32>
    %5 = vector.broadcast %4 : vector<16x1xf32> to vector<16x128xf32>
    %6 = arith.subf %0, %5 : vector<16x128xf32>
    %7 = arith.mulf %6, %6 : vector<16x128xf32>
    %cst_2 = arith.constant dense<0.000000e+00> : vector<16xf32>
    %8 = vector.multi_reduction <add>, %7, %cst_2 [1] : vector<16x128xf32> to vector<16xf32>
    %9 = vector.shape_cast %8 : vector<16xf32> to vector<16x1xf32>
    %cst_3 = arith.constant 1.280000e+02 : f32
    %10 = vector.broadcast %cst_3 : f32 to vector<16x1xf32>
    %11 = arith.divf %9, %10 : vector<16x1xf32>
    %12 = vector.broadcast %4 : vector<16x1xf32> to vector<16x128xf32>
    %13 = arith.subf %0, %12 : vector<16x128xf32>
    %cst_4 = arith.constant 9.99999974E-6 : f32
    %14 = vector.broadcast %cst_4 : f32 to vector<16x1xf32>
    %15 = arith.addf %11, %14 : vector<16x1xf32>
    %16 = math.rsqrt %15 : vector<16x1xf32>
    %17 = vector.broadcast %16 : vector<16x1xf32> to vector<16x128xf32>
    %18 = arith.mulf %13, %17 : vector<16x128xf32>
    %c0_5 = arith.constant 0 : index
    %c0_6 = arith.constant 0 : index
    %19 = vector.load %arg6[%c0_5, %c0_6] : memref<1x128xf32, #tpu.memory_space<vmem>>, vector<1x128xf32>
    %20 = vector.broadcast %19 : vector<1x128xf32> to vector<16x128xf32>
    %21 = arith.mulf %18, %20 : vector<16x128xf32>
    %c0_7 = arith.constant 0 : index
    %c0_8 = arith.constant 0 : index
    %22 = vector.load %arg7[%c0_7, %c0_8] : memref<1x128xf32, #tpu.memory_space<vmem>>, vector<1x128xf32>
    %23 = vector.broadcast %22 : vector<1x128xf32> to vector<16x128xf32>
    %24 = arith.addf %21, %23 : vector<16x128xf32>
    %25 = arith.truncf %24 : vector<16x128xf32> to vector<16x128xbf16>
    %c0_9 = arith.constant 0 : index
    %c0_10 = arith.constant 0 : index
    %26 = vector.load %arg4[%c0_9, %c0_10] : memref<128x384xbf16, #tpu.memory_space<vmem>>, vector<128x384xbf16>
    %cst_11 = arith.constant dense<0.000000e+00> : vector<16x384xf32>
    %27 = tpu.matmul %25, %26, %cst_11 {dimension_numbers = #tpu.dot_dimension_numbers<[1], [0], [0], [1], [0, 0, 1, 1], [], []>} : vector<16x128xbf16>, vector<128x384xbf16>, vector<16x384xf32> -> vector<16x384xf32>
    %c0_12 = arith.constant 0 : index
    %c0_13 = arith.constant 0 : index
    %28 = vector.load %arg5[%c0_12, %c0_13] : memref<1x384xf32, #tpu.memory_space<vmem>>, vector<1x384xf32>
    %29 = vector.broadcast %28 : vector<1x384xf32> to vector<16x384xf32>
    %30 = arith.addf %27, %29 : vector<16x384xf32>
    %31 = arith.truncf %30 : vector<16x384xf32> to vector<16x384xbf16>
    %c0_14 = arith.constant 0 : index
    %c0_15 = arith.constant 0 : index
    %32 = vector.load %arg8[%c0_14, %c0_15] : memref<16x384xbf16, #tpu.memory_space<vmem>>, vector<16x384xbf16>
    tpu.vector_store %arg8[%c0_14, %c0_15], %31 {strides = array<i32>} : memref<16x384xbf16, #tpu.memory_space<vmem>>, vector<16x384xbf16>,
    return
  }
  func.func @transform_0(%arg0: i32, %arg1: i32, %arg2: i32) -> (i32, i32) {
    %c0_i32 = arith.constant 0 : i32
    return %arg0, %arg2 : i32, i32
  }
  func.func @transform_1(%arg0: i32, %arg1: i32, %arg2: i32) -> (i32, i32) {
    %c0_i32 = arith.constant 0 : i32
    return %arg2, %arg1 : i32, i32
  }
  func.func @transform_2(%arg0: i32, %arg1: i32, %arg2: i32) -> (i32, i32) {
    %c0_i32 = arith.constant 0 : i32
    %c0_i32_0 = arith.constant 0 : i32
    return %c0_i32, %arg1 : i32, i32
  }
  func.func @transform_3(%arg0: i32, %arg1: i32, %arg2: i32) -> (i32, i32) {
    %c0_i32 = arith.constant 0 : i32
    %c0_i32_0 = arith.constant 0 : i32
    return %c0_i32, %arg2 : i32, i32
  }
  func.func @transform_4(%arg0: i32, %arg1: i32, %arg2: i32) -> (i32, i32) {
    %c0_i32 = arith.constant 0 : i32
    %c0_i32_0 = arith.constant 0 : i32
    return %c0_i32, %arg2 : i32, i32
  }
  func.func @transform_5(%arg0: i32, %arg1: i32, %arg2: i32) -> (i32, i32) {
    %c0_i32 = arith.constant 0 : i32
    return %arg0, %arg1 : i32, i32
  }
}

module attributes {stable_mosaic.version = 11 : i64} {
  func.func @_fused_linear_kernel(%arg0: i32, %arg1: i32, %arg2: i32, %arg3: memref<16x128xf32, #tpu.memory_space<vmem>>, %arg4: memref<128x512xbf16, #tpu.memory_space<vmem>>, %arg5: memref<1x512xf32, #tpu.memory_space<vmem>>, %arg6: memref<1x128xf32, #tpu.memory_space<vmem>>, %arg7: memref<1x128xf32, #tpu.memory_space<vmem>>, %arg8: memref<16x512xbf16, #tpu.memory_space<vmem>>) attributes {dimension_semantics = [#tpu.dimension_semantics<parallel>, #tpu.dimension_semantics<parallel>, #tpu.dimension_semantics<arbitrary>], iteration_bounds = array<i64: 1, 1, 1>, scalar_prefetch = 0 : i64, scratch_operands = 0 : i64, tpu.core_type = #tpu.core_type<tc>, window_params = [{transform_indices = @transform_0, window_bounds = array<i64: 16, 128>}, {transform_indices = @transform_1, window_bounds = array<i64: 128, 512>}, {transform_indices = @transform_2, window_bounds = array<i64: 1, 512>}, {transform_indices = @transform_3, window_bounds = array<i64: 1, 128>}, {transform_indices = @transform_4, window_bounds = array<i64: 1, 128>}, {transform_indices = @transform_5, window_bounds = array<i64: 16, 512>}]} {
    %c0 = arith.constant 0 : index
    %c0_0 = arith.constant 0 : index
    %0 = vector.load %arg3[%c0, %c0_0] : memref<16x128xf32, #tpu.memory_space<vmem>>, vector<16x128xf32>
    %cst = arith.constant dense<0.000000e+00> : vector<16xf32>
    %1 = vector.multi_reduction <add>, %0, %cst [1] : vector<16x128xf32> to vector<16xf32>
    %2 = vector.shape_cast %1 : vector<16xf32> to vector<16x1xf32>
    %cst_1 = arith.constant 1.280000e+02 : f32
    %3 = vector.broadcast %cst_1 : f32 to vector<16x1xf32>
    %4 = arith.divf %2, %3 : vector<16x1xf32>
    %5 = vector.broadcast %4 : vector<16x1xf32> to vector<16x128xf32>
    %6 = arith.subf %0, %5 : vector<16x128xf32>
    %7 = arith.mulf %6, %6 : vector<16x128xf32>
    %cst_2 = arith.constant dense<0.000000e+00> : vector<16xf32>
    %8 = vector.multi_reduction <add>, %7, %cst_2 [1] : vector<16x128xf32> to vector<16xf32>
    %9 = vector.shape_cast %8 : vector<16xf32> to vector<16x1xf32>
    %cst_3 = arith.constant 1.280000e+02 : f32
    %10 = vector.broadcast %cst_3 : f32 to vector<16x1xf32>
    %11 = arith.divf %9, %10 : vector<16x1xf32>
    %12 = vector.broadcast %4 : vector<16x1xf32> to vector<16x128xf32>
    %13 = arith.subf %0, %12 : vector<16x128xf32>
    %cst_4 = arith.constant 9.99999974E-6 : f32
    %14 = vector.broadcast %cst_4 : f32 to vector<16x1xf32>
    %15 = arith.addf %11, %14 : vector<16x1xf32>
    %16 = math.rsqrt %15 : vector<16x1xf32>
    %17 = vector.broadcast %16 : vector<16x1xf32> to vector<16x128xf32>
    %18 = arith.mulf %13, %17 : vector<16x128xf32>
    %c0_5 = arith.constant 0 : index
    %c0_6 = arith.constant 0 : index
    %19 = vector.load %arg6[%c0_5, %c0_6] : memref<1x128xf32, #tpu.memory_space<vmem>>, vector<1x128xf32>
    %20 = vector.broadcast %19 : vector<1x128xf32> to vector<16x128xf32>
    %21 = arith.mulf %18, %20 : vector<16x128xf32>
    %c0_7 = arith.constant 0 : index
    %c0_8 = arith.constant 0 : index
    %22 = vector.load %arg7[%c0_7, %c0_8] : memref<1x128xf32, #tpu.memory_space<vmem>>, vector<1x128xf32>
    %23 = vector.broadcast %22 : vector<1x128xf32> to vector<16x128xf32>
    %24 = arith.addf %21, %23 : vector<16x128xf32>
    %25 = arith.truncf %24 : vector<16x128xf32> to vector<16x128xbf16>
    %c0_9 = arith.constant 0 : index
    %c0_10 = arith.constant 0 : index
    %26 = vector.load %arg4[%c0_9, %c0_10] : memref<128x512xbf16, #tpu.memory_space<vmem>>, vector<128x512xbf16>
    %cst_11 = arith.constant dense<0.000000e+00> : vector<16x512xf32>
    %27 = tpu.matmul %25, %26, %cst_11 {dimension_numbers = #tpu.dot_dimension_numbers<[1], [0], [0], [1], [0, 0, 1, 1], [], []>} : vector<16x128xbf16>, vector<128x512xbf16>, vector<16x512xf32> -> vector<16x512xf32>
    %c0_12 = arith.constant 0 : index
    %c0_13 = arith.constant 0 : index
    %28 = vector.load %arg5[%c0_12, %c0_13] : memref<1x512xf32, #tpu.memory_space<vmem>>, vector<1x512xf32>
    %29 = vector.broadcast %28 : vector<1x512xf32> to vector<16x512xf32>
    %30 = arith.addf %27, %29 : vector<16x512xf32>
    %cst_14 = arith.constant 5.000000e-01 : f32
    %31 = vector.broadcast %cst_14 : f32 to vector<16x512xf32>
    %32 = arith.mulf %31, %30 : vector<16x512xf32>
    %cst_15 = arith.constant 4.471500e-02 : f32
    %33 = vector.broadcast %cst_15 : f32 to vector<16x512xf32>
    %34 = arith.mulf %33, %30 : vector<16x512xf32>
    %35 = arith.mulf %34, %30 : vector<16x512xf32>
    %36 = arith.mulf %35, %30 : vector<16x512xf32>
    %37 = arith.addf %30, %36 : vector<16x512xf32>
    %cst_16 = arith.constant 0.797884583 : f32
    %38 = vector.broadcast %cst_16 : f32 to vector<16x512xf32>
    %39 = arith.mulf %38, %37 : vector<16x512xf32>
    %40 = math.tanh %39 : vector<16x512xf32>
    %cst_17 = arith.constant 1.000000e+00 : f32
    %41 = vector.broadcast %cst_17 : f32 to vector<16x512xf32>
    %42 = arith.addf %41, %40 : vector<16x512xf32>
    %43 = arith.mulf %32, %42 : vector<16x512xf32>
    %44 = arith.truncf %43 : vector<16x512xf32> to vector<16x512xbf16>
    %c0_18 = arith.constant 0 : index
    %c0_19 = arith.constant 0 : index
    %45 = vector.load %arg8[%c0_18, %c0_19] : memref<16x512xbf16, #tpu.memory_space<vmem>>, vector<16x512xbf16>
    tpu.vector_store %arg8[%c0_18, %c0_19], %44 {strides = array<i32>} : memref<16x512xbf16, #tpu.memory_space<vmem>>, vector<16x512xbf16>,
    return
  }
  func.func @transform_0(%arg0: i32, %arg1: i32, %arg2: i32) -> (i32, i32) {
    %c0_i32 = arith.constant 0 : i32
    return %arg0, %arg2 : i32, i32
  }
  func.func @transform_1(%arg0: i32, %arg1: i32, %arg2: i32) -> (i32, i32) {
    %c0_i32 = arith.constant 0 : i32
    return %arg2, %arg1 : i32, i32
  }
  func.func @transform_2(%arg0: i32, %arg1: i32, %arg2: i32) -> (i32, i32) {
    %c0_i32 = arith.constant 0 : i32
    %c0_i32_0 = arith.constant 0 : i32
    return %c0_i32, %arg1 : i32, i32
  }
  func.func @transform_3(%arg0: i32, %arg1: i32, %arg2: i32) -> (i32, i32) {
    %c0_i32 = arith.constant 0 : i32
    %c0_i32_0 = arith.constant 0 : i32
    return %c0_i32, %arg2 : i32, i32
  }
  func.func @transform_4(%arg0: i32, %arg1: i32, %arg2: i32) -> (i32, i32) {
    %c0_i32 = arith.constant 0 : i32
    %c0_i32_0 = arith.constant 0 : i32
    return %c0_i32, %arg2 : i32, i32
  }
  func.func @transform_5(%arg0: i32, %arg1: i32, %arg2: i32) -> (i32, i32) {
    %c0_i32 = arith.constant 0 : i32
    return %arg0, %arg1 : i32, i32
  }
}

module attributes {stable_mosaic.version = 11 : i64} {
  func.func @_mha_kernel(%arg0: i32, %arg1: i32, %arg2: i32, %arg3: memref<1x8x128xbf16, #tpu.memory_space<vmem>>, %arg4: memref<1x8x128xbf16, #tpu.memory_space<vmem>>, %arg5: memref<1x8x128xbf16, #tpu.memory_space<vmem>>, %arg6: memref<1x1x8xf32, #tpu.memory_space<vmem>>, %arg7: memref<1x8x128xbf16, #tpu.memory_space<vmem>>, %arg8: memref<8x128xf32, #tpu.memory_space<vmem>>) attributes {dimension_semantics = [#tpu.dimension_semantics<parallel>, #tpu.dimension_semantics<parallel>, #tpu.dimension_semantics<parallel>], iteration_bounds = array<i64: 2, 1, 1>, scalar_prefetch = 0 : i64, scratch_operands = 1 : i64, tpu.core_type = #tpu.core_type<tc>, window_params = [{transform_indices = @transform_0, window_bounds = array<i64: 1, 8, 128>}, {transform_indices = @transform_1, window_bounds = array<i64: 1, 8, 128>}, {transform_indices = @transform_2, window_bounds = array<i64: 1, 8, 128>}, {transform_indices = @transform_3, window_bounds = array<i64: 1, 1, 8>}, {transform_indices = @transform_4, window_bounds = array<i64: 1, 8, 128>}]} {
    %c8_i32 = arith.constant 8 : i32
    %0 = arith.muli %arg2, %c8_i32 : i32
    %1 = tpu.iota {dimensions = array<i32: 0>} : vector<8x8xi32>
    %2 = vector.broadcast %0 : i32 to vector<8x8xi32>
    %3 = arith.addi %1, %2 : vector<8x8xi32>
    %4 = tpu.iota {dimensions = array<i32: 1>} : vector<8x8xi32>
    %5 = arith.cmpi sle, %4, %3 : vector<8x8xi32>
    %cst = arith.constant 0.000000e+00 : f32
    %cst_0 = arith.constant -1.000000e+09 : f32
    %6 = vector.broadcast %cst : f32 to vector<8x8xf32>
    %7 = vector.broadcast %cst_0 : f32 to vector<8x8xf32>
    %8 = arith.select %5, %6, %7 : vector<8x8xi1>, vector<8x8xf32>
    %c0 = arith.constant 0 : index
    %c0_1 = arith.constant 0 : index
    %c0_2 = arith.constant 0 : index
    %9 = vector.load %arg6[%c0, %c0_1, %c0_2] : memref<1x1x8xf32, #tpu.memory_space<vmem>>, vector<1x1x8xf32>
    %10 = vector.shape_cast %9 : vector<1x1x8xf32> to vector<1x8xf32>
    %11 = vector.broadcast %10 : vector<1x8xf32> to vector<8x8xf32>
    %12 = arith.addf %8, %11 : vector<8x8xf32>
    %c0_3 = arith.constant 0 : index
    %c0_4 = arith.constant 0 : index
    %c0_5 = arith.constant 0 : index
    %13 = vector.load %arg3[%c0_3, %c0_4, %c0_5] : memref<1x8x128xbf16, #tpu.memory_space<vmem>>, vector<1x8x128xbf16>
    %14 = vector.shape_cast %13 : vector<1x8x128xbf16> to vector<8x128xbf16>
    %c0_6 = arith.constant 0 : index
    %c0_7 = arith.constant 0 : index
    %c0_8 = arith.constant 0 : index
    %15 = vector.load %arg4[%c0_6, %c0_7, %c0_8] : memref<1x8x128xbf16, #tpu.memory_space<vmem>>, vector<1x8x128xbf16>
    %16 = vector.shape_cast %15 : vector<1x8x128xbf16> to vector<8x128xbf16>
    %c0_9 = arith.constant 0 : index
    %c0_10 = arith.constant 0 : index
    %c0_11 = arith.constant 0 : index
    %17 = vector.load %arg5[%c0_9, %c0_10, %c0_11] : memref<1x8x128xbf16, #tpu.memory_space<vmem>>, vector<1x8x128xbf16>
    %18 = vector.shape_cast %17 : vector<1x8x128xbf16> to vector<8x128xbf16>
    %19 = vector.extract_strided_slice %14 {offsets = [0, 0], sizes = [8, 32], strides = [1, 1]} : vector<8x128xbf16> to vector<8x32xbf16>
    %20 = vector.extract_strided_slice %16 {offsets = [0, 0], sizes = [8, 32], strides = [1, 1]} : vector<8x128xbf16> to vector<8x32xbf16>
    %21 = vector.extract_strided_slice %18 {offsets = [0, 0], sizes = [8, 32], strides = [1, 1]} : vector<8x128xbf16> to vector<8x32xbf16>
    %cst_12 = arith.constant dense<0.000000e+00> : vector<8x8xf32>
    %22 = tpu.matmul %19, %20, %cst_12 {dimension_numbers = #tpu.dot_dimension_numbers<[1], [1], [0], [0], [0, 0, 1, 0], [], []>} : vector<8x32xbf16>, vector<8x32xbf16>, vector<8x8xf32> -> vector<8x8xf32>
    %cst_13 = arith.constant 0.176776692 : f32
    %23 = vector.broadcast %cst_13 : f32 to vector<8x8xf32>
    %24 = arith.mulf %22, %23 : vector<8x8xf32>
    %25 = arith.addf %24, %12 : vector<8x8xf32>
    %cst_14 = arith.constant dense<0xFF800000> : vector<8xf32>
    %26 = vector.multi_reduction <maximumf>, %25, %cst_14 [1] : vector<8x8xf32> to vector<8xf32>
    %27 = vector.shape_cast %26 : vector<8xf32> to vector<8x1xf32>
    %28 = vector.broadcast %27 : vector<8x1xf32> to vector<8x8xf32>
    %29 = arith.subf %25, %28 : vector<8x8xf32>
    %30 = math.exp %29 : vector<8x8xf32>
    %cst_15 = arith.constant dense<0.000000e+00> : vector<8xf32>
    %31 = vector.multi_reduction <add>, %30, %cst_15 [1] : vector<8x8xf32> to vector<8xf32>
    %32 = vector.shape_cast %31 : vector<8xf32> to vector<8x1xf32>
    %33 = tpu.reciprocal %32 {approx = true} : vector<8x1xf32> -> vector<8x1xf32>
    %34 = vector.broadcast %33 : vector<8x1xf32> to vector<8x8xf32>
    %35 = arith.mulf %30, %34 : vector<8x8xf32>
    %36 = arith.truncf %35 : vector<8x8xf32> to vector<8x8xbf16>
    %cst_16 = arith.constant dense<0.000000e+00> : vector<8x32xf32>
    %37 = tpu.matmul %36, %21, %cst_16 {dimension_numbers = #tpu.dot_dimension_numbers<[1], [0], [0], [1], [0, 0, 1, 1], [], []>} : vector<8x8xbf16>, vector<8x32xbf16>, vector<8x32xf32> -> vector<8x32xf32>
    %c0_17 = arith.constant 0 : index
    %c0_18 = arith.constant 0 : index
    %38 = vector.load %arg8[%c0_17, %c0_18] : memref<8x128xf32, #tpu.memory_space<vmem>>, vector<8x32xf32>
    tpu.vector_store %arg8[%c0_17, %c0_18], %37 {strides = array<i32>} : memref<8x128xf32, #tpu.memory_space<vmem>>, vector<8x32xf32>,
    %39 = vector.extract_strided_slice %14 {offsets = [0, 32], sizes = [8, 32], strides = [1, 1]} : vector<8x128xbf16> to vector<8x32xbf16>
    %40 = vector.extract_strided_slice %16 {offsets = [0, 32], sizes = [8, 32], strides = [1, 1]} : vector<8x128xbf16> to vector<8x32xbf16>
    %41 = vector.extract_strided_slice %18 {offsets = [0, 32], sizes = [8, 32], strides = [1, 1]} : vector<8x128xbf16> to vector<8x32xbf16>
    %cst_19 = arith.constant dense<0.000000e+00> : vector<8x8xf32>
    %42 = tpu.matmul %39, %40, %cst_19 {dimension_numbers = #tpu.dot_dimension_numbers<[1], [1], [0], [0], [0, 0, 1, 0], [], []>} : vector<8x32xbf16>, vector<8x32xbf16>, vector<8x8xf32> -> vector<8x8xf32>
    %cst_20 = arith.constant 0.176776692 : f32
    %43 = vector.broadcast %cst_20 : f32 to vector<8x8xf32>
    %44 = arith.mulf %42, %43 : vector<8x8xf32>
    %45 = arith.addf %44, %12 : vector<8x8xf32>
    %cst_21 = arith.constant dense<0xFF800000> : vector<8xf32>
    %46 = vector.multi_reduction <maximumf>, %45, %cst_21 [1] : vector<8x8xf32> to vector<8xf32>
    %47 = vector.shape_cast %46 : vector<8xf32> to vector<8x1xf32>
    %48 = vector.broadcast %47 : vector<8x1xf32> to vector<8x8xf32>
    %49 = arith.subf %45, %48 : vector<8x8xf32>
    %50 = math.exp %49 : vector<8x8xf32>
    %cst_22 = arith.constant dense<0.000000e+00> : vector<8xf32>
    %51 = vector.multi_reduction <add>, %50, %cst_22 [1] : vector<8x8xf32> to vector<8xf32>
    %52 = vector.shape_cast %51 : vector<8xf32> to vector<8x1xf32>
    %53 = tpu.reciprocal %52 {approx = true} : vector<8x1xf32> -> vector<8x1xf32>
    %54 = vector.broadcast %53 : vector<8x1xf32> to vector<8x8xf32>
    %55 = arith.mulf %50, %54 : vector<8x8xf32>
    %56 = arith.truncf %55 : vector<8x8xf32> to vector<8x8xbf16>
    %cst_23 = arith.constant dense<0.000000e+00> : vector<8x32xf32>
    %57 = tpu.matmul %56, %41, %cst_23 {dimension_numbers = #tpu.dot_dimension_numbers<[1], [0], [0], [1], [0, 0, 1, 1], [], []>} : vector<8x8xbf16>, vector<8x32xbf16>, vector<8x32xf32> -> vector<8x32xf32>
    %c0_24 = arith.constant 0 : index
    %c32 = arith.constant 32 : index
    %58 = vector.load %arg8[%c0_24, %c32] : memref<8x128xf32, #tpu.memory_space<vmem>>, vector<8x32xf32>
    tpu.vector_store %arg8[%c0_24, %c32], %57 {strides = array<i32>} : memref<8x128xf32, #tpu.memory_space<vmem>>, vector<8x32xf32>,
    %59 = vector.extract_strided_slice %14 {offsets = [0, 64], sizes = [8, 32], strides = [1, 1]} : vector<8x128xbf16> to vector<8x32xbf16>
    %60 = vector.extract_strided_slice %16 {offsets = [0, 64], sizes = [8, 32], strides = [1, 1]} : vector<8x128xbf16> to vector<8x32xbf16>
    %61 = vector.extract_strided_slice %18 {offsets = [0, 64], sizes = [8, 32], strides = [1, 1]} : vector<8x128xbf16> to vector<8x32xbf16>
    %cst_25 = arith.constant dense<0.000000e+00> : vector<8x8xf32>
    %62 = tpu.matmul %59, %60, %cst_25 {dimension_numbers = #tpu.dot_dimension_numbers<[1], [1], [0], [0], [0, 0, 1, 0], [], []>} : vector<8x32xbf16>, vector<8x32xbf16>, vector<8x8xf32> -> vector<8x8xf32>
    %cst_26 = arith.constant 0.176776692 : f32
    %63 = vector.broadcast %cst_26 : f32 to vector<8x8xf32>
    %64 = arith.mulf %62, %63 : vector<8x8xf32>
    %65 = arith.addf %64, %12 : vector<8x8xf32>
    %cst_27 = arith.constant dense<0xFF800000> : vector<8xf32>
    %66 = vector.multi_reduction <maximumf>, %65, %cst_27 [1] : vector<8x8xf32> to vector<8xf32>
    %67 = vector.shape_cast %66 : vector<8xf32> to vector<8x1xf32>
    %68 = vector.broadcast %67 : vector<8x1xf32> to vector<8x8xf32>
    %69 = arith.subf %65, %68 : vector<8x8xf32>
    %70 = math.exp %69 : vector<8x8xf32>
    %cst_28 = arith.constant dense<0.000000e+00> : vector<8xf32>
    %71 = vector.multi_reduction <add>, %70, %cst_28 [1] : vector<8x8xf32> to vector<8xf32>
    %72 = vector.shape_cast %71 : vector<8xf32> to vector<8x1xf32>
    %73 = tpu.reciprocal %72 {approx = true} : vector<8x1xf32> -> vector<8x1xf32>
    %74 = vector.broadcast %73 : vector<8x1xf32> to vector<8x8xf32>
    %75 = arith.mulf %70, %74 : vector<8x8xf32>
    %76 = arith.truncf %75 : vector<8x8xf32> to vector<8x8xbf16>
    %cst_29 = arith.constant dense<0.000000e+00> : vector<8x32xf32>
    %77 = tpu.matmul %76, %61, %cst_29 {dimension_numbers = #tpu.dot_dimension_numbers<[1], [0], [0], [1], [0, 0, 1, 1], [], []>} : vector<8x8xbf16>, vector<8x32xbf16>, vector<8x32xf32> -> vector<8x32xf32>
    %c0_30 = arith.constant 0 : index
    %c64 = arith.constant 64 : index
    %78 = vector.load %arg8[%c0_30, %c64] : memref<8x128xf32, #tpu.memory_space<vmem>>, vector<8x32xf32>
    tpu.vector_store %arg8[%c0_30, %c64], %77 {strides = array<i32>} : memref<8x128xf32, #tpu.memory_space<vmem>>, vector<8x32xf32>,
    %79 = vector.extract_strided_slice %14 {offsets = [0, 96], sizes = [8, 32], strides = [1, 1]} : vector<8x128xbf16> to vector<8x32xbf16>
    %80 = vector.extract_strided_slice %16 {offsets = [0, 96], sizes = [8, 32], strides = [1, 1]} : vector<8x128xbf16> to vector<8x32xbf16>
    %81 = vector.extract_strided_slice %18 {offsets = [0, 96], sizes = [8, 32], strides = [1, 1]} : vector<8x128xbf16> to vector<8x32xbf16>
    %cst_31 = arith.constant dense<0.000000e+00> : vector<8x8xf32>
    %82 = tpu.matmul %79, %80, %cst_31 {dimension_numbers = #tpu.dot_dimension_numbers<[1], [1], [0], [0], [0, 0, 1, 0], [], []>} : vector<8x32xbf16>, vector<8x32xbf16>, vector<8x8xf32> -> vector<8x8xf32>
    %cst_32 = arith.constant 0.176776692 : f32
    %83 = vector.broadcast %cst_32 : f32 to vector<8x8xf32>
    %84 = arith.mulf %82, %83 : vector<8x8xf32>
    %85 = arith.addf %84, %12 : vector<8x8xf32>
    %cst_33 = arith.constant dense<0xFF800000> : vector<8xf32>
    %86 = vector.multi_reduction <maximumf>, %85, %cst_33 [1] : vector<8x8xf32> to vector<8xf32>
    %87 = vector.shape_cast %86 : vector<8xf32> to vector<8x1xf32>
    %88 = vector.broadcast %87 : vector<8x1xf32> to vector<8x8xf32>
    %89 = arith.subf %85, %88 : vector<8x8xf32>
    %90 = math.exp %89 : vector<8x8xf32>
    %cst_34 = arith.constant dense<0.000000e+00> : vector<8xf32>
    %91 = vector.multi_reduction <add>, %90, %cst_34 [1] : vector<8x8xf32> to vector<8xf32>
    %92 = vector.shape_cast %91 : vector<8xf32> to vector<8x1xf32>
    %93 = tpu.reciprocal %92 {approx = true} : vector<8x1xf32> -> vector<8x1xf32>
    %94 = vector.broadcast %93 : vector<8x1xf32> to vector<8x8xf32>
    %95 = arith.mulf %90, %94 : vector<8x8xf32>
    %96 = arith.truncf %95 : vector<8x8xf32> to vector<8x8xbf16>
    %cst_35 = arith.constant dense<0.000000e+00> : vector<8x32xf32>
    %97 = tpu.matmul %96, %81, %cst_35 {dimension_numbers = #tpu.dot_dimension_numbers<[1], [0], [0], [1], [0, 0, 1, 1], [], []>} : vector<8x8xbf16>, vector<8x32xbf16>, vector<8x32xf32> -> vector<8x32xf32>
    %c0_36 = arith.constant 0 : index
    %c96 = arith.constant 96 : index
    %98 = vector.load %arg8[%c0_36, %c96] : memref<8x128xf32, #tpu.memory_space<vmem>>, vector<8x32xf32>
    tpu.vector_store %arg8[%c0_36, %c96], %97 {strides = array<i32>} : memref<8x128xf32, #tpu.memory_space<vmem>>, vector<8x32xf32>,
    %c0_37 = arith.constant 0 : index
    %c0_38 = arith.constant 0 : index
    %99 = vector.load %arg8[%c0_37, %c0_38] : memref<8x128xf32, #tpu.memory_space<vmem>>, vector<8x128xf32>
    %100 = arith.truncf %99 : vector<8x128xf32> to vector<8x128xbf16>
    %c0_39 = arith.constant 0 : index
    %c0_40 = arith.constant 0 : index
    %c0_41 = arith.constant 0 : index
    %101 = vector.load %arg7[%c0_39, %c0_40, %c0_41] : memref<1x8x128xbf16, #tpu.memory_space<vmem>>, vector<1x8x128xbf16>
    %102 = vector.shape_cast %101 : vector<1x8x128xbf16> to vector<8x128xbf16>
    %103 = vector.shape_cast %100 : vector<8x128xbf16> to vector<1x8x128xbf16>
    tpu.vector_store %arg7[%c0_39, %c0_40, %c0_41], %103 {strides = array<i32>} : memref<1x8x128xbf16, #tpu.memory_space<vmem>>, vector<1x8x128xbf16>,
    return
  }
  func.func @transform_0(%arg0: i32, %arg1: i32, %arg2: i32) -> (i32, i32, i32) {
    %c0_i32 = arith.constant 0 : i32
    %0 = arith.addi %c0_i32, %arg1 : i32
    %c0_i32_0 = arith.constant 0 : i32
    return %arg0, %arg2, %0 : i32, i32, i32
  }
  func.func @transform_1(%arg0: i32, %arg1: i32, %arg2: i32) -> (i32, i32, i32) {
    %c1_i32 = arith.constant 1 : i32
    %0 = arith.addi %c1_i32, %arg1 : i32
    %c0_i32 = arith.constant 0 : i32
    %c0_i32_0 = arith.constant 0 : i32
    return %arg0, %c0_i32, %0 : i32, i32, i32
  }
  func.func @transform_2(%arg0: i32, %arg1: i32, %arg2: i32) -> (i32, i32, i32) {
    %c2_i32 = arith.constant 2 : i32
    %0 = arith.addi %c2_i32, %arg1 : i32
    %c0_i32 = arith.constant 0 : i32
    %c0_i32_0 = arith.constant 0 : i32
    return %arg0, %c0_i32, %0 : i32, i32, i32
  }
  func.func @transform_3(%arg0: i32, %arg1: i32, %arg2: i32) -> (i32, i32, i32) {
    %c0_i32 = arith.constant 0 : i32
    %c0_i32_0 = arith.constant 0 : i32
    %c0_i32_1 = arith.constant 0 : i32
    return %arg0, %c0_i32, %c0_i32_0 : i32, i32, i32
  }
  func.func @transform_4(%arg0: i32, %arg1: i32, %arg2: i32) -> (i32, i32, i32) {
    %c0_i32 = arith.constant 0 : i32
    return %arg0, %arg2, %arg1 : i32, i32, i32
  }
}

module attributes {stable_mosaic.version = 11 : i64} {
  func.func @_fused_linear_kernel(%arg0: i32, %arg1: i32, %arg2: i32, %arg3: memref<16x512xbf16, #tpu.memory_space<vmem>>, %arg4: memref<512x128xbf16, #tpu.memory_space<vmem>>, %arg5: memref<1x128xf32, #tpu.memory_space<vmem>>, %arg6: memref<16x128xf32, #tpu.memory_space<vmem>>, %arg7: memref<16x128xf32, #tpu.memory_space<vmem>>) attributes {dimension_semantics = [#tpu.dimension_semantics<parallel>, #tpu.dimension_semantics<parallel>, #tpu.dimension_semantics<arbitrary>], iteration_bounds = array<i64: 1, 1, 1>, scalar_prefetch = 0 : i64, scratch_operands = 0 : i64, tpu.core_type = #tpu.core_type<tc>, window_params = [{transform_indices = @transform_0, window_bounds = array<i64: 16, 512>}, {transform_indices = @transform_1, window_bounds = array<i64: 512, 128>}, {transform_indices = @transform_2, window_bounds = array<i64: 1, 128>}, {transform_indices = @transform_3, window_bounds = array<i64: 16, 128>}, {transform_indices = @transform_4, window_bounds = array<i64: 16, 128>}]} {
    %c0 = arith.constant 0 : index
    %c0_0 = arith.constant 0 : index
    %0 = vector.load %arg3[%c0, %c0_0] : memref<16x512xbf16, #tpu.memory_space<vmem>>, vector<16x512xbf16>
    %c0_1 = arith.constant 0 : index
    %c0_2 = arith.constant 0 : index
    %1 = vector.load %arg4[%c0_1, %c0_2] : memref<512x128xbf16, #tpu.memory_space<vmem>>, vector<512x128xbf16>
    %cst = arith.constant dense<0.000000e+00> : vector<16x128xf32>
    %2 = tpu.matmul %0, %1, %cst {dimension_numbers = #tpu.dot_dimension_numbers<[1], [0], [0], [1], [0, 0, 1, 1], [], []>} : vector<16x512xbf16>, vector<512x128xbf16>, vector<16x128xf32> -> vector<16x128xf32>
    %c0_3 = arith.constant 0 : index
    %c0_4 = arith.constant 0 : index
    %3 = vector.load %arg5[%c0_3, %c0_4] : memref<1x128xf32, #tpu.memory_space<vmem>>, vector<1x128xf32>
    %4 = vector.broadcast %3 : vector<1x128xf32> to vector<16x128xf32>
    %5 = arith.addf %2, %4 : vector<16x128xf32>
    %c0_5 = arith.constant 0 : index
    %c0_6 = arith.constant 0 : index
    %6 = vector.load %arg6[%c0_5, %c0_6] : memref<16x128xf32, #tpu.memory_space<vmem>>, vector<16x128xf32>
    %7 = arith.addf %5, %6 : vector<16x128xf32>
    %c0_7 = arith.constant 0 : index
    %c0_8 = arith.constant 0 : index
    %8 = vector.load %arg7[%c0_7, %c0_8] : memref<16x128xf32, #tpu.memory_space<vmem>>, vector<16x128xf32>
    tpu.vector_store %arg7[%c0_7, %c0_8], %7 {strides = array<i32>} : memref<16x128xf32, #tpu.memory_space<vmem>>, vector<16x128xf32>,
    return
  }
  func.func @transform_0(%arg0: i32, %arg1: i32, %arg2: i32) -> (i32, i32) {
    %c0_i32 = arith.constant 0 : i32
    return %arg0, %arg2 : i32, i32
  }
  func.func @transform_1(%arg0: i32, %arg1: i32, %arg2: i32) -> (i32, i32) {
    %c0_i32 = arith.constant 0 : i32
    return %arg2, %arg1 : i32, i32
  }
  func.func @transform_2(%arg0: i32, %arg1: i32, %arg2: i32) -> (i32, i32) {
    %c0_i32 = arith.constant 0 : i32
    %c0_i32_0 = arith.constant 0 : i32
    return %c0_i32, %arg1 : i32, i32
  }
  func.func @transform_3(%arg0: i32, %arg1: i32, %arg2: i32) -> (i32, i32) {
    %c0_i32 = arith.constant 0 : i32
    return %arg0, %arg1 : i32, i32
  }
  func.func @transform_4(%arg0: i32, %arg1: i32, %arg2: i32) -> (i32, i32) {
    %c0_i32 = arith.constant 0 : i32
    return %arg0, %arg1 : i32, i32
  }
}

module attributes {stable_mosaic.version = 11 : i64} {
  func.func @_fused_linear_kernel(%arg0: i32, %arg1: i32, %arg2: i32, %arg3: memref<14x128xf32, #tpu.memory_space<vmem>>, %arg4: memref<128x64xbf16, #tpu.memory_space<vmem>>, %arg5: memref<1x128xf32, #tpu.memory_space<vmem>>, %arg6: memref<1x128xf32, #tpu.memory_space<vmem>>, %arg7: memref<14x64xf32, #tpu.memory_space<vmem>>) attributes {dimension_semantics = [#tpu.dimension_semantics<parallel>, #tpu.dimension_semantics<parallel>, #tpu.dimension_semantics<arbitrary>], iteration_bounds = array<i64: 1, 1, 1>, scalar_prefetch = 0 : i64, scratch_operands = 0 : i64, tpu.core_type = #tpu.core_type<tc>, window_params = [{transform_indices = @transform_0, window_bounds = array<i64: 14, 128>}, {transform_indices = @transform_1, window_bounds = array<i64: 128, 64>}, {transform_indices = @transform_2, window_bounds = array<i64: 1, 128>}, {transform_indices = @transform_3, window_bounds = array<i64: 1, 128>}, {transform_indices = @transform_4, window_bounds = array<i64: 14, 64>}]} {
    %c0 = arith.constant 0 : index
    %c0_0 = arith.constant 0 : index
    %0 = vector.load %arg3[%c0, %c0_0] : memref<14x128xf32, #tpu.memory_space<vmem>>, vector<14x128xf32>
    %cst = arith.constant dense<0.000000e+00> : vector<14xf32>
    %1 = vector.multi_reduction <add>, %0, %cst [1] : vector<14x128xf32> to vector<14xf32>
    %2 = vector.shape_cast %1 : vector<14xf32> to vector<14x1xf32>
    %cst_1 = arith.constant 1.280000e+02 : f32
    %3 = vector.broadcast %cst_1 : f32 to vector<14x1xf32>
    %4 = arith.divf %2, %3 : vector<14x1xf32>
    %5 = vector.broadcast %4 : vector<14x1xf32> to vector<14x128xf32>
    %6 = arith.subf %0, %5 : vector<14x128xf32>
    %7 = arith.mulf %6, %6 : vector<14x128xf32>
    %cst_2 = arith.constant dense<0.000000e+00> : vector<14xf32>
    %8 = vector.multi_reduction <add>, %7, %cst_2 [1] : vector<14x128xf32> to vector<14xf32>
    %9 = vector.shape_cast %8 : vector<14xf32> to vector<14x1xf32>
    %cst_3 = arith.constant 1.280000e+02 : f32
    %10 = vector.broadcast %cst_3 : f32 to vector<14x1xf32>
    %11 = arith.divf %9, %10 : vector<14x1xf32>
    %12 = vector.broadcast %4 : vector<14x1xf32> to vector<14x128xf32>
    %13 = arith.subf %0, %12 : vector<14x128xf32>
    %cst_4 = arith.constant 9.99999974E-6 : f32
    %14 = vector.broadcast %cst_4 : f32 to vector<14x1xf32>
    %15 = arith.addf %11, %14 : vector<14x1xf32>
    %16 = math.rsqrt %15 : vector<14x1xf32>
    %17 = vector.broadcast %16 : vector<14x1xf32> to vector<14x128xf32>
    %18 = arith.mulf %13, %17 : vector<14x128xf32>
    %c0_5 = arith.constant 0 : index
    %c0_6 = arith.constant 0 : index
    %19 = vector.load %arg5[%c0_5, %c0_6] : memref<1x128xf32, #tpu.memory_space<vmem>>, vector<1x128xf32>
    %20 = vector.broadcast %19 : vector<1x128xf32> to vector<14x128xf32>
    %21 = arith.mulf %18, %20 : vector<14x128xf32>
    %c0_7 = arith.constant 0 : index
    %c0_8 = arith.constant 0 : index
    %22 = vector.load %arg6[%c0_7, %c0_8] : memref<1x128xf32, #tpu.memory_space<vmem>>, vector<1x128xf32>
    %23 = vector.broadcast %22 : vector<1x128xf32> to vector<14x128xf32>
    %24 = arith.addf %21, %23 : vector<14x128xf32>
    %25 = arith.truncf %24 : vector<14x128xf32> to vector<14x128xbf16>
    %c0_9 = arith.constant 0 : index
    %c0_10 = arith.constant 0 : index
    %26 = vector.load %arg4[%c0_9, %c0_10] : memref<128x64xbf16, #tpu.memory_space<vmem>>, vector<128x64xbf16>
    %cst_11 = arith.constant dense<0.000000e+00> : vector<14x64xf32>
    %27 = tpu.matmul %25, %26, %cst_11 {dimension_numbers = #tpu.dot_dimension_numbers<[1], [0], [0], [1], [0, 0, 1, 1], [], []>} : vector<14x128xbf16>, vector<128x64xbf16>, vector<14x64xf32> -> vector<14x64xf32>
    %c0_12 = arith.constant 0 : index
    %c0_13 = arith.constant 0 : index
    %28 = vector.load %arg7[%c0_12, %c0_13] : memref<14x64xf32, #tpu.memory_space<vmem>>, vector<14x64xf32>
    tpu.vector_store %arg7[%c0_12, %c0_13], %27 {strides = array<i32>} : memref<14x64xf32, #tpu.memory_space<vmem>>, vector<14x64xf32>,
    return
  }
  func.func @transform_0(%arg0: i32, %arg1: i32, %arg2: i32) -> (i32, i32) {
    %c0_i32 = arith.constant 0 : i32
    return %arg0, %arg2 : i32, i32
  }
  func.func @transform_1(%arg0: i32, %arg1: i32, %arg2: i32) -> (i32, i32) {
    %c0_i32 = arith.constant 0 : i32
    return %arg2, %arg1 : i32, i32
  }
  func.func @transform_2(%arg0: i32, %arg1: i32, %arg2: i32) -> (i32, i32) {
    %c0_i32 = arith.constant 0 : i32
    %c0_i32_0 = arith.constant 0 : i32
    return %c0_i32, %arg2 : i32, i32
  }
  func.func @transform_3(%arg0: i32, %arg1: i32, %arg2: i32) -> (i32, i32) {
    %c0_i32 = arith.constant 0 : i32
    %c0_i32_0 = arith.constant 0 : i32
    return %c0_i32, %arg2 : i32, i32
  }
  func.func @transform_4(%arg0: i32, %arg1: i32, %arg2: i32) -> (i32, i32) {
    %c0_i32 = arith.constant 0 : i32
    return %arg0, %arg1 : i32, i32
  }
}

</mosaic_0001>

<bundles_post_ra>
// kernel: _lambda_.24
= control target key start
LH: loop header
LB: loop body
LE: loop exit
PB: predicated region body
PF: predicated region fallthrough
CT: control target
= control target key end

     0   :  { %8 = vsyncpa [#allocation3], 0  ;;  %s132_s12 = smov [#allocation2]   ;;  %s167_s0 = inlined_call_operand.hbm [shape: f32[8,16], index: 0, kind: input, shape index: {}]   ;;  %s168_s1 = inlined_call_operand.vmem [shape: bf16[16,128], index: 1, kind: input, shape index: {}]   ;;  %s169_s2 = inlined_call_operand.vmem [shape: f32[1,128], index: 2, kind: input, shape index: {}]   ;;  %s170_s3 = inlined_call_operand.vmem [shape: bf16[8,128], index: 3, kind: output, shape index: {}]  }
   0x1   :  { %s15_s13 = sshll.u32 %s132_s12, 4  ;;  %s16_s13 = int_to_ptr.vmem [resolvable:$true] %s15_s13 }
   0x2   :  { %s118_s14 = scalar_lea.vmem %s16_s13, 128  ;;  %p123_p1 = scmp.lt.s32.totalorder %s16_s13, %s16_s13 }
   0x3   :  { %p119_p0 = scmp.ne.s32.totalorder %s16_s13, %s118_s14  ;;  %p124_p2 = scmp.lt.s32.totalorder %s118_s14, %s118_s14 }
   0x5   :  { %p125_p3 = por %p124_p2, %p123_p1 }
   0x7   :  { %p126_p4 = pnand %p125_p3, %p119_p0 }
   0x9   :  { %129 = shalt.err (!%p126_p4)
}
   0xa   :  { %18 = dma.hbm_to_vmem [thread:$0]  %s167_s0, 128, %s16_s13, [#allocation3]  }
   0xb   :  { %130 = dma.done.wait [#allocation3], 128  }
   0xc   :  { %131 = vsyncadd [#allocation3], 4294967168  ;;  %v133_v0 = vmov 0.0   ;;  %vm134_vm0 = vmmov 0   ;;  %v109_v1 = vld [vmem:[%s168_s1] sm:$0xff]   ;;  %vm44_vm1 = vcmask 130048  }
   0xd   :  { %100 = vmatprep.subr.bf16.mxu0 %v133_v0  ;;  %102 = vmatprep.mubr.msk.bf16.mxu0 %vm134_vm0, %v133_v0  ;;  %v27_v2 = vld [vmem:[#allocation2] sm:$0xff] }
   0xe   :  { %101 = vmatpush3.bf16.msra.mxu0 %v109_v1  ;;  %v28_v3 = vpack.c.bf16 %v27_v2, %v27_v2  ;;  %v95_v4 = vld [vmem:[%s169_s2] ss:$0 sm:$0xff] }
  0x11   :  { %103 = vmatmul.mubr.msk.bf16.vlgmr.msra.gmra.mxu0 %vm44_vm1, %v28_v3 }
  0xd1   :  { %v82_v5 = vpop.f32.mrf.mxu0 }
  0xd2   :  { %v83_v6 = vadd.f32 %v95_v4, %v82_v5 }
  0xd3   :  { %v104_v7 = vpop.f32.mrf.mxu0 }
  0xd4   :  { %v88_v8 = vpack.c.bf16 %v83_v6, %v83_v6 }
  0xd5   :  { %v85_v9 = vpop.f32.mrf.mxu0 }
  0xd6   :  { %89 = vst [vmem:[%s170_s3] sm:$0xf] %v88_v8 }
  0xd7   :  { %v105_v10 = vpop.f32.mrf.mxu0 }
  0xd8   :  { %94 = vsyncpa [#allocation3], 1 }

// kernel: _lambda_.26
= control target key start
LH: loop header
LB: loop body
LE: loop exit
PB: predicated region body
PF: predicated region fallthrough
CT: control target
= control target key end

     0   :  { %8 = vsyncpa [#allocation3], 0  ;;  %s535_s0 = inlined_call_operand.vmem [shape: bf16[8,128], index: 0, kind: input, shape index: {}]   ;;  %s536_s1 = inlined_call_operand.hbm [shape: bf16[128,512], index: 1, kind: input, shape index: {}]   ;;  %s537_s2 = inlined_call_operand.hbm [shape: f32[1,512], index: 2, kind: input, shape index: {}]   ;;  %s538_s3 = inlined_call_operand.vmem [shape: bf16[8,512], index: 3, kind: output, shape index: {}]  }
   0x1   :  { %9 = vsyncpa [#allocation5], 0  ;;  %s495_s12 = smov [#allocation2]  }
   0x2   :  { %s17_s13 = sshll.u32 %s495_s12, 4  ;;  %s18_s13 = int_to_ptr.vmem [resolvable:$true] %s17_s13 }
   0x3   :  { %s459_s14 = scalar_lea.vmem %s18_s13, 4096  ;;  %p464_p1 = scmp.lt.s32.totalorder %s18_s13, %s18_s13 }
   0x4   :  { %p460_p0 = scmp.ne.s32.totalorder %s18_s13, %s459_s14  ;;  %p465_p2 = scmp.lt.s32.totalorder %s459_s14, %s459_s14 }
   0x6   :  { %p466_p3 = por %p465_p2, %p464_p1 }
   0x8   :  { %p467_p4 = pnand %p466_p3, %p460_p0 }
   0xa   :  { %470 = shalt.err (!%p467_p4)
}
   0xb   :  { %s496_s15 = smov 256   ;;  %s497_s16 = smov 16  }
   0xc   :  { %23 = dma.hbm_to_vmem [thread:$0]  %s536_s1, 4096, %s18_s13, [#allocation3], %s496_s15, %s496_s15, %s497_s16  }
   0xd   :  { %s498_s19 = smov [#allocation4]  }
   0xe   :  { %s30_s20 = sshll.u32 %s498_s19, 4  ;;  %s31_s20 = int_to_ptr.vmem [resolvable:$true] %s30_s20 }
   0xf   :  { %s479_s21 = scalar_lea.vmem %s31_s20, 64  ;;  %p484_p6 = scmp.lt.s32.totalorder %s31_s20, %s31_s20 }
  0x10   :  { %p480_p5 = scmp.ne.s32.totalorder %s31_s20, %s479_s21  ;;  %p485_p7 = scmp.lt.s32.totalorder %s479_s21, %s479_s21 }
  0x12   :  { %p486_p8 = por %p485_p7, %p484_p6 }
  0x14   :  { %p487_p9 = pnand %p486_p8, %p480_p5 }
  0x16   :  { %490 = shalt.err (!%p487_p9)
}
  0x17   :  { %33 = dma.hbm_to_vmem [thread:$0]  %s537_s2, 64, %s31_s20, [#allocation5]  }
  0x18   :  { %491 = dma.done.wait [#allocation3], 4096  }
  0x19   :  { %492 = vsyncadd [#allocation3], 4294963200 }
  0x1a   :  { %493 = dma.done.wait [#allocation5], 64  }
  0x1b   :  { %494 = vsyncadd [#allocation5], 4294967232  ;;  %v499_v0 = vmov 0   ;;  %v403_v1 = vld [vmem:[#allocation2 + $0xe4] ss:$16 sps:$4 sm:$0xff]   ;;  %v76_v34 = vlaneseq }
  0x1c   :  { %288 = vmatprep.mubr.bf16.mxu0 %v499_v0  ;;  %329 = vmatprep.mubr.bf16.mxu1 %v499_v0  ;;  %v405_v2 = vld [vmem:[#allocation2 + $0xec] ss:$16 sps:$4 sm:$0xff]   ;;  %v407_v3 = vld [vmem:[#allocation2 + $0xe0] ss:$16 sps:$4 sm:$0xff]   ;;  %v408_v4 = vld [vmem:[#allocation2 + $0xe8] ss:$16 sps:$4 sm:$0xff]  }
  0x1d   :  { %256 = vmatprep.subr.bf16.mxu0 %v403_v1  ;;  %297 = vmatprep.subr.bf16.mxu1 %v405_v2  ;;  %v409_v5 = vld [vmem:[#allocation2 + $0xc4] ss:$16 sps:$4 sm:$0xff]   ;;  %v411_v6 = vld [vmem:[#allocation2 + $0xcc] ss:$16 sps:$4 sm:$0xff]   ;;  %v413_v7 = vld [vmem:[#allocation2 + $0xc0] ss:$16 sps:$4 sm:$0xff]  }
  0x1e   :  { %257 = vmatpush1.bf16.msra.mxu0 %v407_v3  ;;  %298 = vmatpush1.bf16.msra.mxu1 %v408_v4  ;;  %v414_v8 = vld [vmem:[#allocation2 + $0xc8] ss:$16 sps:$4 sm:$0xff]   ;;  %v415_v9 = vld [vmem:[#allocation2 + $0xa4] ss:$16 sps:$4 sm:$0xff]   ;;  %v417_v10 = vld [vmem:[#allocation2 + $0xac] ss:$16 sps:$4 sm:$0xff]  }
  0x1f   :  { %258 = vmatprep.subr.bf16.mxu0 %v409_v5  ;;  %299 = vmatprep.subr.bf16.mxu1 %v411_v6  ;;  %v419_v11 = vld [vmem:[#allocation2 + $0xa0] ss:$16 sps:$4 sm:$0xff]   ;;  %v420_v12 = vld [vmem:[#allocation2 + $0xa8] ss:$16 sps:$4 sm:$0xff]   ;;  %v421_v13 = vld [vmem:[#allocation2 + $0x84] ss:$16 sps:$4 sm:$0xff]  }
  0x20   :  { %v423_v14 = vld [vmem:[#allocation2 + $0x8c] ss:$16 sps:$4 sm:$0xff]   ;;  %v425_v15 = vld [vmem:[#allocation2 + $0x80] ss:$16 sps:$4 sm:$0xff]   ;;  %v426_v16 = vld [vmem:[#allocation2 + $0x88] ss:$16 sps:$4 sm:$0xff]  }
  0x21   :  { %v427_v17 = vld [vmem:[#allocation2 + $0x64] ss:$16 sps:$4 sm:$0xff]   ;;  %v429_v18 = vld [vmem:[#allocation2 + $0x6c] ss:$16 sps:$4 sm:$0xff]   ;;  %v431_v19 = vld [vmem:[#allocation2 + $0x60] ss:$16 sps:$4 sm:$0xff]  }
  0x22   :  { %259 = vmatpush1.bf16.msra.mxu0 %v413_v7  ;;  %300 = vmatpush1.bf16.msra.mxu1 %v414_v8  ;;  %v432_v20 = vld [vmem:[#allocation2 + $0x68] ss:$16 sps:$4 sm:$0xff]   ;;  %v433_v21 = vld [vmem:[#allocation2 + $0x44] ss:$16 sps:$4 sm:$0xff]   ;;  %v435_v22 = vld [vmem:[#allocation2 + $0x4c] ss:$16 sps:$4 sm:$0xff]  }
  0x23   :  { %260 = vmatprep.subr.bf16.mxu0 %v415_v9  ;;  %301 = vmatprep.subr.bf16.mxu1 %v417_v10  ;;  %v437_v23 = vld [vmem:[#allocation2 + $0x40] ss:$16 sps:$4 sm:$0xff]   ;;  %v438_v24 = vld [vmem:[#allocation2 + $0x48] ss:$16 sps:$4 sm:$0xff]   ;;  %v439_v25 = vld [vmem:[#allocation2 + $0x24] ss:$16 sps:$4 sm:$0xff]  }
  0x24   :  { %v441_v26 = vld [vmem:[#allocation2 + $0x2c] ss:$16 sps:$4 sm:$0xff]   ;;  %v443_v27 = vld [vmem:[#allocation2 + $0x20] ss:$16 sps:$4 sm:$0xff]   ;;  %v444_v28 = vld [vmem:[#allocation2 + $0x28] ss:$16 sps:$4 sm:$0xff]  }
  0x25   :  { %v445_v29 = vld [vmem:[#allocation2 + $0x4] ss:$16 sps:$4 sm:$0xff]   ;;  %v447_v30 = vld [vmem:[#allocation2 + $0xc] ss:$16 sps:$4 sm:$0xff]   ;;  %v449_v31 = vld [vmem:[#allocation2] ss:$16 sps:$4 sm:$0xff]  }
  0x26   :  { %261 = vmatpush1.bf16.msra.mxu0 %v419_v11  ;;  %302 = vmatpush1.bf16.msra.mxu1 %v420_v12  ;;  %v450_v32 = vld [vmem:[#allocation2 + $0x8] ss:$16 sps:$4 sm:$0xff]   ;;  %v41_v33 = vld [vmem:[%s535_s0] sm:$0xf]  ;;  %v77_v35 = vshrl.u32 %v76_v34, 7 }
  0x27   :  { %262 = vmatprep.subr.bf16.mxu0 %v421_v13  ;;  %303 = vmatprep.subr.bf16.mxu1 %v423_v14  ;;  %v74_v40 = vld [vmem:[#allocation4] sm:$0xf] }
  0x28   :  { %v78_v36 = vsub.s32 0, %v77_v35  ;;  %v86_v37 = vsub.s32 2, %v77_v35  ;;  %v82_v38 = vsub.s32 1, %v77_v35  ;;  %v90_v39 = vsub.s32 3, %v77_v35 }
  0x2a   :  { %263 = vmatpush1.bf16.msra.mxu0 %v425_v15  ;;  %304 = vmatpush1.bf16.msra.mxu1 %v426_v16  ;;  %v79_v41 = vrot.slane %v74_v40, %v78_v36  ;;  %v87_v42 = vrot.slane %v74_v40, %v86_v37  ;;  %v83_v43 = vrot.slane %v74_v40, %v82_v38 }
  0x2b   :  { %264 = vmatprep.subr.bf16.mxu0 %v427_v17  ;;  %305 = vmatprep.subr.bf16.mxu1 %v429_v18  ;;  %v91_v44 = vrot.slane %v74_v40, %v90_v39 }
  0x2e   :  { %265 = vmatpush1.bf16.msra.mxu0 %v431_v19  ;;  %306 = vmatpush1.bf16.msra.mxu1 %v432_v20 }
  0x2f   :  { %266 = vmatprep.subr.bf16.mxu0 %v433_v21  ;;  %307 = vmatprep.subr.bf16.mxu1 %v435_v22 }
  0x32   :  { %267 = vmatpush1.bf16.msra.mxu0 %v437_v23  ;;  %308 = vmatpush1.bf16.msra.mxu1 %v438_v24 }
  0x33   :  { %268 = vmatprep.subr.bf16.mxu0 %v439_v25  ;;  %309 = vmatprep.subr.bf16.mxu1 %v441_v26 }
  0x36   :  { %269 = vmatpush1.bf16.msra.mxu0 %v443_v27  ;;  %310 = vmatpush1.bf16.msra.mxu1 %v444_v28 }
  0x37   :  { %270 = vmatprep.subr.bf16.mxu0 %v445_v29  ;;  %311 = vmatprep.subr.bf16.mxu1 %v447_v30 }
  0x3a   :  { %271 = vmatpush1.bf16.msra.mxu0 %v449_v31  ;;  %312 = vmatpush1.bf16.msra.mxu1 %v450_v32 }
  0x3d   :  { %289 = vmatmul.mubr.bf16.vlgmr.msra.gmra.mxu0 %v41_v33  ;;  %330 = vmatmul.mubr.bf16.vlgmr.msra.gmra.mxu1 %v41_v33 }
  0xfd   :  { %v290_v45 = vpop.f32.mrf.mxu0  ;;  %v331_v46 = vpop.f32.mrf.mxu1 }
  0xfe   :  { %v291_v49 = vadd.f32 %v290_v45, %v79_v41  ;;  %v332_v50 = vadd.f32 %v331_v46, %v87_v42 }
  0xff   :  { %v292_v47 = vpop.f32.mrf.mxu0  ;;  %v333_v48 = vpop.f32.mrf.mxu1 }
 0x100   :  { %v293_v51 = vadd.f32 %v292_v47, %v83_v43  ;;  %v334_v52 = vadd.f32 %v333_v48, %v91_v44 }
 0x101   :  { %v294_v53 = vpop.f32.mrf.mxu0  ;;  %v335_v54 = vpop.f32.mrf.mxu1 }
 0x102   :  { %v396_v55 = vpack.c.bf16 %v293_v51, %v291_v49  ;;  %v397_v56 = vpack.c.bf16 %v334_v52, %v332_v50 }
 0x103   :  { %v295_v57 = vpop.f32.mrf.mxu0  ;;  %v336_v58 = vpop.f32.mrf.mxu1 }
 0x104   :  { %354 = vst [vmem:[%s538_s3] sm:$0xff] %v396_v55  ;;  %355 = vst [vmem:[%s538_s3 + $0x8] sm:$0xff] %v397_v56 }
 0x105   :  { %360 = vsyncpa [#allocation3], 1 }
 0x106   :  { %361 = vsyncpa [#allocation5], 1 }

// kernel: _lambda_.27
= control target key start
LH: loop header
LB: loop body
LE: loop exit
PB: predicated region body
PF: predicated region fallthrough
CT: control target
= control target key end

     0   :  { %s1118_s12 = smov 0   ;;  %s1120_s13 = smov 0   ;;  %s1238_s0 = inlined_call_operand.vmem [shape: bf16[2,8,768], index: 0, kind: input, shape index: {}, may-alias: {0,1,2}]   ;;  %s1239_s1 = inlined_call_operand.vmem [shape: bf16[2,8,768], index: 1, kind: input, shape index: {}, may-alias: {0,1,2}]   ;;  %s1240_s2 = inlined_call_operand.vmem [shape: bf16[2,8,768], index: 2, kind: input, shape index: {}, may-alias: {0,1,2}]   ;;  %s1241_s3 = inlined_call_operand.vmem [shape: bf16[2,8,128], index: 3, kind: output, shape index: {}]  }
   0x1   :  { %s1122_s14 = smov 0  }
   0x2 LB: > { %s32_s15 = sadd.s32 1, %s1086_s13  ;;  %p930_p0 = scmp.ge.s32.totalorder %s1090_s14, 1  ;;  %s1090_s14 = sphi %s1122_s14, %s13_s14   ;;  %s1086_s13 = sphi %s1120_s13, %s1243_s13   ;;  %s1082_s12 = sphi %s1118_s12, %s1242_s12  }
   0x3   : > { %p34_p1 = scmp.ge.s32.totalorder %s32_s15, 2  ;;  %p209_p2 = scmp.lt.s32.totalorder %s1090_s14, 3 }
   0x5   : > { %s1245_s15 = smov (%p34_p1, %s32_s15), 0  ;;  %p210_p3 = pnand %p930_p0, %p209_p2 }
   0x6   : > { %p263_p4 = scmp.lt.s32.totalorder (!%p210_p3), %s1082_s12, 1  ;;  %s1095_s24 = smov (!%p210_p3), 96  }
   0x7   : > { %213 = sbr.rel (%p210_p3) target bundleno = 1428 (0x594), region = 32  ;;  %s1096_s25 = smov (!%p210_p3), 64  }
   0x8   : > { %s1097_s26 = smov (!%p210_p3), 32  }
   0xc   : > { %v1092_v0 = vmov 0.0   ;;  %vm1093_vm0 = vmmov 0   ;;  %s1247_s12 = smov (!%p263_p4, %s1082_s12), 1  ;;  %vm318_vm1 = vcmask 261120   ;;  %v307_v4 = vlaneseq }
   0xd   : > { %968 = vmatprep.subr.bf16.mxu0 %v1092_v0  ;;  %970 = vmatprep.mubr.msk.bf16.mxu0 %vm1093_vm0, %v1092_v0  ;;  %s1145_s16 = smul.u32 24, %s1247_s12  ;;  %v1094_v8 = vmov -1e+09   ;;  %vm367_vm3 = vcmask 64512   ;;  %vm383_vm4 = vcmask 1043456   ;;  %vm553_vm5 = vcmask 523520  }
   0xe   : > { %974 = vmatprep.subr.bf16.mxu1 %v1092_v0  ;;  %976 = vmatprep.mubr.msk.bf16.mxu1 %vm1093_vm0, %v1092_v0  ;;  %v308_v5 = vshrl.u32 %v307_v4, 7  ;;  %v312_v6 = vand.u32 127, %v307_v4  ;;  %vm671_vm6 = vcmask 785920   ;;  %vm789_vm7 = vcmask 1048320   ;;  %s934_s4 = sshll.u32 %s1247_s12, 2 }
   0xf   : > { %s949_s17 = sadd.s32 4, %s1145_s16  ;;  %s274_s23 = scalar_lea.vmem %s1238_s0, %s1145_s16 }
  0x10   : > { %s283_s20 = scalar_lea.vmem %s1239_s1, %s949_s17  ;;  %v315_v3 = vld [vmem:[%s274_s23] sm:$0xf]  ;;  %vm313_vm2 = vcmp.le.s32.totalorder %v312_v6, %v308_v5  ;;  %s951_s27 = sadd.s32 8, %s1145_s16 }
  0x11   : > { %v316_v1 = vld [vmem:[%s283_s20] sm:$0xf]  ;;  %v1160_v9 = vsel %vm313_vm2, 0.0, %v1094_v8  ;;  %v937_v17 = vcombine.low %v315_v3, %v315_v3  ;;  %s293_s30 = scalar_lea.vmem %s1240_s2, %s951_s27  ;;  %s304_s7 = scalar_lea.vmem %s1241_s3, %s934_s4 }
  0x12   : > { %v323_v2 = vsel %vm318_vm1, %v316_v1, 0  ;;  %v938_v16 = vcombine.low %v316_v1, %v316_v1  ;;  %v1174_v23 = vld [vmem:[%s293_s30] sm:$0xf] }
  0x13   : > { %969 = vmatpush3.bf16.xpose.msra.mxu0 %v323_v2  ;;  %v385_v24 = vsel %vm383_vm4, %v1174_v23, 0 }
  0x14   : > { %986 = vmatprep.subr.bf16.mxu0 %v1092_v0  ;;  %436 = vrot.lane.b32.xlu1 %v938_v16, %s1095_s24 }
  0x15   : > { %975 = vmatpush3.bf16.msra.mxu1 %v385_v24 }
  0x16   : > { %980 = vmatprep.subr.bf16.mxu1 %v1092_v0 }
  0x18   : > { %431 = vrot.lane.b32.xlu1 %v937_v17, %s1095_s24 }
  0x1a   : > { %971 = vmatmul.mubr.msk.bf16.vlgmr.msra.gmra.mxu0 %vm318_vm1, %v315_v3 }
  0x1b   : > { %988 = vmatprep.mubr.msk.bf16.mxu0 %vm1093_vm0, %v1092_v0 }
  0x1c   : > { %555 = vrot.lane.b32.xlu1 %v937_v17, %s1096_s25 }
  0x20   : > { %675 = vrot.lane.b32.xlu1 %v938_v16, %s1097_s26 }
  0x24   : > { %673 = vrot.lane.b32.xlu1 %v937_v17, %s1097_s26 }
  0x86   : > { %v437_v27 = vpop.permute.xlu1 %436 }
  0x87   : > { %v442_v29 = vsel %vm318_vm1, %v437_v27, 0 }
  0x8a   : > { %v432_v31 = vpop.permute.xlu1 %431 }
  0x8e   : > { %v556_v33 = vpop.permute.xlu1 %555 }
  0x92   : > { %v676_v35 = vpop.permute.xlu1 %675 }
  0x93   : > { %v681_v36 = vsel %vm318_vm1, %v676_v35, 0 }
  0x96   : > { %v674_v37 = vpop.permute.xlu1 %673 }
  0xda   : > { %v359_v7 = vpop.f32.mrf.mxu0 }
  0xdb   : > { %v365_v10 = vmul.f32 0.17677669, %v359_v7 }
  0xdc   : > { %v972_v11 = vpop.f32.mrf.mxu0 }
  0xdd   : > { %v366_v12 = vadd.f32 %v365_v10, %v1160_v9  ;;  %v940_v10 = vcombine.low %v1174_v23, %v1174_v23 }
  0xde   : > { %v362_v13 = vpop.f32.mrf.mxu0 }
  0xdf   : > { %v368_v14 = vsel %vm367_vm3, %v366_v12, -inf }
  0xe0   : > { %369 = vmax.xlane.f32.xlu0 %v368_v14  ;;  %v973_v15 = vpop.f32.mrf.mxu0 }
 0x169   : > { %v370_v18 = vpop.xlane.xlu0 %369 }
 0x16a   : > { %v371_v19 = vsub.f32 %v366_v12, %v370_v18 }
 0x16c   : > { %v372_v20 = vmul.f32 1.442695, %v371_v19 }
 0x16e   : > { %1052 = vpow2.f32 %v372_v20 }
 0x17b   : > { %v1053_v21 = vpop.eup %1052 }
 0x17c   : > { %v374_v22 = vsel %vm367_vm3, %v1053_v21, 0.0 }
 0x17d   : > { %375 = vadd.xlane.f32.xlu0 %v374_v22 }
 0x193   : > { %557 = vrot.lane.b32.xlu0 %v938_v16, %s1096_s25 }
 0x206   : > { %v376_v25 = vpop.xlane.xlu0 %375 }
 0x207   : > { %1054 = vrcp.f32 %v376_v25 }
 0x20a   : > { %v558_v32 = vpop.permute.xlu0 %557 }
 0x20b   : > { %v563_v34 = vsel %vm318_vm1, %v558_v32, 0 }
 0x214   : > { %v1055_v26 = vpop.eup %1054 }
 0x215   : > { %v378_v28 = vmul.f32 %v1055_v26, %v1053_v21 }
 0x217   : > { %v379_v30 = vpack.c.bf16 %v378_v28, %v378_v28 }
 0x219   : > { %977 = vmatmul.mubr.msk.bf16.vlgmr.msra.gmra.mxu1 %vm367_vm3, %v379_v30 }
 0x21a   : > { %981 = vmatpush3.bf16.xpose.msra.mxu1 %v442_v29  ;;  %982 = vmatprep.mubr.msk.bf16.mxu1 %vm1093_vm0, %v1092_v0 }
 0x21b   : > { %992 = vmatprep.subr.bf16.mxu1 %v1092_v0 }
 0x221   : > { %983 = vmatmul.mubr.msk.bf16.vlgmr.msra.gmra.mxu1 %vm318_vm1, %v432_v31 }
 0x222   : > { %993 = vmatpush3.bf16.xpose.msra.mxu1 %v563_v34  ;;  %994 = vmatprep.mubr.msk.bf16.mxu1 %vm1093_vm0, %v1092_v0 }
 0x223   : > { %1004 = vmatprep.subr.bf16.mxu1 %v1092_v0 }
 0x229   : > { %995 = vmatmul.mubr.msk.bf16.vlgmr.msra.gmra.mxu1 %vm318_vm1, %v556_v33 }
 0x22a   : > { %1005 = vmatpush3.bf16.xpose.msra.mxu1 %v681_v36  ;;  %1006 = vmatprep.mubr.msk.bf16.mxu1 %vm1093_vm0, %v1092_v0 }
 0x231   : > { %1007 = vmatmul.mubr.msk.bf16.vlgmr.msra.gmra.mxu1 %vm318_vm1, %v674_v37 }
 0x2d9   : > { %v421_v38 = vpop.f32.mrf.mxu1 }
 0x2da   : > { %427 = vst.msk [vmem:[#allocation2] sm:$0xff] %vm318_vm1, %v421_v38 }
 0x2db   : > { %v978_v39 = vpop.f32.mrf.mxu1 }
 0x2dd   : > { %v424_v40 = vpop.f32.mrf.mxu1 }
 0x2df   : > { %v979_v41 = vpop.f32.mrf.mxu1 }
 0x2e1   : > { %v478_v42 = vpop.f32.mrf.mxu1 }
 0x2e2   : > { %v484_v43 = vmul.f32 0.17677669, %v478_v42 }
 0x2e3   : > { %v984_v44 = vpop.f32.mrf.mxu1 }
 0x2e4   : > { %v485_v45 = vadd.f32 %v484_v43, %v1160_v9 }
 0x2e5   : > { %v481_v46 = vpop.f32.mrf.mxu1 }
 0x2e6   : > { %v486_v47 = vsel %vm367_vm3, %v485_v45, -inf }
 0x2e7   : > { %487 = vmax.xlane.f32.xlu1 %v486_v47  ;;  %v985_v48 = vpop.f32.mrf.mxu1 }
 0x2e9   : > { %v599_v49 = vpop.f32.mrf.mxu1 }
 0x2ea   : > { %v605_v50 = vmul.f32 0.17677669, %v599_v49 }
 0x2eb   : > { %v996_v51 = vpop.f32.mrf.mxu1 }
 0x2ec   : > { %v606_v52 = vadd.f32 %v605_v50, %v1160_v9 }
 0x2ed   : > { %v602_v53 = vpop.f32.mrf.mxu1 }
 0x2ee   : > { %v607_v54 = vsel %vm367_vm3, %v606_v52, -inf }
 0x2ef   : > { %608 = vmax.xlane.f32.xlu0 %v607_v54  ;;  %v997_v55 = vpop.f32.mrf.mxu1 }
 0x2f1   : > { %v717_v56 = vpop.f32.mrf.mxu1 }
 0x2f2   : > { %v723_v57 = vmul.f32 0.17677669, %v717_v56 }
 0x2f3   : > { %v1008_v58 = vpop.f32.mrf.mxu1 }
 0x2f4   : > { %v724_v59 = vadd.f32 %v723_v57, %v1160_v9 }
 0x2f5   : > { %v720_v60 = vpop.f32.mrf.mxu1 }
 0x2f6   : > { %v725_v61 = vsel %vm367_vm3, %v724_v59, -inf }
 0x2f7   : > { %726 = vmax.xlane.f32.xlu1 %v725_v61  ;;  %v1009_v62 = vpop.f32.mrf.mxu1 }
 0x370   : > { %v488_v63 = vpop.xlane.xlu1 %487 }
 0x371   : > { %v489_v1 = vsub.f32 %v485_v45, %v488_v63 }
 0x373   : > { %v490_v2 = vmul.f32 1.442695, %v489_v1 }
 0x375   : > { %1056 = vpow2.f32 %v490_v2 }
 0x378   : > { %v609_v3 = vpop.xlane.xlu0 %608 }
 0x379   : > { %v610_v4 = vsub.f32 %v606_v52, %v609_v3 }
 0x37b   : > { %v611_v5 = vmul.f32 1.442695, %v610_v4 }
 0x37d   : > { %1058 = vpow2.f32 %v611_v5 }
 0x380   : > { %v727_v11 = vpop.xlane.xlu1 %726 }
 0x381   : > { %v728_v12 = vsub.f32 %v724_v59, %v727_v11 }
 0x382   : > { %v1057_v6 = vpop.eup %1056 }
 0x383   : > { %v492_v7 = vsel %vm367_vm3, %v1057_v6, 0.0  ;;  %v729_v13 = vmul.f32 1.442695, %v728_v12 }
 0x384   : > { %493 = vadd.xlane.f32.xlu1 %v492_v7 }
 0x385   : > { %1060 = vpow2.f32 %v729_v13 }
 0x38a   : > { %v1059_v8 = vpop.eup %1058 }
 0x38b   : > { %v613_v9 = vsel %vm367_vm3, %v1059_v8, 0.0 }
 0x38c   : > { %614 = vadd.xlane.f32.xlu0 %v613_v9 }
 0x392   : > { %v1061_v14 = vpop.eup %1060 }
 0x393   : > { %v731_v15 = vsel %vm367_vm3, %v1061_v14, 0.0 }
 0x395   : > { %619 = vrot.lane.b32.xlu1 %v940_v10, %s1096_s25 }
 0x3a2   : > { %501 = vrot.lane.b32.xlu0 %v940_v10, %s1095_s24 }
 0x3b9   : > { %732 = vadd.xlane.f32.xlu1 %v731_v15 }
 0x3ca   : > { %737 = vrot.lane.b32.xlu1 %v940_v10, %s1097_s26 }
 0x40d   : > { %v494_v16 = vpop.xlane.xlu1 %493 }
 0x40e   : > { %1062 = vrcp.f32 %v494_v16 }
 0x411   : > { %v620_v22 = vpop.permute.xlu1 %619 }
 0x412   : > { %v625_v24 = vsel %vm383_vm4, %v620_v22, 0 }
 0x415   : > { %v615_v17 = vpop.xlane.xlu0 %614 }
 0x416   : > { %1064 = vrcp.f32 %v615_v17 }
 0x419   : > { %v502_v18 = vpop.permute.xlu0 %501 }
 0x41a   : > { %v507_v19 = vsel %vm383_vm4, %v502_v18, 0 }
 0x41b   : > { %v1063_v20 = vpop.eup %1062  ;;  %987 = vmatpush3.bf16.msra.mxu0 %v507_v19 }
 0x41c   : > { %998 = vmatprep.subr.bf16.mxu0 %v1092_v0  ;;  %v496_v21 = vmul.f32 %v1063_v20, %v1057_v6 }
 0x41e   : > { %v497_v23 = vpack.c.bf16 %v496_v21, %v496_v21 }
 0x420   : > { %989 = vmatmul.mubr.msk.bf16.vlgmr.msra.gmra.mxu0 %vm367_vm3, %v497_v23 }
 0x421   : > { %999 = vmatpush3.bf16.msra.mxu0 %v625_v24  ;;  %1000 = vmatprep.mubr.msk.bf16.mxu0 %vm1093_vm0, %v1092_v0 }
 0x422   : > { %1010 = vmatprep.subr.bf16.mxu0 %v1092_v0 }
 0x423   : > { %v1065_v25 = vpop.eup %1064 }
 0x424   : > { %v617_v26 = vmul.f32 %v1065_v25, %v1059_v8 }
 0x426   : > { %v618_v27 = vpack.c.bf16 %v617_v26, %v617_v26 }
 0x428   : > { %1001 = vmatmul.mubr.msk.bf16.vlgmr.msra.gmra.mxu0 %vm367_vm3, %v618_v27 }
 0x429   : > { %1012 = vmatprep.mubr.msk.bf16.mxu0 %vm1093_vm0, %v1092_v0 }
 0x442   : > { %v733_v28 = vpop.xlane.xlu1 %732 }
 0x443   : > { %1066 = vrcp.f32 %v733_v28 }
 0x446   : > { %v738_v29 = vpop.permute.xlu1 %737 }
 0x447   : > { %v743_v30 = vsel %vm383_vm4, %v738_v29, 0 }
 0x448   : > { %1011 = vmatpush3.bf16.msra.mxu0 %v743_v30 }
 0x450   : > { %v1067_v31 = vpop.eup %1066 }
 0x451   : > { %v735_v32 = vmul.f32 %v1067_v31, %v1061_v14 }
 0x453   : > { %v736_v33 = vpack.c.bf16 %v735_v32, %v735_v32 }
 0x455   : > { %1013 = vmatmul.mubr.msk.bf16.vlgmr.msra.gmra.mxu0 %vm367_vm3, %v736_v33 }
 0x4e0   : > { %v543_v34 = vpop.f32.mrf.mxu0 }
 0x4e1   : > { %550 = vrot.lane.b32.xlu0 %v543_v34, %s1097_s26 }
 0x4e2   : > { %v990_v35 = vpop.f32.mrf.mxu0 }
 0x4e4   : > { %v546_v36 = vpop.f32.mrf.mxu0 }
 0x4e6   : > { %v991_v37 = vpop.f32.mrf.mxu0 }
 0x4e8   : > { %v661_v38 = vpop.f32.mrf.mxu0 }
 0x4e9   : > { %668 = vrot.lane.b32.xlu1 %v661_v38, %s1096_s25 }
 0x4ea   : > { %v1002_v0 = vpop.f32.mrf.mxu0 }
 0x4ec   : > { %v664_v39 = vpop.f32.mrf.mxu0 }
 0x4ee   : > { %v1003_v40 = vpop.f32.mrf.mxu0 }
 0x515   : > { %v779_v41 = vpop.f32.mrf.mxu0 }
 0x516   : > { %786 = vrot.lane.b32.xlu0 %v779_v41, %s1095_s24 }
 0x517   : > { %v1014_v42 = vpop.f32.mrf.mxu0 }
 0x519   : > { %v782_v43 = vpop.f32.mrf.mxu0 }
 0x51b   : > { %v1015_v44 = vpop.f32.mrf.mxu0 }
 0x553   : > { %v551_v45 = vpop.permute.xlu0 %550 }
 0x554   : > { %554 = vst.msk [vmem:[#allocation2] sm:$0xff] %vm553_vm5, %v551_v45 }
 0x55b   : > { %v669_v46 = vpop.permute.xlu1 %668 }
 0x55c   : > { %672 = vst.msk [vmem:[#allocation2] sm:$0xff] %vm671_vm6, %v669_v46 }
 0x588   : > { %v787_v47 = vpop.permute.xlu0 %786 }
 0x589   : > { %790 = vst.msk [vmem:[#allocation2] sm:$0xff] %vm789_vm7, %v787_v47 }
 0x590   : > { %v791_v48 = vld [vmem:[#allocation2] sm:$0xff] }
 0x591   : > { %v792_v49 = vpack.c.bf16 %v791_v48, %v791_v48 }
 0x593   : > { %793 = vst [vmem:[%s304_s7] sm:$0xf] %v792_v49 }
 0x594 PF: > { %s13_s14 = sadd.s32 1, %s1090_s14   ;;  %s1242_s12 = smov %s1086_s13 }
 0x595   : > { %p10_p5 = scmp.ge.s32.totalorder %s13_s14, 4   ;;  %s1243_s13 = smov %s1245_s15 }
 0x597   :  { %12 = sbr.rel (!%p10_p5) target bundleno = 2 (0x2), region = 68 }

// kernel: _lambda_.25
= control target key start
LH: loop header
LB: loop body
LE: loop exit
PB: predicated region body
PF: predicated region fallthrough
CT: control target
= control target key end

     0   :  { %s1033_s12 = smov 0   ;;  %s1035_s13 = smov 0   ;;  %s1213_s0 = inlined_call_operand.vmem [shape: f32[16,128], index: 0, kind: input, shape index: {}]   ;;  %s1214_s1 = inlined_call_operand.vmem [shape: bf16[128,768], index: 1, kind: input, shape index: {}]   ;;  %s1215_s2 = inlined_call_operand.vmem [shape: f32[1,768], index: 2, kind: input, shape index: {}]   ;;  %s1216_s3 = inlined_call_operand.vmem [shape: bf16[16,768], index: 3, kind: output, shape index: {}]  }
   0x1   :  { %s1037_s14 = smov 0   ;;  %s1039_s15 = smov 0  }
   0x2   :  { %s1041_s16 = smov 0  }
   0x3 LB: > { %s28_s17 = sadd.s32 1, %s1004_s15  ;;  %s783_s18 = sadd.s32 4294967295, %s1008_s16   ;;  %s1008_s16 = sphi %s1041_s16, %s13_s16   ;;  %s1004_s15 = sphi %s1039_s15, %s1221_s15   ;;  %s1000_s14 = sphi %s1037_s14, %s1220_s14   ;;  %s996_s13 = sphi %s1035_s13, %s1219_s13   ;;  %s992_s12 = sphi %s1033_s12, %s1218_s12  }
   0x4   : > { %p30_p0 = scmp.ge.s32.totalorder %s28_s17, 2  ;;  %p76_p1 = scmp.ne.s32.totalorder %s996_s13, %s992_s12 }
   0x5   : > { %p77_p2 = scmp.eq.s32.totalorder %s1008_s16, 0  ;;  %p134_p4 = scmp.eq.s32.totalorder %s783_s18, 1 }
   0x6   : > { %s1223_s17 = smov (%p30_p0, %s28_s17), 0  ;;  %s69_s20 = sadd.s32 1, %s996_s13 }
   0x7   : > { %p78_p3 = por %p77_p2, %p76_p1  ;;  %s65_s19 = ssub.s32 %s1004_s15, %s1223_s17 }
   0x8   : > { %p67_p5 = scmp.eq.s32.totalorder %s65_s19, 0  ;;  %p1068_p6 = por %p134_p4, %p76_p1 }
   0x9   : > { %p787_p7 = scmp.ge.s32.totalorder %s1008_s16, 2 }
   0xa   : > { %s1073_s22 = scalar_select %p67_p5, %s996_s13, %s69_s20  }
   0xb   : > { %168 = sbr.rel (%p787_p7) target bundleno = 39 (0x27), region = 20 }
  0x10   : > { %171 = sbr.rel (!%p78_p3) target bundleno = 39 (0x27), region = 24  ;;  %s173_s23 = sand.u32 (%p78_p3), 1, %s996_s13  }
  0x11   : > { %s857_s24 = smul.u32 (%p78_p3), 12, %s1004_s15 }
  0x12   : > { %s892_s25 = smul.u32 (%p78_p3), 192, %s173_s23 }
  0x13   : > { %s1081_s28 = scalar_lea.vmem (%p78_p3), %s1214_s1, %s857_s24 }
  0x14   : > { %v196_v0 = vld [vmem:[%s1081_s28] sm:$0xff] (%p78_p3)  ;;  %v198_v1 = vld [vmem:[%s1081_s28 + $0x18] sm:$0xff] (%p78_p3)  ;;  %v200_v2 = vld [vmem:[%s1081_s28 + $0x30] sm:$0xff] (%p78_p3)  ;;  %s1086_s29 = scalar_lea.vmem (%p78_p3), [#allocation2], %s892_s25 }
  0x15   : > { %197 = vst [vmem:[%s1086_s29] sm:$0xff] %v196_v0  ;;  %199 = vst [vmem:[%s1086_s29 + $0xc] sm:$0xff] %v198_v1  ;;  %v202_v3 = vld [vmem:[%s1081_s28 + $0x48] sm:$0xff]  ;;  %v204_v4 = vld [vmem:[%s1081_s28 + $0x60] sm:$0xff] }
  0x16   : > { %201 = vst [vmem:[%s1086_s29 + $0x18] sm:$0xff] %v200_v2  ;;  %v206_v5 = vld [vmem:[%s1081_s28 + $0x78] sm:$0xff]  ;;  %203 = vst [vmem:[%s1086_s29 + $0x24] sm:$0xff] %v202_v3  ;;  %v208_v6 = vld [vmem:[%s1081_s28 + $0x90] sm:$0xff] }
  0x17   : > { %205 = vst [vmem:[%s1086_s29 + $0x30] sm:$0xff] %v204_v4  ;;  %207 = vst [vmem:[%s1086_s29 + $0x3c] sm:$0xff] %v206_v5  ;;  %v210_v7 = vld [vmem:[%s1081_s28 + $0xa8] sm:$0xff]  ;;  %v212_v8 = vld [vmem:[%s1081_s28 + $0xc0] sm:$0xff] }
  0x18   : > { %209 = vst [vmem:[%s1086_s29 + $0x48] sm:$0xff] %v208_v6  ;;  %211 = vst [vmem:[%s1086_s29 + $0x54] sm:$0xff] %v210_v7  ;;  %v214_v9 = vld [vmem:[%s1081_s28 + $0xd8] sm:$0xff]  ;;  %v216_v10 = vld [vmem:[%s1081_s28 + $0xf0] sm:$0xff] }
  0x19   : > { %213 = vst [vmem:[%s1086_s29 + $0x60] sm:$0xff] %v212_v8  ;;  %v218_v11 = vld [vmem:[%s1081_s28 + $0x108] sm:$0xff]  ;;  %215 = vst [vmem:[%s1086_s29 + $0x6c] sm:$0xff] %v214_v9  ;;  %v220_v12 = vld [vmem:[%s1081_s28 + $0x120] sm:$0xff] }
  0x1a   : > { %217 = vst [vmem:[%s1086_s29 + $0x78] sm:$0xff] %v216_v10  ;;  %219 = vst [vmem:[%s1086_s29 + $0x84] sm:$0xff] %v218_v11  ;;  %v222_v13 = vld [vmem:[%s1081_s28 + $0x138] sm:$0xff]  ;;  %v224_v14 = vld [vmem:[%s1081_s28 + $0x150] sm:$0xff] }
  0x1b   : > { %221 = vst [vmem:[%s1086_s29 + $0x90] sm:$0xff] %v220_v12  ;;  %223 = vst [vmem:[%s1086_s29 + $0x9c] sm:$0xff] %v222_v13  ;;  %v226_v15 = vld [vmem:[%s1081_s28 + $0x168] sm:$0xff]  ;;  %v791_v17 = vld [vmem:[%s1081_s28 + $0x20] sm:$0xf] }
  0x1c   : > { %225 = vst [vmem:[%s1086_s29 + $0xa8] sm:$0xff] %v224_v14  ;;  %v789_v16 = vld [vmem:[%s1081_s28 + $0x8] sm:$0xf]  ;;  %227 = vst [vmem:[%s1086_s29 + $0xb4] sm:$0xff] %v226_v15  ;;  %v793_v18 = vld [vmem:[%s1081_s28 + $0x38] sm:$0xf] }
  0x1d   : > { %790 = vst [vmem:[%s1086_s29 + $0x8] sm:$0xf] %v789_v16  ;;  %792 = vst [vmem:[%s1086_s29 + $0x14] sm:$0xf] %v791_v17  ;;  %v795_v19 = vld [vmem:[%s1081_s28 + $0x50] sm:$0xf] }
  0x1e   : > { %v797_v20 = vld [vmem:[%s1081_s28 + $0x68] sm:$0xf]  ;;  %794 = vst [vmem:[%s1086_s29 + $0x20] sm:$0xf] %v793_v18  ;;  %796 = vst [vmem:[%s1086_s29 + $0x2c] sm:$0xf] %v795_v19 }
  0x1f   : > { %798 = vst [vmem:[%s1086_s29 + $0x38] sm:$0xf] %v797_v20  ;;  %v799_v21 = vld [vmem:[%s1081_s28 + $0x80] sm:$0xf]  ;;  %v801_v22 = vld [vmem:[%s1081_s28 + $0x98] sm:$0xf] }
  0x20   : > { %v803_v23 = vld [vmem:[%s1081_s28 + $0xb0] sm:$0xf]  ;;  %800 = vst [vmem:[%s1086_s29 + $0x44] sm:$0xf] %v799_v21  ;;  %802 = vst [vmem:[%s1086_s29 + $0x50] sm:$0xf] %v801_v22 }
  0x21   : > { %804 = vst [vmem:[%s1086_s29 + $0x5c] sm:$0xf] %v803_v23  ;;  %v805_v24 = vld [vmem:[%s1081_s28 + $0xc8] sm:$0xf]  ;;  %v807_v25 = vld [vmem:[%s1081_s28 + $0xe0] sm:$0xf] }
  0x22   : > { %v809_v26 = vld [vmem:[%s1081_s28 + $0xf8] sm:$0xf]  ;;  %806 = vst [vmem:[%s1086_s29 + $0x68] sm:$0xf] %v805_v24  ;;  %808 = vst [vmem:[%s1086_s29 + $0x74] sm:$0xf] %v807_v25 }
  0x23   : > { %810 = vst [vmem:[%s1086_s29 + $0x80] sm:$0xf] %v809_v26  ;;  %v811_v27 = vld [vmem:[%s1081_s28 + $0x110] sm:$0xf]  ;;  %v813_v28 = vld [vmem:[%s1081_s28 + $0x128] sm:$0xf] }
  0x24   : > { %v815_v29 = vld [vmem:[%s1081_s28 + $0x140] sm:$0xf]  ;;  %812 = vst [vmem:[%s1086_s29 + $0x8c] sm:$0xf] %v811_v27  ;;  %814 = vst [vmem:[%s1086_s29 + $0x98] sm:$0xf] %v813_v28 }
  0x25   : > { %816 = vst [vmem:[%s1086_s29 + $0xa4] sm:$0xf] %v815_v29  ;;  %v817_v30 = vld [vmem:[%s1081_s28 + $0x158] sm:$0xf]  ;;  %v819_v31 = vld [vmem:[%s1081_s28 + $0x170] sm:$0xf] }
  0x26   : > { %818 = vst [vmem:[%s1086_s29 + $0xb0] sm:$0xf] %v817_v30  ;;  %820 = vst [vmem:[%s1086_s29 + $0xbc] sm:$0xf] %v819_v31 }
  0x27 PF: > { %p821_p8 = scmp.ge.s32.totalorder %s1008_s16, 1  ;;  %p280_p9 = scmp.lt.s32.totalorder %s1008_s16, 3 }
  0x29   : > { %p281_p10 = pnand %p821_p8, %p280_p9 }
  0x2a   : > { %s287_s30 = sand.u32 (!%p281_p10), 1, %s992_s12   ;;  %s332_s10 = smul.u32 (!%p281_p10), 3, %s1000_s14 }
  0x2b   : > { %284 = sbr.rel (%p281_p10) target bundleno = 294 (0x126), region = 54 }
  0x2c   : > { %s893_s4 = smul.u32 (!%p281_p10), 192, %s287_s30  ;;  %p333_p11 = scmp.lt.s32.totalorder (!%p281_p10), %s332_s10, 5 }
  0x2d   : > { %s894_s20 = smul.u32 (!%p281_p10), 24, %s287_s30 }
  0x2e   : > { %s1154_s5 = scalar_lea.vmem (!%p281_p10), [#allocation2], %s893_s4 }
  0x2f   : > { %s320_s23 = scalar_lea.vmem (!%p281_p10), [#allocation3], %s894_s20 }
  0x30   : > { %v1010_v32 = vmov 0.0   ;;  %vm1011_vm0 = vmmov 0   ;;  %v1012_v33 = vmov 0   ;;  %v938_v34 = vld [vmem:[%s1154_s5 + $0xac] ss:$12 sps:$4 sm:$0xff]   ;;  %v340_v57 = vld [vmem:[%s1213_s0] sm:$0xff]  ;;  %v377_v61 = vlaneseq }
  0x31   : > { %872 = vmatprep.subr.bf16.mxu1 %v1010_v32  ;;  %888 = vmatprep.mubr.msk.bf16.mxu1 %vm1011_vm0, %v1010_v32  ;;  %v940_v35 = vld [vmem:[%s1154_s5 + $0xb0] ss:$12 sps:$4 sm:$0xff]   ;;  %v941_v36 = vld [vmem:[%s1154_s5 + $0xa8] ss:$12 sps:$4 sm:$0xff]   ;;  %v944_v38 = vld [vmem:[%s1154_s5 + $0x98] ss:$12 sps:$4 sm:$0xff]  }
  0x32   : > { %552 = vmatprep.mubr.bf16.mxu0 %v1012_v33  ;;  %520 = vmatprep.subr.bf16.mxu0 %v938_v34  ;;  %v942_v37 = vld [vmem:[%s1154_s5 + $0x94] ss:$12 sps:$4 sm:$0xff]   ;;  %v945_v39 = vld [vmem:[%s1154_s5 + $0x90] ss:$12 sps:$4 sm:$0xff]   ;;  %v949_v42 = vld [vmem:[%s1154_s5 + $0x78] ss:$12 sps:$4 sm:$0xff]  }
  0x33   : > { %873 = vmatpush3.bf16.msra.mxu1 %v940_v35  ;;  %521 = vmatpush1.bf16.msra.mxu0 %v941_v36  ;;  %v946_v40 = vld [vmem:[%s1154_s5 + $0x7c] ss:$12 sps:$4 sm:$0xff]   ;;  %v948_v41 = vld [vmem:[%s1154_s5 + $0x80] ss:$12 sps:$4 sm:$0xff]   ;;  %v950_v43 = vld [vmem:[%s1154_s5 + $0x64] ss:$12 sps:$4 sm:$0xff]  }
  0x34   : > { %874 = vmatprep.subr.bf16.mxu1 %v1010_v32  ;;  %522 = vmatprep.subr.bf16.mxu0 %v942_v37  ;;  %v952_v44 = vld [vmem:[%s1154_s5 + $0x68] ss:$12 sps:$4 sm:$0xff]   ;;  %v953_v45 = vld [vmem:[%s1154_s5 + $0x60] ss:$12 sps:$4 sm:$0xff]   ;;  %v956_v47 = vld [vmem:[%s1154_s5 + $0x50] ss:$12 sps:$4 sm:$0xff]  }
  0x35   : > { %v954_v46 = vld [vmem:[%s1154_s5 + $0x4c] ss:$12 sps:$4 sm:$0xff]   ;;  %v957_v48 = vld [vmem:[%s1154_s5 + $0x48] ss:$12 sps:$4 sm:$0xff]   ;;  %v961_v51 = vld [vmem:[%s1154_s5 + $0x30] ss:$12 sps:$4 sm:$0xff]  }
  0x36   : > { %v958_v49 = vld [vmem:[%s1154_s5 + $0x34] ss:$12 sps:$4 sm:$0xff]   ;;  %v960_v50 = vld [vmem:[%s1154_s5 + $0x38] ss:$12 sps:$4 sm:$0xff]   ;;  %v962_v52 = vld [vmem:[%s1154_s5 + $0x1c] ss:$12 sps:$4 sm:$0xff]  }
  0x37   : > { %875 = vmatpush3.bf16.msra.mxu1 %v944_v38  ;;  %523 = vmatpush1.bf16.msra.mxu0 %v945_v39  ;;  %v964_v53 = vld [vmem:[%s1154_s5 + $0x20] ss:$12 sps:$4 sm:$0xff]   ;;  %v965_v54 = vld [vmem:[%s1154_s5 + $0x18] ss:$12 sps:$4 sm:$0xff]   ;;  %v968_v56 = vld [vmem:[%s1154_s5 + $0x8] ss:$12 sps:$4 sm:$0xff]  }
  0x38   : > { %876 = vmatprep.subr.bf16.mxu1 %v1010_v32  ;;  %524 = vmatprep.subr.bf16.mxu0 %v946_v40  ;;  %v966_v55 = vld [vmem:[%s1154_s5 + $0x4] ss:$12 sps:$4 sm:$0xff]   ;;  %v341_v58 = vld [vmem:[%s1213_s0 + $0x8] sm:$0xff]  ;;  %s1225_s10 = smov (!%p333_p11, %s332_s10), 5  ;;  %v378_v62 = vshrl.u32 %v377_v61, 7  ;;  %s862_s12 = smul.u32 (%p1068_p6), 12, %s1000_s14 }
  0x39   : > { %v969_v59 = vld [vmem:[%s1154_s5] ss:$12 sps:$4 sm:$0xff]   ;;  %v342_v60 = vpack.c.bf16 %v341_v58, %v340_v57  ;;  %s335_s19 = scalar_lea.vmem %s1215_s2, %s1225_s10 }
  0x3a   : > { %v387_v63 = vsub.s32 2, %v378_v62  ;;  %v375_v0 = vld [vmem:[%s335_s19] sm:$0x7]  ;;  %v379_v1 = vsub.s32 0, %v378_v62  ;;  %v383_v2 = vsub.s32 1, %v378_v62  ;;  %s640_s26 = scalar_lea.vmem (%p1068_p6), %s1216_s3, %s862_s12 }
  0x3b   : > { %877 = vmatpush3.bf16.msra.mxu1 %v948_v41  ;;  %525 = vmatpush1.bf16.msra.mxu0 %v949_v42 }
  0x3c   : > { %878 = vmatprep.subr.bf16.mxu1 %v1010_v32  ;;  %526 = vmatprep.subr.bf16.mxu0 %v950_v43  ;;  %v388_v3 = vrot.slane %v375_v0, %v387_v63  ;;  %v380_v5 = vrot.slane %v375_v0, %v379_v1  ;;  %v384_v6 = vrot.slane %v375_v0, %v383_v2 }
  0x3f   : > { %879 = vmatpush3.bf16.msra.mxu1 %v952_v44  ;;  %527 = vmatpush1.bf16.msra.mxu0 %v953_v45 }
  0x40   : > { %880 = vmatprep.subr.bf16.mxu1 %v1010_v32  ;;  %528 = vmatprep.subr.bf16.mxu0 %v954_v46 }
  0x43   : > { %881 = vmatpush3.bf16.msra.mxu1 %v956_v47  ;;  %529 = vmatpush1.bf16.msra.mxu0 %v957_v48 }
  0x44   : > { %882 = vmatprep.subr.bf16.mxu1 %v1010_v32  ;;  %530 = vmatprep.subr.bf16.mxu0 %v958_v49 }
  0x47   : > { %883 = vmatpush3.bf16.msra.mxu1 %v960_v50  ;;  %531 = vmatpush1.bf16.msra.mxu0 %v961_v51 }
  0x48   : > { %884 = vmatprep.subr.bf16.mxu1 %v1010_v32  ;;  %532 = vmatprep.subr.bf16.mxu0 %v962_v52 }
  0x4b   : > { %885 = vmatpush3.bf16.msra.mxu1 %v964_v53  ;;  %533 = vmatpush1.bf16.msra.mxu0 %v965_v54 }
  0x4c   : > { %886 = vmatprep.subr.bf16.mxu1 %v1010_v32  ;;  %534 = vmatprep.subr.bf16.mxu0 %v966_v55 }
  0x4f   : > { %887 = vmatpush3.bf16.msra.mxu1 %v968_v56  ;;  %535 = vmatpush1.bf16.msra.mxu0 %v969_v59 }
  0x52   : > { %889 = vmatmul.mubr.bf16.vlgmr.msra.gmra.mxu1 %v342_v60  ;;  %553 = vmatmul.mubr.bf16.vlgmr.msra.gmra.mxu0 %v342_v60 }
 0x112   : > { %v597_v4 = vpop.f32.mrf.mxu1  ;;  %v554_v8 = vpop.f32.mrf.mxu0 }
 0x113   : > { %v598_v7 = vadd.f32 %v597_v4, %v388_v3  ;;  %v555_v12 = vadd.f32 %v554_v8, %v380_v5 }
 0x114   : > { %v890_v9 = vpop.f32.mrf.mxu1  ;;  %v556_v11 = vpop.f32.mrf.mxu0 }
 0x115   : > { %v859_v10 = vpack.c.bf16 %v598_v7, %v598_v7  ;;  %v557_v13 = vadd.f32 %v556_v11, %v384_v6 }
 0x116   : > { %v600_v14 = vpop.f32.mrf.mxu1  ;;  %v558_v16 = vpop.f32.mrf.mxu0 }
 0x117   : > { %625 = vst [vmem:[%s320_s23 + $0x8] sm:$0xf] %v859_v10  ;;  %v601_v15 = vadd.f32 %v600_v14, %v388_v3  ;;  %v858_v17 = vpack.c.bf16 %v557_v13, %v555_v12  ;;  %v559_v21 = vadd.f32 %v558_v16, %v380_v5 }
 0x118   : > { %v891_v18 = vpop.f32.mrf.mxu1  ;;  %v560_v20 = vpop.f32.mrf.mxu0 }
 0x119   : > { %v861_v19 = vpack.c.bf16 %v601_v15, %v601_v15  ;;  %624 = vst [vmem:[%s320_s23] sm:$0xff] %v858_v17  ;;  %v561_v22 = vadd.f32 %v560_v20, %v384_v6  ;;  %634 = sbr.rel (!%p1068_p6) target bundleno = 294 (0x126), region = 62 }
 0x11b   : > { %627 = vst [vmem:[%s320_s23 + $0x14] sm:$0xf] %v861_v19  ;;  %v860_v23 = vpack.c.bf16 %v561_v22, %v559_v21 }
 0x11d   : > { %626 = vst [vmem:[%s320_s23 + $0xc] sm:$0xff] %v860_v23 }
 0x11e   : > { %v851_v26 = vld [vmem:[%s320_s23 + $0x8] sm:$0xf] }
 0x11f   : > { %852 = vst [vmem:[%s640_s26 + $0x8] sm:$0xf] %v851_v26 }
 0x120   : > { %v655_v24 = vld [vmem:[%s320_s23] sm:$0xff] }
 0x121   : > { %656 = vst [vmem:[%s640_s26] sm:$0xff] %v655_v24 }
 0x122   : > { %v853_v27 = vld [vmem:[%s320_s23 + $0x14] sm:$0xf] }
 0x123   : > { %854 = vst [vmem:[%s640_s26 + $0x20] sm:$0xf] %v853_v27 }
 0x124   : > { %v657_v25 = vld [vmem:[%s320_s23 + $0xc] sm:$0xff] }
 0x125   : > { %658 = vst [vmem:[%s640_s26 + $0x18] sm:$0xff] %v657_v25 }
 0x126 PF: > { %s13_s16 = sadd.s32 1, %s1008_s16   ;;  %s1218_s12 = smov %s996_s13 }
 0x127   : > { %p10_p12 = scmp.ge.s32.totalorder %s13_s16, 4   ;;  %s1219_s13 = smov %s1073_s22 }
 0x128   : > { %s1220_s14 = smov %s1004_s15  ;;  %s1221_s15 = smov %s1223_s17 }
 0x129   :  { %12 = sbr.rel (!%p10_p12) target bundleno = 3 (0x3), region = 137 }

// kernel: _lambda_.33
= control target key start
LH: loop header
LB: loop body
LE: loop exit
PB: predicated region body
PF: predicated region fallthrough
CT: control target
= control target key end

     0   :  { %v208_v0 = vmov 0.0   ;;  %vm209_vm0 = vmmov 0   ;;  %s263_s1 = inlined_call_operand.vmem [shape: bf16[128,128], index: 1, kind: input, shape index: {}]   ;;  %s264_s0 = inlined_call_operand.vmem [shape: bf16[16,128], index: 0, kind: input, shape index: {}]   ;;  %s265_s2 = inlined_call_operand.vmem [shape: f32[1,128], index: 2, kind: input, shape index: {}]   ;;  %s266_s3 = inlined_call_operand.vmem [shape: bf16[16,128], index: 3, kind: output, shape index: {}]  }
   0x1   :  { %177 = vmatprep.subr.bf16.mxu0 %v208_v0  ;;  %v199_v1 = vld [vmem:[%s263_s1 + $0x38] sm:$0xff]   ;;  %193 = vmatprep.mubr.msk.bf16.mxu0 %vm209_vm0, %v208_v0  ;;  %v200_v2 = vld [vmem:[%s263_s1 + $0x30] sm:$0xff]   ;;  %v201_v3 = vld [vmem:[%s263_s1 + $0x28] sm:$0xff]  }
   0x2   :  { %178 = vmatpush3.bf16.msra.mxu0 %v199_v1  ;;  %v202_v4 = vld [vmem:[%s263_s1 + $0x20] sm:$0xff]   ;;  %v203_v5 = vld [vmem:[%s263_s1 + $0x18] sm:$0xff]   ;;  %v204_v6 = vld [vmem:[%s263_s1 + $0x10] sm:$0xff]  }
   0x3   :  { %179 = vmatprep.subr.bf16.mxu0 %v208_v0  ;;  %v205_v7 = vld [vmem:[%s263_s1 + $0x8] sm:$0xff]   ;;  %v206_v8 = vld [vmem:[%s263_s1] sm:$0xff]  }
   0x4   :  { %v207_v9 = vld [vmem:[%s264_s0] sm:$0xff]  }
   0x5   :  { %v149_v11 = vld [vmem:[%s265_s2] ss:$0 sm:$0xff] }
   0x6   :  { %180 = vmatpush3.bf16.msra.mxu0 %v200_v2 }
   0x7   :  { %181 = vmatprep.subr.bf16.mxu0 %v208_v0 }
   0xa   :  { %182 = vmatpush3.bf16.msra.mxu0 %v201_v3 }
   0xb   :  { %183 = vmatprep.subr.bf16.mxu0 %v208_v0 }
   0xe   :  { %184 = vmatpush3.bf16.msra.mxu0 %v202_v4 }
   0xf   :  { %185 = vmatprep.subr.bf16.mxu0 %v208_v0 }
  0x12   :  { %186 = vmatpush3.bf16.msra.mxu0 %v203_v5 }
  0x13   :  { %187 = vmatprep.subr.bf16.mxu0 %v208_v0 }
  0x16   :  { %188 = vmatpush3.bf16.msra.mxu0 %v204_v6 }
  0x17   :  { %189 = vmatprep.subr.bf16.mxu0 %v208_v0 }
  0x1a   :  { %190 = vmatpush3.bf16.msra.mxu0 %v205_v7 }
  0x1b   :  { %191 = vmatprep.subr.bf16.mxu0 %v208_v0 }
  0x1e   :  { %192 = vmatpush3.bf16.msra.mxu0 %v206_v8 }
  0x21   :  { %194 = vmatmul.mubr.bf16.vlgmr.msra.gmra.mxu0 %v207_v9 }
  0xe1   :  { %v128_v10 = vpop.f32.mrf.mxu0 }
  0xe2   :  { %v129_v14 = vadd.f32 %v149_v11, %v128_v10 }
  0xe3   :  { %v195_v12 = vpop.f32.mrf.mxu0 }
  0xe5   :  { %v131_v13 = vpop.f32.mrf.mxu0 }
  0xe6   :  { %v132_v15 = vadd.f32 %v149_v11, %v131_v13 }
  0xe7   :  { %v196_v16 = vpop.f32.mrf.mxu0 }
  0xe8   :  { %v166_v17 = vpack.c.bf16 %v132_v15, %v129_v14 }
  0xea   :  { %167 = vst [vmem:[%s266_s3] sm:$0xff] %v166_v17  }

// kernel: _lambda_.32
= control target key start
LH: loop header
LB: loop body
LE: loop exit
PB: predicated region body
PF: predicated region fallthrough
CT: control target
= control target key end

     0   :  { %s1126_s12 = smov 0   ;;  %s1128_s13 = smov 0   ;;  %s1246_s0 = inlined_call_operand.vmem [shape: bf16[2,8,768], index: 0, kind: input, shape index: {}, may-alias: {0,1,2}]   ;;  %s1247_s1 = inlined_call_operand.vmem [shape: bf16[2,8,768], index: 1, kind: input, shape index: {}, may-alias: {0,1,2}]   ;;  %s1248_s2 = inlined_call_operand.vmem [shape: bf16[2,8,768], index: 2, kind: input, shape index: {}, may-alias: {0,1,2}]   ;;  %s1249_s3 = inlined_call_operand.vmem [shape: bf16[2,8,128], index: 3, kind: output, shape index: {}]  }
   0x1   :  { %s1130_s14 = smov 0  }
   0x2 LB: > { %s32_s15 = sadd.s32 1, %s1094_s13  ;;  %p937_p0 = scmp.ge.s32.totalorder %s1098_s14, 1  ;;  %s1098_s14 = sphi %s1130_s14, %s13_s14   ;;  %s1094_s13 = sphi %s1128_s13, %s1251_s13   ;;  %s1090_s12 = sphi %s1126_s12, %s1250_s12  }
   0x3   : > { %p34_p1 = scmp.ge.s32.totalorder %s32_s15, 2  ;;  %p213_p2 = scmp.lt.s32.totalorder %s1098_s14, 3 }
   0x5   : > { %s1253_s15 = smov (%p34_p1, %s32_s15), 0  ;;  %p214_p3 = pnand %p937_p0, %p213_p2 }
   0x6   : > { %p269_p4 = scmp.lt.s32.totalorder (!%p214_p3), %s1090_s12, 1  ;;  %s1103_s25 = smov (!%p214_p3), 96  }
   0x7   : > { %217 = sbr.rel (%p214_p3) target bundleno = 1428 (0x594), region = 32  ;;  %s1104_s26 = smov (!%p214_p3), 64  }
   0x8   : > { %s1105_s27 = smov (!%p214_p3), 32  }
   0xc   : > { %v1100_v0 = vmov 0.0   ;;  %vm1101_vm0 = vmmov 0   ;;  %s1255_s12 = smov (!%p269_p4, %s1090_s12), 1  ;;  %vm325_vm1 = vcmask 261120   ;;  %v314_v4 = vlaneseq }
   0xd   : > { %977 = vmatprep.subr.bf16.mxu0 %v1100_v0  ;;  %979 = vmatprep.mubr.msk.bf16.mxu0 %vm1101_vm0, %v1100_v0  ;;  %s1153_s16 = smul.u32 24, %s1255_s12  ;;  %v1102_v8 = vmov -1e+09   ;;  %vm374_vm3 = vcmask 64512   ;;  %vm390_vm4 = vcmask 1043456   ;;  %vm560_vm5 = vcmask 523520  }
   0xe   : > { %983 = vmatprep.subr.bf16.mxu1 %v1100_v0  ;;  %985 = vmatprep.mubr.msk.bf16.mxu1 %vm1101_vm0, %v1100_v0  ;;  %v315_v5 = vshrl.u32 %v314_v4, 7  ;;  %v319_v6 = vand.u32 127, %v314_v4  ;;  %vm678_vm6 = vcmask 785920   ;;  %vm796_vm7 = vcmask 1048320   ;;  %s941_s5 = sshll.u32 %s1255_s12, 2 }
   0xf   : > { %s958_s17 = sadd.s32 16, %s1153_s16  ;;  %s956_s21 = sadd.s32 12, %s1153_s16 }
  0x10   : > { %s290_s20 = scalar_lea.vmem %s1247_s1, %s958_s17  ;;  %s280_s24 = scalar_lea.vmem %s1246_s0, %s956_s21  ;;  %vm320_vm2 = vcmp.le.s32.totalorder %v319_v6, %v315_v5 }
  0x11   : > { %v323_v1 = vld [vmem:[%s290_s20] sm:$0xf]  ;;  %v1168_v9 = vsel %vm320_vm2, 0.0, %v1102_v8  ;;  %s960_s28 = sadd.s32 20, %s1153_s16  ;;  %s311_s8 = scalar_lea.vmem %s1249_s3, %s941_s5 }
  0x12   : > { %v330_v2 = vsel %vm325_vm1, %v323_v1, 0  ;;  %v322_v3 = vld [vmem:[%s280_s24] sm:$0xf]  ;;  %v945_v16 = vcombine.low %v323_v1, %v323_v1  ;;  %s300_s4 = scalar_lea.vmem %s1248_s2, %s960_s28 }
  0x13   : > { %978 = vmatpush3.bf16.xpose.msra.mxu0 %v330_v2  ;;  %v944_v17 = vcombine.low %v322_v3, %v322_v3  ;;  %v1182_v23 = vld [vmem:[%s300_s4] sm:$0xf] }
  0x14   : > { %995 = vmatprep.subr.bf16.mxu0 %v1100_v0  ;;  %443 = vrot.lane.b32.xlu1 %v945_v16, %s1103_s25  ;;  %v392_v24 = vsel %vm390_vm4, %v1182_v23, 0 }
  0x15   : > { %984 = vmatpush3.bf16.msra.mxu1 %v392_v24 }
  0x16   : > { %989 = vmatprep.subr.bf16.mxu1 %v1100_v0 }
  0x18   : > { %438 = vrot.lane.b32.xlu1 %v944_v17, %s1103_s25 }
  0x1a   : > { %980 = vmatmul.mubr.msk.bf16.vlgmr.msra.gmra.mxu0 %vm325_vm1, %v322_v3 }
  0x1b   : > { %997 = vmatprep.mubr.msk.bf16.mxu0 %vm1101_vm0, %v1100_v0 }
  0x1c   : > { %562 = vrot.lane.b32.xlu1 %v944_v17, %s1104_s26 }
  0x20   : > { %682 = vrot.lane.b32.xlu1 %v945_v16, %s1105_s27 }
  0x24   : > { %680 = vrot.lane.b32.xlu1 %v944_v17, %s1105_s27 }
  0x86   : > { %v444_v27 = vpop.permute.xlu1 %443 }
  0x87   : > { %v449_v29 = vsel %vm325_vm1, %v444_v27, 0 }
  0x8a   : > { %v439_v31 = vpop.permute.xlu1 %438 }
  0x8e   : > { %v563_v33 = vpop.permute.xlu1 %562 }
  0x92   : > { %v683_v35 = vpop.permute.xlu1 %682 }
  0x93   : > { %v688_v36 = vsel %vm325_vm1, %v683_v35, 0 }
  0x96   : > { %v681_v37 = vpop.permute.xlu1 %680 }
  0xda   : > { %v366_v7 = vpop.f32.mrf.mxu0 }
  0xdb   : > { %v372_v10 = vmul.f32 0.17677669, %v366_v7 }
  0xdc   : > { %v981_v11 = vpop.f32.mrf.mxu0 }
  0xdd   : > { %v373_v12 = vadd.f32 %v372_v10, %v1168_v9  ;;  %v947_v10 = vcombine.low %v1182_v23, %v1182_v23 }
  0xde   : > { %v369_v13 = vpop.f32.mrf.mxu0 }
  0xdf   : > { %v375_v14 = vsel %vm374_vm3, %v373_v12, -inf }
  0xe0   : > { %376 = vmax.xlane.f32.xlu0 %v375_v14  ;;  %v982_v15 = vpop.f32.mrf.mxu0 }
 0x169   : > { %v377_v18 = vpop.xlane.xlu0 %376 }
 0x16a   : > { %v378_v19 = vsub.f32 %v373_v12, %v377_v18 }
 0x16c   : > { %v379_v20 = vmul.f32 1.442695, %v378_v19 }
 0x16e   : > { %1060 = vpow2.f32 %v379_v20 }
 0x17b   : > { %v1061_v21 = vpop.eup %1060 }
 0x17c   : > { %v381_v22 = vsel %vm374_vm3, %v1061_v21, 0.0 }
 0x17d   : > { %382 = vadd.xlane.f32.xlu0 %v381_v22 }
 0x193   : > { %564 = vrot.lane.b32.xlu0 %v945_v16, %s1104_s26 }
 0x206   : > { %v383_v25 = vpop.xlane.xlu0 %382 }
 0x207   : > { %1062 = vrcp.f32 %v383_v25 }
 0x20a   : > { %v565_v32 = vpop.permute.xlu0 %564 }
 0x20b   : > { %v570_v34 = vsel %vm325_vm1, %v565_v32, 0 }
 0x214   : > { %v1063_v26 = vpop.eup %1062 }
 0x215   : > { %v385_v28 = vmul.f32 %v1063_v26, %v1061_v21 }
 0x217   : > { %v386_v30 = vpack.c.bf16 %v385_v28, %v385_v28 }
 0x219   : > { %986 = vmatmul.mubr.msk.bf16.vlgmr.msra.gmra.mxu1 %vm374_vm3, %v386_v30 }
 0x21a   : > { %990 = vmatpush3.bf16.xpose.msra.mxu1 %v449_v29  ;;  %991 = vmatprep.mubr.msk.bf16.mxu1 %vm1101_vm0, %v1100_v0 }
 0x21b   : > { %1001 = vmatprep.subr.bf16.mxu1 %v1100_v0 }
 0x221   : > { %992 = vmatmul.mubr.msk.bf16.vlgmr.msra.gmra.mxu1 %vm325_vm1, %v439_v31 }
 0x222   : > { %1002 = vmatpush3.bf16.xpose.msra.mxu1 %v570_v34  ;;  %1003 = vmatprep.mubr.msk.bf16.mxu1 %vm1101_vm0, %v1100_v0 }
 0x223   : > { %1013 = vmatprep.subr.bf16.mxu1 %v1100_v0 }
 0x229   : > { %1004 = vmatmul.mubr.msk.bf16.vlgmr.msra.gmra.mxu1 %vm325_vm1, %v563_v33 }
 0x22a   : > { %1014 = vmatpush3.bf16.xpose.msra.mxu1 %v688_v36  ;;  %1015 = vmatprep.mubr.msk.bf16.mxu1 %vm1101_vm0, %v1100_v0 }
 0x231   : > { %1016 = vmatmul.mubr.msk.bf16.vlgmr.msra.gmra.mxu1 %vm325_vm1, %v681_v37 }
 0x2d9   : > { %v428_v38 = vpop.f32.mrf.mxu1 }
 0x2da   : > { %434 = vst.msk [vmem:[#allocation2] sm:$0xff] %vm325_vm1, %v428_v38 }
 0x2db   : > { %v987_v39 = vpop.f32.mrf.mxu1 }
 0x2dd   : > { %v431_v40 = vpop.f32.mrf.mxu1 }
 0x2df   : > { %v988_v41 = vpop.f32.mrf.mxu1 }
 0x2e1   : > { %v485_v42 = vpop.f32.mrf.mxu1 }
 0x2e2   : > { %v491_v43 = vmul.f32 0.17677669, %v485_v42 }
 0x2e3   : > { %v993_v44 = vpop.f32.mrf.mxu1 }
 0x2e4   : > { %v492_v45 = vadd.f32 %v491_v43, %v1168_v9 }
 0x2e5   : > { %v488_v46 = vpop.f32.mrf.mxu1 }
 0x2e6   : > { %v493_v47 = vsel %vm374_vm3, %v492_v45, -inf }
 0x2e7   : > { %494 = vmax.xlane.f32.xlu1 %v493_v47  ;;  %v994_v48 = vpop.f32.mrf.mxu1 }
 0x2e9   : > { %v606_v49 = vpop.f32.mrf.mxu1 }
 0x2ea   : > { %v612_v50 = vmul.f32 0.17677669, %v606_v49 }
 0x2eb   : > { %v1005_v51 = vpop.f32.mrf.mxu1 }
 0x2ec   : > { %v613_v52 = vadd.f32 %v612_v50, %v1168_v9 }
 0x2ed   : > { %v609_v53 = vpop.f32.mrf.mxu1 }
 0x2ee   : > { %v614_v54 = vsel %vm374_vm3, %v613_v52, -inf }
 0x2ef   : > { %615 = vmax.xlane.f32.xlu0 %v614_v54  ;;  %v1006_v55 = vpop.f32.mrf.mxu1 }
 0x2f1   : > { %v724_v56 = vpop.f32.mrf.mxu1 }
 0x2f2   : > { %v730_v57 = vmul.f32 0.17677669, %v724_v56 }
 0x2f3   : > { %v1017_v58 = vpop.f32.mrf.mxu1 }
 0x2f4   : > { %v731_v59 = vadd.f32 %v730_v57, %v1168_v9 }
 0x2f5   : > { %v727_v60 = vpop.f32.mrf.mxu1 }
 0x2f6   : > { %v732_v61 = vsel %vm374_vm3, %v731_v59, -inf }
 0x2f7   : > { %733 = vmax.xlane.f32.xlu1 %v732_v61  ;;  %v1018_v62 = vpop.f32.mrf.mxu1 }
 0x370   : > { %v495_v63 = vpop.xlane.xlu1 %494 }
 0x371   : > { %v496_v1 = vsub.f32 %v492_v45, %v495_v63 }
 0x373   : > { %v497_v2 = vmul.f32 1.442695, %v496_v1 }
 0x375   : > { %1064 = vpow2.f32 %v497_v2 }
 0x378   : > { %v616_v3 = vpop.xlane.xlu0 %615 }
 0x379   : > { %v617_v4 = vsub.f32 %v613_v52, %v616_v3 }
 0x37b   : > { %v618_v5 = vmul.f32 1.442695, %v617_v4 }
 0x37d   : > { %1066 = vpow2.f32 %v618_v5 }
 0x380   : > { %v734_v11 = vpop.xlane.xlu1 %733 }
 0x381   : > { %v735_v12 = vsub.f32 %v731_v59, %v734_v11 }
 0x382   : > { %v1065_v6 = vpop.eup %1064 }
 0x383   : > { %v499_v7 = vsel %vm374_vm3, %v1065_v6, 0.0  ;;  %v736_v13 = vmul.f32 1.442695, %v735_v12 }
 0x384   : > { %500 = vadd.xlane.f32.xlu1 %v499_v7 }
 0x385   : > { %1068 = vpow2.f32 %v736_v13 }
 0x38a   : > { %v1067_v8 = vpop.eup %1066 }
 0x38b   : > { %v620_v9 = vsel %vm374_vm3, %v1067_v8, 0.0 }
 0x38c   : > { %621 = vadd.xlane.f32.xlu0 %v620_v9 }
 0x392   : > { %v1069_v14 = vpop.eup %1068 }
 0x393   : > { %v738_v15 = vsel %vm374_vm3, %v1069_v14, 0.0 }
 0x395   : > { %626 = vrot.lane.b32.xlu1 %v947_v10, %s1104_s26 }
 0x3a2   : > { %508 = vrot.lane.b32.xlu0 %v947_v10, %s1103_s25 }
 0x3b9   : > { %739 = vadd.xlane.f32.xlu1 %v738_v15 }
 0x3ca   : > { %744 = vrot.lane.b32.xlu1 %v947_v10, %s1105_s27 }
 0x40d   : > { %v501_v16 = vpop.xlane.xlu1 %500 }
 0x40e   : > { %1070 = vrcp.f32 %v501_v16 }
 0x411   : > { %v627_v22 = vpop.permute.xlu1 %626 }
 0x412   : > { %v632_v24 = vsel %vm390_vm4, %v627_v22, 0 }
 0x415   : > { %v622_v17 = vpop.xlane.xlu0 %621 }
 0x416   : > { %1072 = vrcp.f32 %v622_v17 }
 0x419   : > { %v509_v18 = vpop.permute.xlu0 %508 }
 0x41a   : > { %v514_v19 = vsel %vm390_vm4, %v509_v18, 0 }
 0x41b   : > { %v1071_v20 = vpop.eup %1070  ;;  %996 = vmatpush3.bf16.msra.mxu0 %v514_v19 }
 0x41c   : > { %1007 = vmatprep.subr.bf16.mxu0 %v1100_v0  ;;  %v503_v21 = vmul.f32 %v1071_v20, %v1065_v6 }
 0x41e   : > { %v504_v23 = vpack.c.bf16 %v503_v21, %v503_v21 }
 0x420   : > { %998 = vmatmul.mubr.msk.bf16.vlgmr.msra.gmra.mxu0 %vm374_vm3, %v504_v23 }
 0x421   : > { %1008 = vmatpush3.bf16.msra.mxu0 %v632_v24  ;;  %1009 = vmatprep.mubr.msk.bf16.mxu0 %vm1101_vm0, %v1100_v0 }
 0x422   : > { %1019 = vmatprep.subr.bf16.mxu0 %v1100_v0 }
 0x423   : > { %v1073_v25 = vpop.eup %1072 }
 0x424   : > { %v624_v26 = vmul.f32 %v1073_v25, %v1067_v8 }
 0x426   : > { %v625_v27 = vpack.c.bf16 %v624_v26, %v624_v26 }
 0x428   : > { %1010 = vmatmul.mubr.msk.bf16.vlgmr.msra.gmra.mxu0 %vm374_vm3, %v625_v27 }
 0x429   : > { %1021 = vmatprep.mubr.msk.bf16.mxu0 %vm1101_vm0, %v1100_v0 }
 0x442   : > { %v740_v28 = vpop.xlane.xlu1 %739 }
 0x443   : > { %1074 = vrcp.f32 %v740_v28 }
 0x446   : > { %v745_v29 = vpop.permute.xlu1 %744 }
 0x447   : > { %v750_v30 = vsel %vm390_vm4, %v745_v29, 0 }
 0x448   : > { %1020 = vmatpush3.bf16.msra.mxu0 %v750_v30 }
 0x450   : > { %v1075_v31 = vpop.eup %1074 }
 0x451   : > { %v742_v32 = vmul.f32 %v1075_v31, %v1069_v14 }
 0x453   : > { %v743_v33 = vpack.c.bf16 %v742_v32, %v742_v32 }
 0x455   : > { %1022 = vmatmul.mubr.msk.bf16.vlgmr.msra.gmra.mxu0 %vm374_vm3, %v743_v33 }
 0x4e0   : > { %v550_v34 = vpop.f32.mrf.mxu0 }
 0x4e1   : > { %557 = vrot.lane.b32.xlu0 %v550_v34, %s1105_s27 }
 0x4e2   : > { %v999_v35 = vpop.f32.mrf.mxu0 }
 0x4e4   : > { %v553_v36 = vpop.f32.mrf.mxu0 }
 0x4e6   : > { %v1000_v37 = vpop.f32.mrf.mxu0 }
 0x4e8   : > { %v668_v38 = vpop.f32.mrf.mxu0 }
 0x4e9   : > { %675 = vrot.lane.b32.xlu1 %v668_v38, %s1104_s26 }
 0x4ea   : > { %v1011_v0 = vpop.f32.mrf.mxu0 }
 0x4ec   : > { %v671_v39 = vpop.f32.mrf.mxu0 }
 0x4ee   : > { %v1012_v40 = vpop.f32.mrf.mxu0 }
 0x515   : > { %v786_v41 = vpop.f32.mrf.mxu0 }
 0x516   : > { %793 = vrot.lane.b32.xlu0 %v786_v41, %s1103_s25 }
 0x517   : > { %v1023_v42 = vpop.f32.mrf.mxu0 }
 0x519   : > { %v789_v43 = vpop.f32.mrf.mxu0 }
 0x51b   : > { %v1024_v44 = vpop.f32.mrf.mxu0 }
 0x553   : > { %v558_v45 = vpop.permute.xlu0 %557 }
 0x554   : > { %561 = vst.msk [vmem:[#allocation2] sm:$0xff] %vm560_vm5, %v558_v45 }
 0x55b   : > { %v676_v46 = vpop.permute.xlu1 %675 }
 0x55c   : > { %679 = vst.msk [vmem:[#allocation2] sm:$0xff] %vm678_vm6, %v676_v46 }
 0x588   : > { %v794_v47 = vpop.permute.xlu0 %793 }
 0x589   : > { %797 = vst.msk [vmem:[#allocation2] sm:$0xff] %vm796_vm7, %v794_v47 }
 0x590   : > { %v798_v48 = vld [vmem:[#allocation2] sm:$0xff] }
 0x591   : > { %v799_v49 = vpack.c.bf16 %v798_v48, %v798_v48 }
 0x593   : > { %800 = vst [vmem:[%s311_s8] sm:$0xf] %v799_v49 }
 0x594 PF: > { %s13_s14 = sadd.s32 1, %s1098_s14   ;;  %s1250_s12 = smov %s1094_s13 }
 0x595   : > { %p10_p5 = scmp.ge.s32.totalorder %s13_s14, 4   ;;  %s1251_s13 = smov %s1253_s15 }
 0x597   :  { %12 = sbr.rel (!%p10_p5) target bundleno = 2 (0x2), region = 68 }

// kernel: _lambda_.30
= control target key start
LH: loop header
LB: loop body
LE: loop exit
PB: predicated region body
PF: predicated region fallthrough
CT: control target
= control target key end

     0   :  { %s1091_s12 = smov 0   ;;  %s1093_s13 = smov 0   ;;  %s1211_s0 = inlined_call_operand.vmem [shape: bf16[2,8,128], index: 0, kind: input, shape index: {}]   ;;  %s1212_s1 = inlined_call_operand.vmem [shape: bf16[2,4,512], index: 1, kind: input, shape index: {}, may-alias: {1,2}]   ;;  %s1213_s2 = inlined_call_operand.vmem [shape: bf16[2,4,512], index: 2, kind: input, shape index: {}, may-alias: {1,2}]   ;;  %s1214_s3 = inlined_call_operand.vmem [shape: bf16[2,8,128], index: 3, kind: output, shape index: {}]  }
   0x1   :  { %s1095_s14 = smov 0  }
   0x2 LB: > { %s32_s15 = sadd.s32 1, %s1059_s13  ;;  %p908_p0 = scmp.ge.s32.totalorder %s1063_s14, 1  ;;  %s1063_s14 = sphi %s1095_s14, %s13_s14   ;;  %s1059_s13 = sphi %s1093_s13, %s1216_s13   ;;  %s1055_s12 = sphi %s1091_s12, %s1215_s12  }
   0x3   : > { %p34_p1 = scmp.ge.s32.totalorder %s32_s15, 2  ;;  %p203_p2 = scmp.lt.s32.totalorder %s1063_s14, 3 }
   0x5   : > { %s1218_s15 = smov (%p34_p1, %s32_s15), 0  ;;  %p204_p3 = pnand %p908_p0, %p203_p2 }
   0x6   : > { %p254_p4 = scmp.lt.s32.totalorder (!%p204_p3), %s1055_s12, 1  ;;  %s1068_s24 = smov (!%p204_p3), 96  }
   0x7   : > { %207 = sbr.rel (%p204_p3) target bundleno = 1422 (0x58e), region = 32  ;;  %s1069_s25 = smov (!%p204_p3), 64  }
   0x8   : > { %s1070_s26 = smov (!%p204_p3), 32  }
   0xc   : > { %v1065_v0 = vmov 0.0   ;;  %s1220_s12 = smov (!%p254_p4, %s1055_s12), 1  ;;  %vm1066_vm0 = vmmov 0   ;;  %vm296_vm1 = vcmask 261120   ;;  %vm344_vm2 = vcmask 31744  }
   0xd   : > { %946 = vmatprep.subr.bf16.mxu0 %v1065_v0  ;;  %952 = vmatprep.subr.bf16.mxu1 %v1065_v0  ;;  %s926_s16 = sshll.u32 %s1220_s12, 3  ;;  %s909_s20 = sshll.u32 %s1220_s12, 2  ;;  %v1067_v10 = vmov 1983009808   ;;  %v414_v12 = vlaneseq  ;;  %vm360_vm3 = vcmask 1041408   ;;  %vm539_vm4 = vcmask 523520  }
   0xe   : > { %948 = vmatprep.mubr.msk.bf16.mxu0 %vm1066_vm0, %v1065_v0  ;;  %954 = vmatprep.mubr.msk.bf16.mxu1 %vm1066_vm0, %v1065_v0  ;;  %s271_s19 = scalar_lea.vmem %s1212_s1, %s926_s16  ;;  %s263_s23 = scalar_lea.vmem %s1211_s0, %s909_s20  ;;  %v412_v11 = vunpack.c.l.s4 %v1067_v10  ;;  %vm656_vm5 = vcmask 785920   ;;  %vm773_vm6 = vcmask 1048320  }
   0xf   : > { %v294_v1 = vld [vmem:[%s271_s19] sm:$0x3]  ;;  %v415_v14 = vshrl.u32 %v414_v12, 7  ;;  %s928_s27 = sadd.s32 2, %s926_s16  ;;  %s291_s6 = scalar_lea.vmem %s1214_s3, %s909_s20 }
  0x10   : > { %v301_v2 = vsel %vm296_vm1, %v294_v1, 0  ;;  %v293_v3 = vld [vmem:[%s263_s23] sm:$0xf]  ;;  %v413_v13 = vunpack.c.0.s8 %v412_v11  ;;  %s280_s30 = scalar_lea.vmem %s1213_s2, %s928_s27 }
  0x11   : > { %947 = vmatpush3.bf16.xpose.msra.mxu0 %v301_v2  ;;  %v917_v17 = vcombine.low %v293_v3, %v293_v3  ;;  %v1149_v23 = vld [vmem:[%s280_s30] sm:$0x3] }
  0x12   : > { %964 = vmatprep.subr.bf16.mxu0 %v1065_v0  ;;  %v1135_v15 = vsub.s32 %v413_v13, %v415_v14  ;;  %v362_v24 = vsel %vm360_vm3, %v1149_v23, 0 }
  0x13   : > { %953 = vmatpush3.bf16.msra.mxu1 %v362_v24 }
  0x14   : > { %v417_v16 = vrot.slane %v294_v1, %v1135_v15  ;;  %958 = vmatprep.subr.bf16.mxu1 %v1065_v0 }
  0x16   : > { %418 = vrot.lane.b32.xlu1 %v417_v16, %s1068_s24 }
  0x18   : > { %949 = vmatmul.mubr.msk.bf16.vlgmr.msra.gmra.mxu0 %vm296_vm1, %v293_v3 }
  0x19   : > { %966 = vmatprep.mubr.msk.bf16.mxu0 %vm1066_vm0, %v1065_v0 }
  0x1a   : > { %408 = vrot.lane.b32.xlu1 %v917_v17, %s1068_s24 }
  0x1e   : > { %541 = vrot.lane.b32.xlu1 %v917_v17, %s1069_s25 }
  0x22   : > { %660 = vrot.lane.b32.xlu1 %v417_v16, %s1070_s26 }
  0x26   : > { %658 = vrot.lane.b32.xlu1 %v917_v17, %s1070_s26 }
  0x88   : > { %v419_v27 = vpop.permute.xlu1 %418 }
  0x89   : > { %v424_v29 = vsel %vm296_vm1, %v419_v27, 0 }
  0x8c   : > { %v409_v31 = vpop.permute.xlu1 %408 }
  0x90   : > { %v542_v33 = vpop.permute.xlu1 %541 }
  0x94   : > { %v661_v35 = vpop.permute.xlu1 %660 }
  0x95   : > { %v666_v36 = vsel %vm296_vm1, %v661_v35, 0 }
  0x98   : > { %v659_v37 = vpop.permute.xlu1 %658 }
  0xd8   : > { %v337_v4 = vpop.f32.mrf.mxu0 }
  0xd9   : > { %v343_v5 = vmul.f32 0.17677669, %v337_v4 }
  0xda   : > { %v950_v6 = vpop.f32.mrf.mxu0 }
  0xdb   : > { %v345_v7 = vsel %vm344_vm2, %v343_v5, -inf }
  0xdc   : > { %346 = vmax.xlane.f32.xlu0 %v345_v7  ;;  %v340_v8 = vpop.f32.mrf.mxu0  ;;  %v486_v7 = vrot.slane %v1149_v23, %v1135_v15 }
  0xde   : > { %v951_v9 = vpop.f32.mrf.mxu0 }
 0x165   : > { %v347_v18 = vpop.xlane.xlu0 %346 }
 0x166   : > { %v348_v19 = vsub.f32 %v343_v5, %v347_v18 }
 0x168   : > { %v349_v20 = vmul.f32 1.442695, %v348_v19 }
 0x16a   : > { %1025 = vpow2.f32 %v349_v20 }
 0x177   : > { %v1026_v21 = vpop.eup %1025 }
 0x178   : > { %v351_v22 = vsel %vm344_vm2, %v1026_v21, 0.0 }
 0x179   : > { %352 = vadd.xlane.f32.xlu0 %v351_v22 }
 0x18f   : > { %543 = vrot.lane.b32.xlu0 %v417_v16, %s1069_s25 }
 0x202   : > { %v353_v25 = vpop.xlane.xlu0 %352 }
 0x203   : > { %1027 = vrcp.f32 %v353_v25 }
 0x206   : > { %v544_v32 = vpop.permute.xlu0 %543 }
 0x207   : > { %v549_v34 = vsel %vm296_vm1, %v544_v32, 0 }
 0x210   : > { %v1028_v26 = vpop.eup %1027 }
 0x211   : > { %v355_v28 = vmul.f32 %v1028_v26, %v1026_v21 }
 0x213   : > { %v356_v30 = vpack.c.bf16 %v355_v28, %v355_v28 }
 0x215   : > { %955 = vmatmul.mubr.msk.bf16.vlgmr.msra.gmra.mxu1 %vm344_vm2, %v356_v30 }
 0x216   : > { %959 = vmatpush3.bf16.xpose.msra.mxu1 %v424_v29  ;;  %960 = vmatprep.mubr.msk.bf16.mxu1 %vm1066_vm0, %v1065_v0 }
 0x217   : > { %970 = vmatprep.subr.bf16.mxu1 %v1065_v0 }
 0x21d   : > { %961 = vmatmul.mubr.msk.bf16.vlgmr.msra.gmra.mxu1 %vm296_vm1, %v409_v31 }
 0x21e   : > { %971 = vmatpush3.bf16.xpose.msra.mxu1 %v549_v34  ;;  %972 = vmatprep.mubr.msk.bf16.mxu1 %vm1066_vm0, %v1065_v0 }
 0x21f   : > { %982 = vmatprep.subr.bf16.mxu1 %v1065_v0 }
 0x225   : > { %973 = vmatmul.mubr.msk.bf16.vlgmr.msra.gmra.mxu1 %vm296_vm1, %v542_v33 }
 0x226   : > { %983 = vmatpush3.bf16.xpose.msra.mxu1 %v666_v36  ;;  %984 = vmatprep.mubr.msk.bf16.mxu1 %vm1066_vm0, %v1065_v0 }
 0x22d   : > { %985 = vmatmul.mubr.msk.bf16.vlgmr.msra.gmra.mxu1 %vm296_vm1, %v659_v37 }
 0x2d5   : > { %v398_v38 = vpop.f32.mrf.mxu1 }
 0x2d6   : > { %404 = vst.msk [vmem:[#allocation2] sm:$0xff] %vm296_vm1, %v398_v38 }
 0x2d7   : > { %v956_v39 = vpop.f32.mrf.mxu1 }
 0x2d9   : > { %v401_v40 = vpop.f32.mrf.mxu1 }
 0x2db   : > { %v957_v41 = vpop.f32.mrf.mxu1 }
 0x2dd   : > { %v460_v42 = vpop.f32.mrf.mxu1 }
 0x2de   : > { %v466_v43 = vmul.f32 0.17677669, %v460_v42 }
 0x2df   : > { %v962_v44 = vpop.f32.mrf.mxu1 }
 0x2e0   : > { %v467_v45 = vsel %vm344_vm2, %v466_v43, -inf }
 0x2e1   : > { %468 = vmax.xlane.f32.xlu1 %v467_v45  ;;  %v463_v46 = vpop.f32.mrf.mxu1 }
 0x2e3   : > { %v963_v47 = vpop.f32.mrf.mxu1 }
 0x2e5   : > { %v585_v48 = vpop.f32.mrf.mxu1 }
 0x2e6   : > { %v591_v49 = vmul.f32 0.17677669, %v585_v48 }
 0x2e7   : > { %v974_v50 = vpop.f32.mrf.mxu1 }
 0x2e8   : > { %v592_v51 = vsel %vm344_vm2, %v591_v49, -inf }
 0x2e9   : > { %593 = vmax.xlane.f32.xlu0 %v592_v51  ;;  %v588_v52 = vpop.f32.mrf.mxu1 }
 0x2eb   : > { %v975_v53 = vpop.f32.mrf.mxu1 }
 0x2ed   : > { %v702_v54 = vpop.f32.mrf.mxu1 }
 0x2ee   : > { %v708_v55 = vmul.f32 0.17677669, %v702_v54 }
 0x2ef   : > { %v986_v56 = vpop.f32.mrf.mxu1 }
 0x2f0   : > { %v709_v57 = vsel %vm344_vm2, %v708_v55, -inf }
 0x2f1   : > { %710 = vmax.xlane.f32.xlu1 %v709_v57  ;;  %v705_v58 = vpop.f32.mrf.mxu1 }
 0x2f3   : > { %v987_v59 = vpop.f32.mrf.mxu1 }
 0x36a   : > { %v469_v60 = vpop.xlane.xlu1 %468 }
 0x36b   : > { %v470_v61 = vsub.f32 %v466_v43, %v469_v60 }
 0x36d   : > { %v471_v62 = vmul.f32 1.442695, %v470_v61 }
 0x36f   : > { %1029 = vpow2.f32 %v471_v62 }
 0x372   : > { %v594_v63 = vpop.xlane.xlu0 %593 }
 0x373   : > { %v595_v1 = vsub.f32 %v591_v49, %v594_v63 }
 0x375   : > { %v596_v2 = vmul.f32 1.442695, %v595_v1 }
 0x377   : > { %1031 = vpow2.f32 %v596_v2 }
 0x37a   : > { %v711_v8 = vpop.xlane.xlu1 %710 }
 0x37b   : > { %v712_v9 = vsub.f32 %v708_v55, %v711_v8 }
 0x37c   : > { %v1030_v3 = vpop.eup %1029 }
 0x37d   : > { %v473_v4 = vsel %vm344_vm2, %v1030_v3, 0.0  ;;  %v713_v10 = vmul.f32 1.442695, %v712_v9 }
 0x37e   : > { %474 = vadd.xlane.f32.xlu1 %v473_v4 }
 0x37f   : > { %1033 = vpow2.f32 %v713_v10 }
 0x384   : > { %v1032_v5 = vpop.eup %1031 }
 0x385   : > { %v598_v6 = vsel %vm344_vm2, %v1032_v5, 0.0 }
 0x386   : > { %599 = vadd.xlane.f32.xlu0 %v598_v6 }
 0x38c   : > { %v1034_v11 = vpop.eup %1033 }
 0x38d   : > { %v715_v12 = vsel %vm344_vm2, %v1034_v11, 0.0 }
 0x38f   : > { %604 = vrot.lane.b32.xlu1 %v486_v7, %s1069_s25 }
 0x39c   : > { %487 = vrot.lane.b32.xlu0 %v486_v7, %s1068_s24 }
 0x3b3   : > { %716 = vadd.xlane.f32.xlu1 %v715_v12 }
 0x3c4   : > { %721 = vrot.lane.b32.xlu1 %v486_v7, %s1070_s26 }
 0x407   : > { %v475_v13 = vpop.xlane.xlu1 %474 }
 0x408   : > { %1035 = vrcp.f32 %v475_v13 }
 0x40b   : > { %v605_v19 = vpop.permute.xlu1 %604 }
 0x40c   : > { %v610_v21 = vsel %vm360_vm3, %v605_v19, 0 }
 0x40f   : > { %v600_v14 = vpop.xlane.xlu0 %599 }
 0x410   : > { %1037 = vrcp.f32 %v600_v14 }
 0x413   : > { %v488_v16 = vpop.permute.xlu0 %487 }
 0x414   : > { %v493_v15 = vsel %vm360_vm3, %v488_v16, 0 }
 0x415   : > { %v1036_v17 = vpop.eup %1035  ;;  %965 = vmatpush3.bf16.msra.mxu0 %v493_v15 }
 0x416   : > { %976 = vmatprep.subr.bf16.mxu0 %v1065_v0  ;;  %v477_v18 = vmul.f32 %v1036_v17, %v1030_v3 }
 0x418   : > { %v478_v20 = vpack.c.bf16 %v477_v18, %v477_v18 }
 0x41a   : > { %967 = vmatmul.mubr.msk.bf16.vlgmr.msra.gmra.mxu0 %vm344_vm2, %v478_v20 }
 0x41b   : > { %977 = vmatpush3.bf16.msra.mxu0 %v610_v21  ;;  %978 = vmatprep.mubr.msk.bf16.mxu0 %vm1066_vm0, %v1065_v0 }
 0x41c   : > { %988 = vmatprep.subr.bf16.mxu0 %v1065_v0 }
 0x41d   : > { %v1038_v22 = vpop.eup %1037 }
 0x41e   : > { %v602_v23 = vmul.f32 %v1038_v22, %v1032_v5 }
 0x420   : > { %v603_v24 = vpack.c.bf16 %v602_v23, %v602_v23 }
 0x422   : > { %979 = vmatmul.mubr.msk.bf16.vlgmr.msra.gmra.mxu0 %vm344_vm2, %v603_v24 }
 0x423   : > { %990 = vmatprep.mubr.msk.bf16.mxu0 %vm1066_vm0, %v1065_v0 }
 0x43c   : > { %v717_v25 = vpop.xlane.xlu1 %716 }
 0x43d   : > { %1039 = vrcp.f32 %v717_v25 }
 0x440   : > { %v722_v26 = vpop.permute.xlu1 %721 }
 0x441   : > { %v727_v27 = vsel %vm360_vm3, %v722_v26, 0 }
 0x442   : > { %989 = vmatpush3.bf16.msra.mxu0 %v727_v27 }
 0x44a   : > { %v1040_v28 = vpop.eup %1039 }
 0x44b   : > { %v719_v29 = vmul.f32 %v1040_v28, %v1034_v11 }
 0x44d   : > { %v720_v30 = vpack.c.bf16 %v719_v29, %v719_v29 }
 0x44f   : > { %991 = vmatmul.mubr.msk.bf16.vlgmr.msra.gmra.mxu0 %vm344_vm2, %v720_v30 }
 0x4da   : > { %v529_v31 = vpop.f32.mrf.mxu0 }
 0x4db   : > { %536 = vrot.lane.b32.xlu0 %v529_v31, %s1070_s26 }
 0x4dc   : > { %v968_v32 = vpop.f32.mrf.mxu0 }
 0x4de   : > { %v532_v33 = vpop.f32.mrf.mxu0 }
 0x4e0   : > { %v969_v34 = vpop.f32.mrf.mxu0 }
 0x4e2   : > { %v646_v35 = vpop.f32.mrf.mxu0 }
 0x4e3   : > { %653 = vrot.lane.b32.xlu1 %v646_v35, %s1069_s25 }
 0x4e4   : > { %v980_v0 = vpop.f32.mrf.mxu0 }
 0x4e6   : > { %v649_v36 = vpop.f32.mrf.mxu0 }
 0x4e8   : > { %v981_v37 = vpop.f32.mrf.mxu0 }
 0x50f   : > { %v763_v38 = vpop.f32.mrf.mxu0 }
 0x510   : > { %770 = vrot.lane.b32.xlu0 %v763_v38, %s1068_s24 }
 0x511   : > { %v992_v39 = vpop.f32.mrf.mxu0 }
 0x513   : > { %v766_v40 = vpop.f32.mrf.mxu0 }
 0x515   : > { %v993_v41 = vpop.f32.mrf.mxu0 }
 0x54d   : > { %v537_v42 = vpop.permute.xlu0 %536 }
 0x54e   : > { %540 = vst.msk [vmem:[#allocation2] sm:$0xff] %vm539_vm4, %v537_v42 }
 0x555   : > { %v654_v43 = vpop.permute.xlu1 %653 }
 0x556   : > { %657 = vst.msk [vmem:[#allocation2] sm:$0xff] %vm656_vm5, %v654_v43 }
 0x582   : > { %v771_v44 = vpop.permute.xlu0 %770 }
 0x583   : > { %774 = vst.msk [vmem:[#allocation2] sm:$0xff] %vm773_vm6, %v771_v44 }
 0x58a   : > { %v775_v45 = vld [vmem:[#allocation2] sm:$0xff] }
 0x58b   : > { %v776_v46 = vpack.c.bf16 %v775_v45, %v775_v45 }
 0x58d   : > { %777 = vst [vmem:[%s291_s6] sm:$0xf] %v776_v46 }
 0x58e PF: > { %s13_s14 = sadd.s32 1, %s1063_s14   ;;  %s1215_s12 = smov %s1059_s13 }
 0x58f   : > { %p10_p5 = scmp.ge.s32.totalorder %s13_s14, 4   ;;  %s1216_s13 = smov %s1218_s15 }
 0x591   :  { %12 = sbr.rel (!%p10_p5) target bundleno = 2 (0x2), region = 68 }

// kernel: _lambda_.35
= control target key start
LH: loop header
LB: loop body
LE: loop exit
PB: predicated region body
PF: predicated region fallthrough
CT: control target
= control target key end

     0   :  { %s1100_s12 = smov 0   ;;  %s1102_s13 = smov 0   ;;  %s1220_s0 = inlined_call_operand.vmem [shape: bf16[2,8,128], index: 0, kind: input, shape index: {}]   ;;  %s1221_s1 = inlined_call_operand.vmem [shape: bf16[2,4,512], index: 1, kind: input, shape index: {}, may-alias: {1,2}]   ;;  %s1222_s2 = inlined_call_operand.vmem [shape: bf16[2,4,512], index: 2, kind: input, shape index: {}, may-alias: {1,2}]   ;;  %s1223_s3 = inlined_call_operand.vmem [shape: bf16[2,8,128], index: 3, kind: output, shape index: {}]  }
   0x1   :  { %s1104_s14 = smov 0  }
   0x2 LB: > { %s32_s15 = sadd.s32 1, %s1068_s13  ;;  %p915_p0 = scmp.ge.s32.totalorder %s1072_s14, 1  ;;  %s1072_s14 = sphi %s1104_s14, %s13_s14   ;;  %s1068_s13 = sphi %s1102_s13, %s1225_s13   ;;  %s1064_s12 = sphi %s1100_s12, %s1224_s12  }
   0x3   : > { %p34_p1 = scmp.ge.s32.totalorder %s32_s15, 2  ;;  %p207_p2 = scmp.lt.s32.totalorder %s1072_s14, 3 }
   0x5   : > { %s1227_s15 = smov (%p34_p1, %s32_s15), 0  ;;  %p208_p3 = pnand %p915_p0, %p207_p2 }
   0x6   : > { %p259_p4 = scmp.lt.s32.totalorder (!%p208_p3), %s1064_s12, 1  ;;  %s1077_s25 = smov (!%p208_p3), 96  }
   0x7   : > { %211 = sbr.rel (%p208_p3) target bundleno = 1423 (0x58f), region = 32  ;;  %s1078_s26 = smov (!%p208_p3), 64  }
   0x8   : > { %s1079_s27 = smov (!%p208_p3), 32  }
   0xc   : > { %v1074_v0 = vmov 0.0   ;;  %s1229_s12 = smov (!%p259_p4, %s1064_s12), 1  ;;  %vm1075_vm0 = vmmov 0   ;;  %vm303_vm1 = vcmask 261120   ;;  %vm351_vm2 = vcmask 31744  }
   0xd   : > { %955 = vmatprep.subr.bf16.mxu0 %v1074_v0  ;;  %961 = vmatprep.subr.bf16.mxu1 %v1074_v0  ;;  %s937_s16 = sshll.u32 %s1229_s12, 3  ;;  %s916_s21 = sshll.u32 %s1229_s12, 2  ;;  %v1076_v10 = vmov 1983009808   ;;  %v421_v12 = vlaneseq  ;;  %vm367_vm3 = vcmask 1041408   ;;  %vm546_vm4 = vcmask 523520  }
   0xe   : > { %957 = vmatprep.mubr.msk.bf16.mxu0 %vm1075_vm0, %v1074_v0  ;;  %963 = vmatprep.mubr.msk.bf16.mxu1 %vm1075_vm0, %v1074_v0  ;;  %s934_s17 = sadd.s32 4, %s937_s16  ;;  %s268_s24 = scalar_lea.vmem %s1220_s0, %s916_s21  ;;  %v419_v11 = vunpack.c.l.s4 %v1076_v10  ;;  %vm663_vm5 = vcmask 785920   ;;  %vm780_vm6 = vcmask 1048320  }
   0xf   : > { %s277_s20 = scalar_lea.vmem %s1221_s1, %s934_s17  ;;  %v300_v3 = vld [vmem:[%s268_s24] sm:$0xf]  ;;  %v422_v14 = vshrl.u32 %v421_v12, 7  ;;  %s936_s28 = sadd.s32 6, %s937_s16 }
  0x10   : > { %v301_v1 = vld [vmem:[%s277_s20] sm:$0x3]  ;;  %v420_v13 = vunpack.c.0.s8 %v419_v11  ;;  %v924_v17 = vcombine.low %v300_v3, %v300_v3  ;;  %s287_s4 = scalar_lea.vmem %s1222_s2, %s936_s28  ;;  %s298_s7 = scalar_lea.vmem %s1223_s3, %s916_s21 }
  0x11   : > { %v308_v2 = vsel %vm303_vm1, %v301_v1, 0  ;;  %v1158_v23 = vld [vmem:[%s287_s4] sm:$0x3] }
  0x12   : > { %956 = vmatpush3.bf16.xpose.msra.mxu0 %v308_v2  ;;  %v1144_v15 = vsub.s32 %v420_v13, %v422_v14  ;;  %v369_v24 = vsel %vm367_vm3, %v1158_v23, 0 }
  0x13   : > { %973 = vmatprep.subr.bf16.mxu0 %v1074_v0  ;;  %962 = vmatpush3.bf16.msra.mxu1 %v369_v24 }
  0x14   : > { %v424_v16 = vrot.slane %v301_v1, %v1144_v15  ;;  %967 = vmatprep.subr.bf16.mxu1 %v1074_v0 }
  0x16   : > { %425 = vrot.lane.b32.xlu1 %v424_v16, %s1077_s25 }
  0x19   : > { %958 = vmatmul.mubr.msk.bf16.vlgmr.msra.gmra.mxu0 %vm303_vm1, %v300_v3 }
  0x1a   : > { %975 = vmatprep.mubr.msk.bf16.mxu0 %vm1075_vm0, %v1074_v0  ;;  %415 = vrot.lane.b32.xlu1 %v924_v17, %s1077_s25 }
  0x1e   : > { %548 = vrot.lane.b32.xlu1 %v924_v17, %s1078_s26 }
  0x22   : > { %667 = vrot.lane.b32.xlu1 %v424_v16, %s1079_s27 }
  0x26   : > { %665 = vrot.lane.b32.xlu1 %v924_v17, %s1079_s27 }
  0x88   : > { %v426_v27 = vpop.permute.xlu1 %425 }
  0x89   : > { %v431_v29 = vsel %vm303_vm1, %v426_v27, 0 }
  0x8c   : > { %v416_v31 = vpop.permute.xlu1 %415 }
  0x90   : > { %v549_v33 = vpop.permute.xlu1 %548 }
  0x94   : > { %v668_v35 = vpop.permute.xlu1 %667 }
  0x95   : > { %v673_v36 = vsel %vm303_vm1, %v668_v35, 0 }
  0x98   : > { %v666_v37 = vpop.permute.xlu1 %665 }
  0xd9   : > { %v344_v4 = vpop.f32.mrf.mxu0 }
  0xda   : > { %v350_v5 = vmul.f32 0.17677669, %v344_v4 }
  0xdb   : > { %v959_v6 = vpop.f32.mrf.mxu0 }
  0xdc   : > { %v352_v7 = vsel %vm351_vm2, %v350_v5, -inf }
  0xdd   : > { %353 = vmax.xlane.f32.xlu0 %v352_v7  ;;  %v347_v8 = vpop.f32.mrf.mxu0  ;;  %v493_v7 = vrot.slane %v1158_v23, %v1144_v15 }
  0xdf   : > { %v960_v9 = vpop.f32.mrf.mxu0 }
 0x166   : > { %v354_v18 = vpop.xlane.xlu0 %353 }
 0x167   : > { %v355_v19 = vsub.f32 %v350_v5, %v354_v18 }
 0x169   : > { %v356_v20 = vmul.f32 1.442695, %v355_v19 }
 0x16b   : > { %1034 = vpow2.f32 %v356_v20 }
 0x178   : > { %v1035_v21 = vpop.eup %1034 }
 0x179   : > { %v358_v22 = vsel %vm351_vm2, %v1035_v21, 0.0 }
 0x17a   : > { %359 = vadd.xlane.f32.xlu0 %v358_v22 }
 0x190   : > { %550 = vrot.lane.b32.xlu0 %v424_v16, %s1078_s26 }
 0x203   : > { %v360_v25 = vpop.xlane.xlu0 %359 }
 0x204   : > { %1036 = vrcp.f32 %v360_v25 }
 0x207   : > { %v551_v32 = vpop.permute.xlu0 %550 }
 0x208   : > { %v556_v34 = vsel %vm303_vm1, %v551_v32, 0 }
 0x211   : > { %v1037_v26 = vpop.eup %1036 }
 0x212   : > { %v362_v28 = vmul.f32 %v1037_v26, %v1035_v21 }
 0x214   : > { %v363_v30 = vpack.c.bf16 %v362_v28, %v362_v28 }
 0x216   : > { %964 = vmatmul.mubr.msk.bf16.vlgmr.msra.gmra.mxu1 %vm351_vm2, %v363_v30 }
 0x217   : > { %968 = vmatpush3.bf16.xpose.msra.mxu1 %v431_v29  ;;  %969 = vmatprep.mubr.msk.bf16.mxu1 %vm1075_vm0, %v1074_v0 }
 0x218   : > { %979 = vmatprep.subr.bf16.mxu1 %v1074_v0 }
 0x21e   : > { %970 = vmatmul.mubr.msk.bf16.vlgmr.msra.gmra.mxu1 %vm303_vm1, %v416_v31 }
 0x21f   : > { %980 = vmatpush3.bf16.xpose.msra.mxu1 %v556_v34  ;;  %981 = vmatprep.mubr.msk.bf16.mxu1 %vm1075_vm0, %v1074_v0 }
 0x220   : > { %991 = vmatprep.subr.bf16.mxu1 %v1074_v0 }
 0x226   : > { %982 = vmatmul.mubr.msk.bf16.vlgmr.msra.gmra.mxu1 %vm303_vm1, %v549_v33 }
 0x227   : > { %992 = vmatpush3.bf16.xpose.msra.mxu1 %v673_v36  ;;  %993 = vmatprep.mubr.msk.bf16.mxu1 %vm1075_vm0, %v1074_v0 }
 0x22e   : > { %994 = vmatmul.mubr.msk.bf16.vlgmr.msra.gmra.mxu1 %vm303_vm1, %v666_v37 }
 0x2d6   : > { %v405_v38 = vpop.f32.mrf.mxu1 }
 0x2d7   : > { %411 = vst.msk [vmem:[#allocation2] sm:$0xff] %vm303_vm1, %v405_v38 }
 0x2d8   : > { %v965_v39 = vpop.f32.mrf.mxu1 }
 0x2da   : > { %v408_v40 = vpop.f32.mrf.mxu1 }
 0x2dc   : > { %v966_v41 = vpop.f32.mrf.mxu1 }
 0x2de   : > { %v467_v42 = vpop.f32.mrf.mxu1 }
 0x2df   : > { %v473_v43 = vmul.f32 0.17677669, %v467_v42 }
 0x2e0   : > { %v971_v44 = vpop.f32.mrf.mxu1 }
 0x2e1   : > { %v474_v45 = vsel %vm351_vm2, %v473_v43, -inf }
 0x2e2   : > { %475 = vmax.xlane.f32.xlu1 %v474_v45  ;;  %v470_v46 = vpop.f32.mrf.mxu1 }
 0x2e4   : > { %v972_v47 = vpop.f32.mrf.mxu1 }
 0x2e6   : > { %v592_v48 = vpop.f32.mrf.mxu1 }
 0x2e7   : > { %v598_v49 = vmul.f32 0.17677669, %v592_v48 }
 0x2e8   : > { %v983_v50 = vpop.f32.mrf.mxu1 }
 0x2e9   : > { %v599_v51 = vsel %vm351_vm2, %v598_v49, -inf }
 0x2ea   : > { %600 = vmax.xlane.f32.xlu0 %v599_v51  ;;  %v595_v52 = vpop.f32.mrf.mxu1 }
 0x2ec   : > { %v984_v53 = vpop.f32.mrf.mxu1 }
 0x2ee   : > { %v709_v54 = vpop.f32.mrf.mxu1 }
 0x2ef   : > { %v715_v55 = vmul.f32 0.17677669, %v709_v54 }
 0x2f0   : > { %v995_v56 = vpop.f32.mrf.mxu1 }
 0x2f1   : > { %v716_v57 = vsel %vm351_vm2, %v715_v55, -inf }
 0x2f2   : > { %717 = vmax.xlane.f32.xlu1 %v716_v57  ;;  %v712_v58 = vpop.f32.mrf.mxu1 }
 0x2f4   : > { %v996_v59 = vpop.f32.mrf.mxu1 }
 0x36b   : > { %v476_v60 = vpop.xlane.xlu1 %475 }
 0x36c   : > { %v477_v61 = vsub.f32 %v473_v43, %v476_v60 }
 0x36e   : > { %v478_v62 = vmul.f32 1.442695, %v477_v61 }
 0x370   : > { %1038 = vpow2.f32 %v478_v62 }
 0x373   : > { %v601_v63 = vpop.xlane.xlu0 %600 }
 0x374   : > { %v602_v1 = vsub.f32 %v598_v49, %v601_v63 }
 0x376   : > { %v603_v2 = vmul.f32 1.442695, %v602_v1 }
 0x378   : > { %1040 = vpow2.f32 %v603_v2 }
 0x37b   : > { %v718_v8 = vpop.xlane.xlu1 %717 }
 0x37c   : > { %v719_v9 = vsub.f32 %v715_v55, %v718_v8 }
 0x37d   : > { %v1039_v3 = vpop.eup %1038 }
 0x37e   : > { %v480_v4 = vsel %vm351_vm2, %v1039_v3, 0.0  ;;  %v720_v10 = vmul.f32 1.442695, %v719_v9 }
 0x37f   : > { %481 = vadd.xlane.f32.xlu1 %v480_v4 }
 0x380   : > { %1042 = vpow2.f32 %v720_v10 }
 0x385   : > { %v1041_v5 = vpop.eup %1040 }
 0x386   : > { %v605_v6 = vsel %vm351_vm2, %v1041_v5, 0.0 }
 0x387   : > { %606 = vadd.xlane.f32.xlu0 %v605_v6 }
 0x38d   : > { %v1043_v11 = vpop.eup %1042 }
 0x38e   : > { %v722_v12 = vsel %vm351_vm2, %v1043_v11, 0.0 }
 0x390   : > { %611 = vrot.lane.b32.xlu1 %v493_v7, %s1078_s26 }
 0x39d   : > { %494 = vrot.lane.b32.xlu0 %v493_v7, %s1077_s25 }
 0x3b4   : > { %723 = vadd.xlane.f32.xlu1 %v722_v12 }
 0x3c5   : > { %728 = vrot.lane.b32.xlu1 %v493_v7, %s1079_s27 }
 0x408   : > { %v482_v13 = vpop.xlane.xlu1 %481 }
 0x409   : > { %1044 = vrcp.f32 %v482_v13 }
 0x40c   : > { %v612_v19 = vpop.permute.xlu1 %611 }
 0x40d   : > { %v617_v21 = vsel %vm367_vm3, %v612_v19, 0 }
 0x410   : > { %v607_v14 = vpop.xlane.xlu0 %606 }
 0x411   : > { %1046 = vrcp.f32 %v607_v14 }
 0x414   : > { %v495_v16 = vpop.permute.xlu0 %494 }
 0x415   : > { %v500_v15 = vsel %vm367_vm3, %v495_v16, 0 }
 0x416   : > { %v1045_v17 = vpop.eup %1044  ;;  %974 = vmatpush3.bf16.msra.mxu0 %v500_v15 }
 0x417   : > { %985 = vmatprep.subr.bf16.mxu0 %v1074_v0  ;;  %v484_v18 = vmul.f32 %v1045_v17, %v1039_v3 }
 0x419   : > { %v485_v20 = vpack.c.bf16 %v484_v18, %v484_v18 }
 0x41b   : > { %976 = vmatmul.mubr.msk.bf16.vlgmr.msra.gmra.mxu0 %vm351_vm2, %v485_v20 }
 0x41c   : > { %986 = vmatpush3.bf16.msra.mxu0 %v617_v21  ;;  %987 = vmatprep.mubr.msk.bf16.mxu0 %vm1075_vm0, %v1074_v0 }
 0x41d   : > { %997 = vmatprep.subr.bf16.mxu0 %v1074_v0 }
 0x41e   : > { %v1047_v22 = vpop.eup %1046 }
 0x41f   : > { %v609_v23 = vmul.f32 %v1047_v22, %v1041_v5 }
 0x421   : > { %v610_v24 = vpack.c.bf16 %v609_v23, %v609_v23 }
 0x423   : > { %988 = vmatmul.mubr.msk.bf16.vlgmr.msra.gmra.mxu0 %vm351_vm2, %v610_v24 }
 0x424   : > { %999 = vmatprep.mubr.msk.bf16.mxu0 %vm1075_vm0, %v1074_v0 }
 0x43d   : > { %v724_v25 = vpop.xlane.xlu1 %723 }
 0x43e   : > { %1048 = vrcp.f32 %v724_v25 }
 0x441   : > { %v729_v26 = vpop.permute.xlu1 %728 }
 0x442   : > { %v734_v27 = vsel %vm367_vm3, %v729_v26, 0 }
 0x443   : > { %998 = vmatpush3.bf16.msra.mxu0 %v734_v27 }
 0x44b   : > { %v1049_v28 = vpop.eup %1048 }
 0x44c   : > { %v726_v29 = vmul.f32 %v1049_v28, %v1043_v11 }
 0x44e   : > { %v727_v30 = vpack.c.bf16 %v726_v29, %v726_v29 }
 0x450   : > { %1000 = vmatmul.mubr.msk.bf16.vlgmr.msra.gmra.mxu0 %vm351_vm2, %v727_v30 }
 0x4db   : > { %v536_v31 = vpop.f32.mrf.mxu0 }
 0x4dc   : > { %543 = vrot.lane.b32.xlu0 %v536_v31, %s1079_s27 }
 0x4dd   : > { %v977_v32 = vpop.f32.mrf.mxu0 }
 0x4df   : > { %v539_v33 = vpop.f32.mrf.mxu0 }
 0x4e1   : > { %v978_v34 = vpop.f32.mrf.mxu0 }
 0x4e3   : > { %v653_v35 = vpop.f32.mrf.mxu0 }
 0x4e4   : > { %660 = vrot.lane.b32.xlu1 %v653_v35, %s1078_s26 }
 0x4e5   : > { %v989_v0 = vpop.f32.mrf.mxu0 }
 0x4e7   : > { %v656_v36 = vpop.f32.mrf.mxu0 }
 0x4e9   : > { %v990_v37 = vpop.f32.mrf.mxu0 }
 0x510   : > { %v770_v38 = vpop.f32.mrf.mxu0 }
 0x511   : > { %777 = vrot.lane.b32.xlu0 %v770_v38, %s1077_s25 }
 0x512   : > { %v1001_v39 = vpop.f32.mrf.mxu0 }
 0x514   : > { %v773_v40 = vpop.f32.mrf.mxu0 }
 0x516   : > { %v1002_v41 = vpop.f32.mrf.mxu0 }
 0x54e   : > { %v544_v42 = vpop.permute.xlu0 %543 }
 0x54f   : > { %547 = vst.msk [vmem:[#allocation2] sm:$0xff] %vm546_vm4, %v544_v42 }
 0x556   : > { %v661_v43 = vpop.permute.xlu1 %660 }
 0x557   : > { %664 = vst.msk [vmem:[#allocation2] sm:$0xff] %vm663_vm5, %v661_v43 }
 0x583   : > { %v778_v44 = vpop.permute.xlu0 %777 }
 0x584   : > { %781 = vst.msk [vmem:[#allocation2] sm:$0xff] %vm780_vm6, %v778_v44 }
 0x58b   : > { %v782_v45 = vld [vmem:[#allocation2] sm:$0xff] }
 0x58c   : > { %v783_v46 = vpack.c.bf16 %v782_v45, %v782_v45 }
 0x58e   : > { %784 = vst [vmem:[%s298_s7] sm:$0xf] %v783_v46 }
 0x58f PF: > { %s13_s14 = sadd.s32 1, %s1072_s14   ;;  %s1224_s12 = smov %s1068_s13 }
 0x590   : > { %p10_p5 = scmp.ge.s32.totalorder %s13_s14, 4   ;;  %s1225_s13 = smov %s1227_s15 }
 0x592   :  { %12 = sbr.rel (!%p10_p5) target bundleno = 2 (0x2), region = 68 }

// kernel: _lambda_.31
= control target key start
LH: loop header
LB: loop body
LE: loop exit
PB: predicated region body
PF: predicated region fallthrough
CT: control target
= control target key end

     0   :  { %v198_v0 = vmov 0.0   ;;  %vm199_vm0 = vmmov 0   ;;  %s267_s1 = inlined_call_operand.vmem [shape: bf16[128,128], index: 1, kind: input, shape index: {}]   ;;  %s268_s0 = inlined_call_operand.vmem [shape: bf16[16,128], index: 0, kind: input, shape index: {}]   ;;  %s269_s2 = inlined_call_operand.vmem [shape: f32[1,128], index: 2, kind: input, shape index: {}]   ;;  %s270_s3 = inlined_call_operand.vmem [shape: f32[16,128], index: 3, kind: input, shape index: {}]   ;;  %s271_s4 = inlined_call_operand.vmem [shape: f32[16,128], index: 4, kind: output, shape index: {}]  }
   0x1   :  { %167 = vmatprep.subr.bf16.mxu0 %v198_v0  ;;  %v189_v1 = vld [vmem:[%s267_s1 + $0x38] sm:$0xff]   ;;  %183 = vmatprep.mubr.msk.bf16.mxu0 %vm199_vm0, %v198_v0  ;;  %v190_v2 = vld [vmem:[%s267_s1 + $0x30] sm:$0xff]   ;;  %v191_v3 = vld [vmem:[%s267_s1 + $0x28] sm:$0xff]  }
   0x2   :  { %168 = vmatpush3.bf16.msra.mxu0 %v189_v1  ;;  %v192_v4 = vld [vmem:[%s267_s1 + $0x20] sm:$0xff]   ;;  %v193_v5 = vld [vmem:[%s267_s1 + $0x18] sm:$0xff]   ;;  %v194_v6 = vld [vmem:[%s267_s1 + $0x10] sm:$0xff]  }
   0x3   :  { %169 = vmatprep.subr.bf16.mxu0 %v198_v0  ;;  %v195_v7 = vld [vmem:[%s267_s1 + $0x8] sm:$0xff]   ;;  %v196_v8 = vld [vmem:[%s267_s1] sm:$0xff]  }
   0x4   :  { %v197_v9 = vld [vmem:[%s268_s0] sm:$0xff]   ;;  %v139_v17 = vld [vmem:[%s270_s3 + $0x8] sm:$0xff] }
   0x5   :  { %v148_v10 = vld [vmem:[%s269_s2] ss:$0 sm:$0xff] }
   0x6   :  { %170 = vmatpush3.bf16.msra.mxu0 %v190_v2  ;;  %v138_v12 = vld [vmem:[%s270_s3] sm:$0xff] }
   0x7   :  { %171 = vmatprep.subr.bf16.mxu0 %v198_v0 }
   0xa   :  { %172 = vmatpush3.bf16.msra.mxu0 %v191_v3 }
   0xb   :  { %173 = vmatprep.subr.bf16.mxu0 %v198_v0 }
   0xe   :  { %174 = vmatpush3.bf16.msra.mxu0 %v192_v4 }
   0xf   :  { %175 = vmatprep.subr.bf16.mxu0 %v198_v0 }
  0x12   :  { %176 = vmatpush3.bf16.msra.mxu0 %v193_v5 }
  0x13   :  { %177 = vmatprep.subr.bf16.mxu0 %v198_v0 }
  0x16   :  { %178 = vmatpush3.bf16.msra.mxu0 %v194_v6 }
  0x17   :  { %179 = vmatprep.subr.bf16.mxu0 %v198_v0 }
  0x1a   :  { %180 = vmatpush3.bf16.msra.mxu0 %v195_v7 }
  0x1b   :  { %181 = vmatprep.subr.bf16.mxu0 %v198_v0 }
  0x1e   :  { %182 = vmatpush3.bf16.msra.mxu0 %v196_v8 }
  0x21   :  { %184 = vmatmul.mubr.bf16.vlgmr.msra.gmra.mxu0 %v197_v9 }
  0xe1   :  { %v131_v11 = vpop.f32.mrf.mxu0 }
  0xe2   :  { %v132_v13 = vadd.f32 %v148_v10, %v131_v11 }
  0xe3   :  { %v185_v14 = vpop.f32.mrf.mxu0 }
  0xe4   :  { %v140_v15 = vadd.f32 %v138_v12, %v132_v13 }
  0xe5   :  { %v134_v16 = vpop.f32.mrf.mxu0 }
  0xe6   :  { %142 = vst [vmem:[%s271_s4] sm:$0xff] %v140_v15  ;;  %v135_v18 = vadd.f32 %v148_v10, %v134_v16 }
  0xe7   :  { %v186_v19 = vpop.f32.mrf.mxu0 }
  0xe8   :  { %v141_v20 = vadd.f32 %v139_v17, %v135_v18 }
  0xea   :  { %143 = vst [vmem:[%s271_s4 + $0x8] sm:$0xff] %v141_v20 }

// kernel: _lambda_.37
= control target key start
LH: loop header
LB: loop body
LE: loop exit
PB: predicated region body
PF: predicated region fallthrough
CT: control target
= control target key end

     0   :  { %v456_v3 = vmov 0.0   ;;  %v457_v27 = vmov 0   ;;  %vm458_vm0 = vmmov 0   ;;  %v99_v53 = vlaneseq  ;;  %s607_s0 = inlined_call_operand.vmem [shape: f32[16,128], index: 0, kind: input, shape index: {}]   ;;  %s608_s1 = inlined_call_operand.vmem [shape: bf16[128,384], index: 1, kind: input, shape index: {}]   ;;  %s609_s3 = inlined_call_operand.vmem [shape: f32[1,128], index: 3, kind: input, shape index: {}]   ;;  %s610_s4 = inlined_call_operand.vmem [shape: f32[1,128], index: 4, kind: input, shape index: {}]   ;;  %s611_s2 = inlined_call_operand.vmem [shape: f32[1,384], index: 2, kind: input, shape index: {}]   ;;  %s612_s5 = inlined_call_operand.vmem [shape: bf16[16,384], index: 5, kind: output, shape index: {}]  }
   0x1   :  { %v21_v0 = vld [vmem:[%s607_s0] sm:$0xff]  ;;  %v22_v1 = vld [vmem:[%s607_s0 + $0x8] sm:$0xff]  ;;  %397 = vmatprep.subr.bf16.mxu1 %v456_v3  ;;  %v423_v5 = vld [vmem:[%s608_s1 + $0xb0] ss:$12 sps:$4 sm:$0xff]   ;;  %274 = vmatprep.mubr.bf16.mxu0 %v457_v27 }
   0x2   :  { %23 = vadd.xlane.f32.xlu0 %v21_v0  ;;  %v420_v2 = vld [vmem:[%s608_s1 + $0xac] ss:$12 sps:$4 sm:$0xff]   ;;  %v422_v4 = vld [vmem:[%s608_s1 + $0xa8] ss:$12 sps:$4 sm:$0xff]   ;;  %398 = vmatpush3.bf16.msra.mxu1 %v423_v5  ;;  %v426_v15 = vld [vmem:[%s608_s1 + $0x90] ss:$12 sps:$4 sm:$0xff]  }
   0x3   :  { %242 = vmatprep.subr.bf16.mxu0 %v420_v2  ;;  %399 = vmatprep.subr.bf16.mxu1 %v456_v3  ;;  %v424_v14 = vld [vmem:[%s608_s1 + $0x94] ss:$12 sps:$4 sm:$0xff]   ;;  %v427_v16 = vld [vmem:[%s608_s1 + $0x98] ss:$12 sps:$4 sm:$0xff]   ;;  %v428_v17 = vld [vmem:[%s608_s1 + $0x7c] ss:$12 sps:$4 sm:$0xff]  }
   0x4   :  { %243 = vmatpush1.bf16.msra.mxu0 %v422_v4  ;;  %v430_v18 = vld [vmem:[%s608_s1 + $0x78] ss:$12 sps:$4 sm:$0xff]   ;;  %v431_v19 = vld [vmem:[%s608_s1 + $0x80] ss:$12 sps:$4 sm:$0xff]   ;;  %v435_v22 = vld [vmem:[%s608_s1 + $0x68] ss:$12 sps:$4 sm:$0xff]   ;;  %413 = vmatprep.mubr.msk.bf16.mxu1 %vm458_vm0, %v456_v3 }
   0x5   :  { %244 = vmatprep.subr.bf16.mxu0 %v424_v14  ;;  %v432_v20 = vld [vmem:[%s608_s1 + $0x64] ss:$12 sps:$4 sm:$0xff]   ;;  %v434_v21 = vld [vmem:[%s608_s1 + $0x60] ss:$12 sps:$4 sm:$0xff]   ;;  %v438_v24 = vld [vmem:[%s608_s1 + $0x48] ss:$12 sps:$4 sm:$0xff]  }
   0x6   :  { %25 = vadd.xlane.f32.xlu0 %v22_v1  ;;  %400 = vmatpush3.bf16.msra.mxu1 %v427_v16  ;;  %v436_v23 = vld [vmem:[%s608_s1 + $0x4c] ss:$12 sps:$4 sm:$0xff]   ;;  %v439_v25 = vld [vmem:[%s608_s1 + $0x50] ss:$12 sps:$4 sm:$0xff]   ;;  %v440_v26 = vld [vmem:[%s608_s1 + $0x34] ss:$12 sps:$4 sm:$0xff]  }
   0x7   :  { %401 = vmatprep.subr.bf16.mxu1 %v456_v3  ;;  %v442_v28 = vld [vmem:[%s608_s1 + $0x30] ss:$12 sps:$4 sm:$0xff]   ;;  %v443_v29 = vld [vmem:[%s608_s1 + $0x38] ss:$12 sps:$4 sm:$0xff]   ;;  %v447_v32 = vld [vmem:[%s608_s1 + $0x20] ss:$12 sps:$4 sm:$0xff]  }
   0x8   :  { %245 = vmatpush1.bf16.msra.mxu0 %v426_v15  ;;  %v444_v30 = vld [vmem:[%s608_s1 + $0x1c] ss:$12 sps:$4 sm:$0xff]   ;;  %v446_v31 = vld [vmem:[%s608_s1 + $0x18] ss:$12 sps:$4 sm:$0xff]   ;;  %v450_v34 = vld [vmem:[%s608_s1] ss:$12 sps:$4 sm:$0xff]  }
   0x9   :  { %246 = vmatprep.subr.bf16.mxu0 %v428_v17  ;;  %v448_v33 = vld [vmem:[%s608_s1 + $0x4] ss:$12 sps:$4 sm:$0xff]   ;;  %v451_v35 = vld [vmem:[%s608_s1 + $0x8] ss:$12 sps:$4 sm:$0xff]   ;;  %v354_v44 = vld [vmem:[%s609_s3] ss:$0 sm:$0xff] }
   0xa   :  { %402 = vmatpush3.bf16.msra.mxu1 %v431_v19  ;;  %v355_v48 = vld [vmem:[%s610_s4] ss:$0 sm:$0xff]  ;;  %v100_v54 = vshrl.u32 %v99_v53, 7 }
   0xb   :  { %403 = vmatprep.subr.bf16.mxu1 %v456_v3  ;;  %v97_v56 = vld [vmem:[%s611_s2] sm:$0x7] }
   0xc   :  { %247 = vmatpush1.bf16.msra.mxu0 %v430_v18  ;;  %v109_v55 = vsub.s32 2, %v100_v54  ;;  %v101_v57 = vsub.s32 0, %v100_v54  ;;  %v105_v58 = vsub.s32 1, %v100_v54 }
   0xd   :  { %248 = vmatprep.subr.bf16.mxu0 %v432_v20 }
   0xe   :  { %404 = vmatpush3.bf16.msra.mxu1 %v435_v22  ;;  %v110_v59 = vrot.slane %v97_v56, %v109_v55  ;;  %v102_v60 = vrot.slane %v97_v56, %v101_v57  ;;  %v106_v61 = vrot.slane %v97_v56, %v105_v58 }
   0xf   :  { %405 = vmatprep.subr.bf16.mxu1 %v456_v3 }
  0x10   :  { %249 = vmatpush1.bf16.msra.mxu0 %v434_v21 }
  0x11   :  { %250 = vmatprep.subr.bf16.mxu0 %v436_v23 }
  0x12   :  { %406 = vmatpush3.bf16.msra.mxu1 %v439_v25 }
  0x13   :  { %407 = vmatprep.subr.bf16.mxu1 %v456_v3 }
  0x14   :  { %251 = vmatpush1.bf16.msra.mxu0 %v438_v24 }
  0x15   :  { %252 = vmatprep.subr.bf16.mxu0 %v440_v26 }
  0x16   :  { %408 = vmatpush3.bf16.msra.mxu1 %v443_v29 }
  0x17   :  { %409 = vmatprep.subr.bf16.mxu1 %v456_v3 }
  0x18   :  { %253 = vmatpush1.bf16.msra.mxu0 %v442_v28 }
  0x19   :  { %254 = vmatprep.subr.bf16.mxu0 %v444_v30 }
  0x1a   :  { %410 = vmatpush3.bf16.msra.mxu1 %v447_v32 }
  0x1b   :  { %411 = vmatprep.subr.bf16.mxu1 %v456_v3 }
  0x1c   :  { %255 = vmatpush1.bf16.msra.mxu0 %v446_v31 }
  0x1d   :  { %256 = vmatprep.subr.bf16.mxu0 %v448_v33 }
  0x1e   :  { %412 = vmatpush3.bf16.msra.mxu1 %v451_v35 }
  0x20   :  { %257 = vmatpush1.bf16.msra.mxu0 %v450_v34 }
  0x8b   :  { %v24_v6 = vpop.xlane.xlu0 %23 }
  0x8c   :  { %v28_v7 = vmul.f32 0.0078125, %v24_v6 }
  0x8e   :  { %v506_v8 = vsub.f32 %v21_v0, %v28_v7 }
  0x8f   :  { %v26_v9 = vpop.xlane.xlu0 %25 }
  0x90   :  { %v29_v10 = vmul.f32 0.0078125, %v26_v9  ;;  %v32_v11 = vmul.f32 %v506_v8, %v506_v8 }
  0x92   :  { %v510_v12 = vsub.f32 %v22_v1, %v29_v10  ;;  %34 = vadd.xlane.f32.xlu1 %v32_v11 }
  0x94   :  { %v33_v13 = vmul.f32 %v510_v12, %v510_v12 }
  0x96   :  { %36 = vadd.xlane.f32.xlu1 %v33_v13 }
 0x11b   :  { %v35_v36 = vpop.xlane.xlu1 %34 }
 0x11c   :  { %v38_v37 = vmul.f32 0.0078125, %v35_v36 }
 0x11e   :  { %v40_v38 = vadd.f32 1e-05, %v38_v37 }
 0x11f   :  { %v37_v39 = vpop.xlane.xlu1 %36 }
 0x120   :  { %452 = vrsqrt.f32 %v40_v38  ;;  %v39_v40 = vmul.f32 0.0078125, %v37_v39 }
 0x122   :  { %v41_v41 = vadd.f32 1e-05, %v39_v40 }
 0x124   :  { %454 = vrsqrt.f32 %v41_v41 }
 0x12d   :  { %v453_v42 = vpop.eup %452 }
 0x12e   :  { %v44_v43 = vmul.f32 %v453_v42, %v506_v8 }
 0x130   :  { %v53_v47 = vmul.f32 %v354_v44, %v44_v43 }
 0x131   :  { %v455_v45 = vpop.eup %454 }
 0x132   :  { %v45_v46 = vmul.f32 %v455_v45, %v510_v12  ;;  %v62_v50 = vadd.f32 %v355_v48, %v53_v47 }
 0x134   :  { %v54_v49 = vmul.f32 %v354_v44, %v45_v46 }
 0x136   :  { %v63_v51 = vadd.f32 %v355_v48, %v54_v49 }
 0x138   :  { %v64_v52 = vpack.c.bf16 %v63_v51, %v62_v50 }
 0x13a   :  { %275 = vmatmul.mubr.bf16.vlgmr.msra.gmra.mxu0 %v64_v52  ;;  %414 = vmatmul.mubr.bf16.vlgmr.msra.gmra.mxu1 %v64_v52 }
 0x1fa   :  { %v276_v62 = vpop.f32.mrf.mxu0  ;;  %v319_v63 = vpop.f32.mrf.mxu1 }
 0x1fb   :  { %v320_v0 = vadd.f32 %v319_v63, %v110_v59  ;;  %v277_v3 = vadd.f32 %v276_v62, %v102_v60 }
 0x1fc   :  { %v278_v1 = vpop.f32.mrf.mxu0  ;;  %v415_v2 = vpop.f32.mrf.mxu1 }
 0x1fd   :  { %v385_v4 = vpack.c.bf16 %v320_v0, %v320_v0  ;;  %v279_v5 = vadd.f32 %v278_v1, %v106_v61 }
 0x1fe   :  { %v280_v6 = vpop.f32.mrf.mxu0  ;;  %v322_v7 = vpop.f32.mrf.mxu1 }
 0x1ff   :  { %347 = vst [vmem:[%s612_s5 + $0x8] sm:$0xf] %v385_v4  ;;  %v384_v8 = vpack.c.bf16 %v279_v5, %v277_v3  ;;  %v323_v9 = vadd.f32 %v322_v7, %v110_v59  ;;  %v281_v12 = vadd.f32 %v280_v6, %v102_v60 }
 0x200   :  { %v282_v10 = vpop.f32.mrf.mxu0  ;;  %v416_v11 = vpop.f32.mrf.mxu1 }
 0x201   :  { %346 = vst [vmem:[%s612_s5] sm:$0xff] %v384_v8  ;;  %v387_v13 = vpack.c.bf16 %v323_v9, %v323_v9  ;;  %v283_v14 = vadd.f32 %v282_v10, %v106_v61 }
 0x203   :  { %349 = vst [vmem:[%s612_s5 + $0x14] sm:$0xf] %v387_v13  ;;  %v386_v15 = vpack.c.bf16 %v283_v14, %v281_v12 }
 0x205   :  { %348 = vst [vmem:[%s612_s5 + $0xc] sm:$0xff] %v386_v15 }

// kernel: _lambda_.40
= control target key start
LH: loop header
LB: loop body
LE: loop exit
PB: predicated region body
PF: predicated region fallthrough
CT: control target
= control target key end

     0   :  { %v580_v36 = vmov 0   ;;  %v99_v60 = vlaneseq  ;;  %s779_s0 = inlined_call_operand.vmem [shape: f32[16,128], index: 0, kind: input, shape index: {}]   ;;  %s780_s1 = inlined_call_operand.vmem [shape: bf16[128,512], index: 1, kind: input, shape index: {}]   ;;  %s781_s3 = inlined_call_operand.vmem [shape: f32[1,128], index: 3, kind: input, shape index: {}]   ;;  %s782_s4 = inlined_call_operand.vmem [shape: f32[1,128], index: 4, kind: input, shape index: {}]   ;;  %s783_s2 = inlined_call_operand.vmem [shape: f32[1,512], index: 2, kind: input, shape index: {}]   ;;  %s784_s5 = inlined_call_operand.vmem [shape: bf16[16,512], index: 5, kind: output, shape index: {}]  }
   0x1   :  { %v21_v0 = vld [vmem:[%s779_s0] sm:$0xff]  ;;  %v22_v1 = vld [vmem:[%s779_s0 + $0x8] sm:$0xff]  ;;  %311 = vmatprep.mubr.bf16.mxu0 %v580_v36  ;;  %354 = vmatprep.mubr.bf16.mxu1 %v580_v36 }
   0x2   :  { %23 = vadd.xlane.f32.xlu0 %v21_v0  ;;  %v512_v2 = vld [vmem:[%s780_s1 + $0xe4] ss:$16 sps:$4 sm:$0xff]   ;;  %v514_v3 = vld [vmem:[%s780_s1 + $0xec] ss:$16 sps:$4 sm:$0xff]   ;;  %v516_v4 = vld [vmem:[%s780_s1 + $0xe0] ss:$16 sps:$4 sm:$0xff]  }
   0x3   :  { %279 = vmatprep.subr.bf16.mxu0 %v512_v2  ;;  %v517_v5 = vld [vmem:[%s780_s1 + $0xe8] ss:$16 sps:$4 sm:$0xff]   ;;  %322 = vmatprep.subr.bf16.mxu1 %v514_v3  ;;  %v518_v14 = vld [vmem:[%s780_s1 + $0xc4] ss:$16 sps:$4 sm:$0xff]   ;;  %v520_v15 = vld [vmem:[%s780_s1 + $0xcc] ss:$16 sps:$4 sm:$0xff]  }
   0x4   :  { %280 = vmatpush1.bf16.msra.mxu0 %v516_v4  ;;  %323 = vmatpush1.bf16.msra.mxu1 %v517_v5  ;;  %v522_v16 = vld [vmem:[%s780_s1 + $0xc0] ss:$16 sps:$4 sm:$0xff]   ;;  %v523_v17 = vld [vmem:[%s780_s1 + $0xc8] ss:$16 sps:$4 sm:$0xff]   ;;  %v524_v18 = vld [vmem:[%s780_s1 + $0xa4] ss:$16 sps:$4 sm:$0xff]  }
   0x5   :  { %281 = vmatprep.subr.bf16.mxu0 %v518_v14  ;;  %324 = vmatprep.subr.bf16.mxu1 %v520_v15  ;;  %v526_v19 = vld [vmem:[%s780_s1 + $0xac] ss:$16 sps:$4 sm:$0xff]   ;;  %v528_v20 = vld [vmem:[%s780_s1 + $0xa0] ss:$16 sps:$4 sm:$0xff]   ;;  %v529_v21 = vld [vmem:[%s780_s1 + $0xa8] ss:$16 sps:$4 sm:$0xff]  }
   0x6   :  { %25 = vadd.xlane.f32.xlu0 %v22_v1  ;;  %v530_v22 = vld [vmem:[%s780_s1 + $0x84] ss:$16 sps:$4 sm:$0xff]   ;;  %v532_v23 = vld [vmem:[%s780_s1 + $0x8c] ss:$16 sps:$4 sm:$0xff]   ;;  %v534_v24 = vld [vmem:[%s780_s1 + $0x80] ss:$16 sps:$4 sm:$0xff]  }
   0x7   :  { %v535_v25 = vld [vmem:[%s780_s1 + $0x88] ss:$16 sps:$4 sm:$0xff]   ;;  %v536_v26 = vld [vmem:[%s780_s1 + $0x64] ss:$16 sps:$4 sm:$0xff]   ;;  %v538_v27 = vld [vmem:[%s780_s1 + $0x6c] ss:$16 sps:$4 sm:$0xff]  }
   0x8   :  { %282 = vmatpush1.bf16.msra.mxu0 %v522_v16  ;;  %325 = vmatpush1.bf16.msra.mxu1 %v523_v17  ;;  %v540_v28 = vld [vmem:[%s780_s1 + $0x60] ss:$16 sps:$4 sm:$0xff]   ;;  %v541_v29 = vld [vmem:[%s780_s1 + $0x68] ss:$16 sps:$4 sm:$0xff]   ;;  %v542_v30 = vld [vmem:[%s780_s1 + $0x44] ss:$16 sps:$4 sm:$0xff]  }
   0x9   :  { %283 = vmatprep.subr.bf16.mxu0 %v524_v18  ;;  %326 = vmatprep.subr.bf16.mxu1 %v526_v19  ;;  %v544_v31 = vld [vmem:[%s780_s1 + $0x4c] ss:$16 sps:$4 sm:$0xff]   ;;  %v546_v32 = vld [vmem:[%s780_s1 + $0x40] ss:$16 sps:$4 sm:$0xff]   ;;  %v547_v33 = vld [vmem:[%s780_s1 + $0x48] ss:$16 sps:$4 sm:$0xff]  }
   0xa   :  { %v548_v34 = vld [vmem:[%s780_s1 + $0x24] ss:$16 sps:$4 sm:$0xff]   ;;  %v550_v35 = vld [vmem:[%s780_s1 + $0x2c] ss:$16 sps:$4 sm:$0xff]   ;;  %v552_v37 = vld [vmem:[%s780_s1 + $0x20] ss:$16 sps:$4 sm:$0xff]  }
   0xb   :  { %v553_v38 = vld [vmem:[%s780_s1 + $0x28] ss:$16 sps:$4 sm:$0xff]   ;;  %v554_v39 = vld [vmem:[%s780_s1 + $0x4] ss:$16 sps:$4 sm:$0xff]   ;;  %v556_v40 = vld [vmem:[%s780_s1 + $0xc] ss:$16 sps:$4 sm:$0xff]  }
   0xc   :  { %284 = vmatpush1.bf16.msra.mxu0 %v528_v20  ;;  %327 = vmatpush1.bf16.msra.mxu1 %v529_v21  ;;  %v558_v41 = vld [vmem:[%s780_s1] ss:$16 sps:$4 sm:$0xff]   ;;  %v559_v42 = vld [vmem:[%s780_s1 + $0x8] ss:$16 sps:$4 sm:$0xff]   ;;  %v100_v61 = vshrl.u32 %v99_v60, 7 }
   0xd   :  { %285 = vmatprep.subr.bf16.mxu0 %v530_v22  ;;  %328 = vmatprep.subr.bf16.mxu1 %v532_v23  ;;  %v469_v51 = vld [vmem:[%s781_s3] ss:$0 sm:$0xff] }
   0xe   :  { %v470_v55 = vld [vmem:[%s782_s4] ss:$0 sm:$0xff]  ;;  %v101_v62 = vsub.s32 0, %v100_v61  ;;  %v109_v63 = vsub.s32 2, %v100_v61  ;;  %v113_v2 = vsub.s32 3, %v100_v61 }
  0x10   :  { %286 = vmatpush1.bf16.msra.mxu0 %v534_v24  ;;  %329 = vmatpush1.bf16.msra.mxu1 %v535_v25 }
  0x11   :  { %287 = vmatprep.subr.bf16.mxu0 %v536_v26  ;;  %330 = vmatprep.subr.bf16.mxu1 %v538_v27 }
  0x14   :  { %288 = vmatpush1.bf16.msra.mxu0 %v540_v28  ;;  %331 = vmatpush1.bf16.msra.mxu1 %v541_v29 }
  0x15   :  { %289 = vmatprep.subr.bf16.mxu0 %v542_v30  ;;  %332 = vmatprep.subr.bf16.mxu1 %v544_v31 }
  0x18   :  { %290 = vmatpush1.bf16.msra.mxu0 %v546_v32  ;;  %333 = vmatpush1.bf16.msra.mxu1 %v547_v33 }
  0x19   :  { %291 = vmatprep.subr.bf16.mxu0 %v548_v34  ;;  %334 = vmatprep.subr.bf16.mxu1 %v550_v35 }
  0x1c   :  { %292 = vmatpush1.bf16.msra.mxu0 %v552_v37  ;;  %335 = vmatpush1.bf16.msra.mxu1 %v553_v38 }
  0x1d   :  { %293 = vmatprep.subr.bf16.mxu0 %v554_v39  ;;  %336 = vmatprep.subr.bf16.mxu1 %v556_v40 }
  0x20   :  { %294 = vmatpush1.bf16.msra.mxu0 %v558_v41  ;;  %337 = vmatpush1.bf16.msra.mxu1 %v559_v42 }
  0x8b   :  { %v24_v6 = vpop.xlane.xlu0 %23 }
  0x8c   :  { %v28_v7 = vmul.f32 0.0078125, %v24_v6 }
  0x8e   :  { %v629_v8 = vsub.f32 %v21_v0, %v28_v7  ;;  %v97_v0 = vld [vmem:[%s783_s2] sm:$0xf] }
  0x8f   :  { %v26_v9 = vpop.xlane.xlu0 %25  ;;  %v102_v3 = vrot.slane %v97_v0, %v101_v62  ;;  %v110_v4 = vrot.slane %v97_v0, %v109_v63 }
  0x90   :  { %v29_v10 = vmul.f32 0.0078125, %v26_v9  ;;  %v32_v11 = vmul.f32 %v629_v8, %v629_v8 }
  0x92   :  { %v633_v12 = vsub.f32 %v22_v1, %v29_v10  ;;  %34 = vadd.xlane.f32.xlu1 %v32_v11  ;;  %v105_v1 = vsub.s32 1, %v100_v61 }
  0x94   :  { %v33_v13 = vmul.f32 %v633_v12, %v633_v12  ;;  %v106_v7 = vrot.slane %v97_v0, %v105_v1 }
  0x96   :  { %36 = vadd.xlane.f32.xlu1 %v33_v13 }
 0x11b   :  { %v35_v43 = vpop.xlane.xlu1 %34 }
 0x11c   :  { %v38_v44 = vmul.f32 0.0078125, %v35_v43 }
 0x11e   :  { %v40_v45 = vadd.f32 1e-05, %v38_v44 }
 0x11f   :  { %v37_v46 = vpop.xlane.xlu1 %36 }
 0x120   :  { %560 = vrsqrt.f32 %v40_v45  ;;  %v39_v47 = vmul.f32 0.0078125, %v37_v46 }
 0x122   :  { %v41_v48 = vadd.f32 1e-05, %v39_v47 }
 0x124   :  { %562 = vrsqrt.f32 %v41_v48 }
 0x12d   :  { %v561_v49 = vpop.eup %560 }
 0x12e   :  { %v44_v50 = vmul.f32 %v561_v49, %v629_v8  ;;  %v114_v8 = vrot.slane %v97_v0, %v113_v2 }
 0x130   :  { %v53_v54 = vmul.f32 %v469_v51, %v44_v50 }
 0x131   :  { %v563_v52 = vpop.eup %562 }
 0x132   :  { %v45_v53 = vmul.f32 %v563_v52, %v633_v12  ;;  %v62_v57 = vadd.f32 %v470_v55, %v53_v54 }
 0x134   :  { %v54_v56 = vmul.f32 %v469_v51, %v45_v53 }
 0x136   :  { %v63_v58 = vadd.f32 %v470_v55, %v54_v56 }
 0x138   :  { %v64_v59 = vpack.c.bf16 %v63_v58, %v62_v57 }
 0x13a   :  { %312 = vmatmul.mubr.bf16.vlgmr.msra.gmra.mxu0 %v64_v59  ;;  %355 = vmatmul.mubr.bf16.vlgmr.msra.gmra.mxu1 %v64_v59 }
 0x1fa   :  { %v313_v5 = vpop.f32.mrf.mxu0  ;;  %v356_v6 = vpop.f32.mrf.mxu1 }
 0x1fb   :  { %v732_v9 = vadd.f32 %v313_v5, %v102_v3  ;;  %v734_v10 = vadd.f32 %v356_v6, %v110_v4 }
 0x1fc   :  { %v315_v11 = vpop.f32.mrf.mxu0  ;;  %v358_v12 = vpop.f32.mrf.mxu1 }
 0x1fd   :  { %v373_v13 = vmul.f32 0.044715, %v732_v9  ;;  %v375_v14 = vmul.f32 0.044715, %v734_v10  ;;  %v316_v15 = vadd.f32 %v315_v11, %v106_v7  ;;  %v738_v16 = vadd.f32 %v358_v12, %v114_v8 }
 0x1fe   :  { %v317_v17 = vpop.f32.mrf.mxu0  ;;  %v360_v18 = vpop.f32.mrf.mxu1  ;;  %v365_v5 = vmul.f32 0.5, %v732_v9 }
 0x1ff   :  { %v381_v19 = vmul.f32 %v373_v13, %v732_v9  ;;  %v383_v20 = vmul.f32 %v375_v14, %v734_v10  ;;  %v742_v21 = vadd.f32 %v317_v17, %v102_v3  ;;  %v744_v22 = vadd.f32 %v360_v18, %v110_v4 }
 0x200   :  { %v374_v23 = vmul.f32 0.044715, %v316_v15  ;;  %v376_v24 = vmul.f32 0.044715, %v738_v16  ;;  %v319_v25 = vpop.f32.mrf.mxu0  ;;  %v362_v29 = vpop.f32.mrf.mxu1  ;;  %v366_v6 = vmul.f32 0.5, %v316_v15  ;;  %v368_v11 = vmul.f32 0.5, %v738_v16 }
 0x201   :  { %v389_v26 = vmul.f32 %v381_v19, %v732_v9  ;;  %v391_v27 = vmul.f32 %v383_v20, %v734_v10  ;;  %v377_v28 = vmul.f32 0.044715, %v742_v21  ;;  %v379_v32 = vmul.f32 0.044715, %v744_v22 }
 0x202   :  { %v382_v30 = vmul.f32 %v374_v23, %v316_v15  ;;  %v384_v31 = vmul.f32 %v376_v24, %v738_v16  ;;  %v320_v36 = vadd.f32 %v319_v25, %v106_v7  ;;  %v363_v40 = vadd.f32 %v362_v29, %v114_v8 }
 0x203   :  { %v397_v33 = vadd.f32 %v389_v26, %v732_v9  ;;  %v399_v34 = vadd.f32 %v391_v27, %v734_v10  ;;  %v385_v35 = vmul.f32 %v377_v28, %v742_v21  ;;  %v387_v39 = vmul.f32 %v379_v32, %v744_v22 }
 0x204   :  { %v390_v37 = vmul.f32 %v382_v30, %v316_v15  ;;  %v392_v38 = vmul.f32 %v384_v31, %v738_v16  ;;  %v378_v47 = vmul.f32 0.044715, %v320_v36  ;;  %v380_v49 = vmul.f32 0.044715, %v363_v40 }
 0x205   :  { %v405_v41 = vmul.f32 0.7978846, %v397_v33  ;;  %v407_v42 = vmul.f32 0.7978846, %v399_v34  ;;  %v393_v43 = vmul.f32 %v385_v35, %v742_v21  ;;  %v395_v46 = vmul.f32 %v387_v39, %v744_v22 }
 0x206   :  { %v398_v44 = vadd.f32 %v390_v37, %v316_v15  ;;  %v400_v45 = vadd.f32 %v392_v38, %v738_v16  ;;  %v386_v54 = vmul.f32 %v378_v47, %v320_v36  ;;  %v388_v55 = vmul.f32 %v380_v49, %v363_v40 }
 0x207   :  { %564 = vtanh.f32 %v405_v41  ;;  %v401_v48 = vadd.f32 %v393_v43, %v742_v21  ;;  %v403_v52 = vadd.f32 %v395_v46, %v744_v22  ;;  %v367_v8 = vmul.f32 0.5, %v734_v10 }
 0x208   :  { %566 = vtanh.f32 %v407_v42  ;;  %v406_v50 = vmul.f32 0.7978846, %v398_v44  ;;  %v408_v51 = vmul.f32 0.7978846, %v400_v45  ;;  %v394_v57 = vmul.f32 %v386_v54, %v320_v36 }
 0x209   :  { %v409_v53 = vmul.f32 0.7978846, %v401_v48  ;;  %v411_v56 = vmul.f32 0.7978846, %v403_v52  ;;  %v396_v58 = vmul.f32 %v388_v55, %v363_v40  ;;  %v369_v10 = vmul.f32 0.5, %v742_v21 }
 0x20a   :  { %568 = vtanh.f32 %v406_v50  ;;  %v402_v59 = vadd.f32 %v394_v57, %v320_v36  ;;  %v370_v16 = vmul.f32 0.5, %v320_v36  ;;  %v371_v28 = vmul.f32 0.5, %v744_v22 }
 0x20b   :  { %570 = vtanh.f32 %v408_v51  ;;  %v404_v60 = vadd.f32 %v396_v58, %v363_v40  ;;  %v372_v29 = vmul.f32 0.5, %v363_v40 }
 0x20c   :  { %572 = vtanh.f32 %v409_v53  ;;  %v410_v61 = vmul.f32 0.7978846, %v402_v59 }
 0x20d   :  { %574 = vtanh.f32 %v411_v56  ;;  %v412_v62 = vmul.f32 0.7978846, %v404_v60 }
 0x20e   :  { %576 = vtanh.f32 %v410_v61 }
 0x20f   :  { %578 = vtanh.f32 %v412_v62 }
 0x214   :  { %v565_v63 = vpop.eup %564 }
 0x215   :  { %v567_v0 = vpop.eup %566  ;;  %v421_v1 = vadd.f32 1.0, %v565_v63 }
 0x216   :  { %v423_v3 = vadd.f32 1.0, %v567_v0 }
 0x217   :  { %v569_v2 = vpop.eup %568  ;;  %v429_v14 = vmul.f32 %v421_v1, %v365_v5 }
 0x218   :  { %v571_v4 = vpop.eup %570  ;;  %v422_v7 = vadd.f32 1.0, %v569_v2  ;;  %v431_v19 = vmul.f32 %v423_v3, %v367_v8 }
 0x219   :  { %v424_v12 = vadd.f32 1.0, %v571_v4  ;;  %v573_v13 = vpop.eup %572 }
 0x21a   :  { %v430_v17 = vmul.f32 %v422_v7, %v366_v6  ;;  %v575_v18 = vpop.eup %574  ;;  %v425_v25 = vadd.f32 1.0, %v573_v13 }
 0x21b   :  { %v432_v20 = vmul.f32 %v424_v12, %v368_v11  ;;  %v577_v26 = vpop.eup %576  ;;  %v427_v9 = vadd.f32 1.0, %v575_v18 }
 0x21c   :  { %v507_v23 = vpack.c.bf16 %v430_v17, %v429_v14  ;;  %v579_v15 = vpop.eup %578  ;;  %v426_v27 = vadd.f32 1.0, %v577_v26  ;;  %v433_v31 = vmul.f32 %v425_v25, %v369_v10 }
 0x21d   :  { %v508_v24 = vpack.c.bf16 %v432_v20, %v431_v19  ;;  %v428_v30 = vadd.f32 1.0, %v579_v15  ;;  %v435_v33 = vmul.f32 %v427_v9, %v371_v28 }
 0x21e   :  { %461 = vst [vmem:[%s784_s5] sm:$0xff] %v507_v23  ;;  %v434_v32 = vmul.f32 %v426_v27, %v370_v16 }
 0x21f   :  { %462 = vst [vmem:[%s784_s5 + $0x8] sm:$0xff] %v508_v24  ;;  %v436_v34 = vmul.f32 %v428_v30, %v372_v29 }
 0x220   :  { %v509_v35 = vpack.c.bf16 %v434_v32, %v433_v31 }
 0x221   :  { %v510_v37 = vpack.c.bf16 %v436_v34, %v435_v33 }
 0x222   :  { %463 = vst [vmem:[%s784_s5 + $0x10] sm:$0xff] %v509_v35 }
 0x223   :  { %464 = vst [vmem:[%s784_s5 + $0x18] sm:$0xff] %v510_v37 }

// kernel: _lambda_.41
= control target key start
LH: loop header
LB: loop body
LE: loop exit
PB: predicated region body
PF: predicated region fallthrough
CT: control target
= control target key end

     0   :  { %s664_s1 = inlined_call_operand.vmem [shape: bf16[512,128], index: 1, kind: input, shape index: {}]   ;;  %s665_s0 = inlined_call_operand.vmem [shape: bf16[16,512], index: 0, kind: input, shape index: {}]   ;;  %s666_s2 = inlined_call_operand.vmem [shape: f32[1,128], index: 2, kind: input, shape index: {}]   ;;  %s667_s3 = inlined_call_operand.vmem [shape: f32[16,128], index: 3, kind: input, shape index: {}]   ;;  %s668_s4 = inlined_call_operand.vmem [shape: f32[16,128], index: 4, kind: output, shape index: {}]  }
   0x1   :  { %v478_v0 = vld [vmem:[%s664_s1 + $0x78] sm:$0xff]   ;;  %v482_v4 = vld [vmem:[%s664_s1 + $0x70] sm:$0xff]   ;;  %v486_v8 = vld [vmem:[%s664_s1 + $0x68] sm:$0xff]  }
   0x2   :  { %v479_v1 = vld [vmem:[%s664_s1 + $0xf8] sm:$0xff]   ;;  %434 = vmatprep.subr.bf16.mxu0 %v478_v0  ;;  %v483_v5 = vld [vmem:[%s664_s1 + $0xf0] sm:$0xff]   ;;  %v487_v9 = vld [vmem:[%s664_s1 + $0xe8] sm:$0xff]  }
   0x3   :  { %v480_v2 = vld [vmem:[%s664_s1 + $0x38] sm:$0xff]   ;;  %456 = vmatprep.subr.bf16.mxu1 %v479_v1  ;;  %v484_v6 = vld [vmem:[%s664_s1 + $0x30] sm:$0xff]   ;;  %v488_v10 = vld [vmem:[%s664_s1 + $0x28] sm:$0xff]  }
   0x4   :  { %v481_v3 = vld [vmem:[%s664_s1 + $0xb8] sm:$0xff]   ;;  %435 = vmatpush3.bf16.msra.mxu0 %v480_v2  ;;  %v485_v7 = vld [vmem:[%s664_s1 + $0xb0] sm:$0xff]   ;;  %v489_v11 = vld [vmem:[%s664_s1 + $0xa8] sm:$0xff]  }
   0x5   :  { %457 = vmatpush3.bf16.msra.mxu1 %v481_v3  ;;  %436 = vmatprep.subr.bf16.mxu0 %v482_v4  ;;  %v490_v12 = vld [vmem:[%s664_s1 + $0x60] sm:$0xff]   ;;  %v494_v16 = vld [vmem:[%s664_s1 + $0x58] sm:$0xff]   ;;  %v498_v20 = vld [vmem:[%s664_s1 + $0x50] sm:$0xff]  }
   0x6   :  { %458 = vmatprep.subr.bf16.mxu1 %v483_v5  ;;  %v491_v13 = vld [vmem:[%s664_s1 + $0xe0] sm:$0xff]   ;;  %v495_v17 = vld [vmem:[%s664_s1 + $0xd8] sm:$0xff]   ;;  %v499_v21 = vld [vmem:[%s664_s1 + $0xd0] sm:$0xff]  }
   0x7   :  { %v492_v14 = vld [vmem:[%s664_s1 + $0x20] sm:$0xff]   ;;  %v496_v18 = vld [vmem:[%s664_s1 + $0x18] sm:$0xff]   ;;  %v500_v22 = vld [vmem:[%s664_s1 + $0x10] sm:$0xff]  }
   0x8   :  { %437 = vmatpush3.bf16.msra.mxu0 %v484_v6  ;;  %v493_v15 = vld [vmem:[%s664_s1 + $0xa0] sm:$0xff]   ;;  %v497_v19 = vld [vmem:[%s664_s1 + $0x98] sm:$0xff]   ;;  %v501_v23 = vld [vmem:[%s664_s1 + $0x90] sm:$0xff]  }
   0x9   :  { %459 = vmatpush3.bf16.msra.mxu1 %v485_v7  ;;  %438 = vmatprep.subr.bf16.mxu0 %v486_v8  ;;  %v502_v24 = vld [vmem:[%s664_s1 + $0x48] sm:$0xff]   ;;  %v506_v28 = vld [vmem:[%s664_s1 + $0x40] sm:$0xff]  }
   0xa   :  { %460 = vmatprep.subr.bf16.mxu1 %v487_v9  ;;  %v503_v25 = vld [vmem:[%s664_s1 + $0xc8] sm:$0xff]   ;;  %v507_v29 = vld [vmem:[%s664_s1 + $0xc0] sm:$0xff]  }
   0xb   :  { %v504_v26 = vld [vmem:[%s664_s1 + $0x8] sm:$0xff]   ;;  %v508_v30 = vld [vmem:[%s664_s1] sm:$0xff]  }
   0xc   :  { %439 = vmatpush3.bf16.msra.mxu0 %v488_v10  ;;  %v505_v27 = vld [vmem:[%s664_s1 + $0x88] sm:$0xff]   ;;  %v509_v31 = vld [vmem:[%s664_s1 + $0x80] sm:$0xff]  }
   0xd   :  { %461 = vmatpush3.bf16.msra.mxu1 %v489_v11  ;;  %440 = vmatprep.subr.bf16.mxu0 %v490_v12  ;;  %v510_v32 = vld [vmem:[%s665_s0] ss:$16 sps:$4 sm:$0xff]   ;;  %v512_v33 = vld [vmem:[%s665_s0 + $0x4] ss:$16 sps:$4 sm:$0xff]   ;;  %v513_v34 = vld [vmem:[%s665_s0 + $0x8] ss:$16 sps:$4 sm:$0xff]  }
   0xe   :  { %462 = vmatprep.subr.bf16.mxu1 %v491_v13  ;;  %v515_v35 = vld [vmem:[%s665_s0 + $0xc] ss:$16 sps:$4 sm:$0xff]   ;;  %337 = vmatprep.mubr.bf16.mxu0 %v512_v33  ;;  %v397_v38 = vld [vmem:[%s666_s2] ss:$0 sm:$0xff] }
   0xf   :  { %378 = vmatprep.mubr.bf16.mxu1 %v515_v35  ;;  %v387_v46 = vld [vmem:[%s667_s3] sm:$0xff]  ;;  %v388_v54 = vld [vmem:[%s667_s3 + $0x8] sm:$0xff] }
  0x10   :  { %441 = vmatpush3.bf16.msra.mxu0 %v492_v14 }
  0x11   :  { %463 = vmatpush3.bf16.msra.mxu1 %v493_v15  ;;  %442 = vmatprep.subr.bf16.mxu0 %v494_v16 }
  0x12   :  { %464 = vmatprep.subr.bf16.mxu1 %v495_v17 }
  0x14   :  { %443 = vmatpush3.bf16.msra.mxu0 %v496_v18 }
  0x15   :  { %465 = vmatpush3.bf16.msra.mxu1 %v497_v19  ;;  %444 = vmatprep.subr.bf16.mxu0 %v498_v20 }
  0x16   :  { %466 = vmatprep.subr.bf16.mxu1 %v499_v21 }
  0x18   :  { %445 = vmatpush3.bf16.msra.mxu0 %v500_v22 }
  0x19   :  { %467 = vmatpush3.bf16.msra.mxu1 %v501_v23  ;;  %446 = vmatprep.subr.bf16.mxu0 %v502_v24 }
  0x1a   :  { %468 = vmatprep.subr.bf16.mxu1 %v503_v25 }
  0x1c   :  { %447 = vmatpush3.bf16.msra.mxu0 %v504_v26 }
  0x1d   :  { %469 = vmatpush3.bf16.msra.mxu1 %v505_v27  ;;  %448 = vmatprep.subr.bf16.mxu0 %v506_v28 }
  0x1e   :  { %470 = vmatprep.subr.bf16.mxu1 %v507_v29 }
  0x20   :  { %449 = vmatpush3.bf16.msra.mxu0 %v508_v30 }
  0x21   :  { %471 = vmatpush3.bf16.msra.mxu1 %v509_v31 }
  0x23   :  { %338 = vmatmul.mubr.bf16.vlgmr.msra.gmra.mxu0 %v510_v32 }
  0x24   :  { %379 = vmatmul.mubr.bf16.vlgmr.msra.gmra.mxu1 %v513_v34 }
  0xe3   :  { %v450_v36 = vpop.f32.mrf.mxu0 }
  0xe4   :  { %v472_v37 = vpop.f32.mrf.mxu1 }
  0xe5   :  { %v451_v39 = vpop.f32.mrf.mxu0 }
  0xe6   :  { %v452_v40 = vadd.f32 %v451_v39, %v450_v36  ;;  %v473_v41 = vpop.f32.mrf.mxu1 }
  0xe7   :  { %v453_v42 = vpop.f32.mrf.mxu0  ;;  %v474_v44 = vadd.f32 %v473_v41, %v472_v37 }
  0xe8   :  { %v340_v43 = vadd.f32 %v452_v40, %v397_v38  ;;  %v475_v45 = vpop.f32.mrf.mxu1 }
  0xe9   :  { %v454_v47 = vpop.f32.mrf.mxu0 }
  0xea   :  { %v381_v48 = vadd.f32 %v474_v44, %v340_v43  ;;  %v455_v49 = vadd.f32 %v454_v47, %v453_v42  ;;  %v476_v50 = vpop.f32.mrf.mxu1 }
  0xeb   :  { %v477_v53 = vadd.f32 %v476_v50, %v475_v45 }
  0xec   :  { %v389_v51 = vadd.f32 %v387_v46, %v381_v48  ;;  %v343_v52 = vadd.f32 %v455_v49, %v397_v38 }
  0xee   :  { %391 = vst [vmem:[%s668_s4] sm:$0xff] %v389_v51  ;;  %v384_v55 = vadd.f32 %v477_v53, %v343_v52 }
  0xf0   :  { %v390_v56 = vadd.f32 %v388_v54, %v384_v55 }
  0xf2   :  { %392 = vst [vmem:[%s668_s4 + $0x8] sm:$0xff] %v390_v56 }

// kernel: _lambda_.38
= control target key start
LH: loop header
LB: loop body
LE: loop exit
PB: predicated region body
PF: predicated region fallthrough
CT: control target
= control target key end

     0   :  { %s1182_s15 = smov 0   ;;  %s1184_s16 = smov 0   ;;  %s1306_s0 = inlined_call_operand.vmem [shape: bf16[2,8,384], index: 0, kind: input, shape index: {}, may-alias: {0,1,2}]   ;;  %s1307_s1 = inlined_call_operand.vmem [shape: bf16[2,8,384], index: 1, kind: input, shape index: {}, may-alias: {0,1,2}]   ;;  %s1308_s2 = inlined_call_operand.vmem [shape: bf16[2,8,384], index: 2, kind: input, shape index: {}, may-alias: {0,1,2}]   ;;  %s1309_s3 = inlined_call_operand.vmem [shape: f32[2,1,8], index: 3, kind: input, shape index: {}]   ;;  %s1310_s4 = inlined_call_operand.vmem [shape: bf16[2,8,128], index: 4, kind: output, shape index: {}]  }
   0x1   :  { %s1186_s17 = smov 0  }
   0x2 LB: > { %s33_s18 = sadd.s32 1, %s1145_s16  ;;  %p988_p0 = scmp.ge.s32.totalorder %s1149_s17, 1  ;;  %s1149_s17 = sphi %s1186_s17, %s14_s17   ;;  %s1145_s16 = sphi %s1184_s16, %s1312_s16   ;;  %s1141_s15 = sphi %s1182_s15, %s1311_s15  }
   0x3   : > { %p35_p1 = scmp.ge.s32.totalorder %s33_s18, 2  ;;  %p242_p2 = scmp.lt.s32.totalorder %s1149_s17, 3 }
   0x5   : > { %s1314_s18 = smov (%p35_p1, %s33_s18), 0  ;;  %p243_p3 = pnand %p988_p0, %p242_p2 }
   0x6   : > { %p301_p4 = scmp.lt.s32.totalorder (!%p243_p3), %s1141_s15, 1  ;;  %s1154_s30 = smov (!%p243_p3), 96  }
   0x7   : > { %246 = sbr.rel (%p243_p3) target bundleno = 1428 (0x594), region = 36  ;;  %s1155_s5 = smov (!%p243_p3), 64  }
   0x8   : > { %s1156_s6 = smov (!%p243_p3), 32  }
   0xc   : > { %v1151_v0 = vmov 0.0   ;;  %vm1152_vm0 = vmmov 0   ;;  %s1316_s15 = smov (!%p301_p4, %s1141_s15), 1  ;;  %vm367_vm1 = vcmask 261120   ;;  %v348_v4 = vlaneseq }
   0xd   : > { %1027 = vmatprep.subr.bf16.mxu0 %v1151_v0  ;;  %1029 = vmatprep.mubr.msk.bf16.mxu0 %vm1152_vm0, %v1151_v0  ;;  %s1209_s19 = smul.u32 12, %s1316_s15  ;;  %s335_s29 = scalar_lea.vmem %s1309_s3, %s1316_s15  ;;  %v1153_v7 = vmov -1e+09   ;;  %vm416_vm3 = vcmask 64512   ;;  %vm432_vm4 = vcmask 1043456   ;;  %vm602_vm5 = vcmask 523520  }
   0xe   : > { %1033 = vmatprep.subr.bf16.mxu1 %v1151_v0  ;;  %1035 = vmatprep.mubr.msk.bf16.mxu1 %vm1152_vm0, %v1151_v0  ;;  %v349_v5 = vshrl.u32 %v348_v4, 7  ;;  %v353_v6 = vand.u32 127, %v348_v4  ;;  %v993_v9 = vld [vmem:[%s335_s29] ss:$0 sm:$0xff]  ;;  %vm720_vm6 = vcmask 785920   ;;  %vm838_vm7 = vcmask 1048320  }
   0xf   : > { %s1008_s20 = sadd.s32 4, %s1209_s19  ;;  %s312_s26 = scalar_lea.vmem %s1306_s0, %s1209_s19 }
  0x10   : > { %s321_s23 = scalar_lea.vmem %s1307_s1, %s1008_s20  ;;  %v364_v3 = vld [vmem:[%s312_s26] sm:$0xf]  ;;  %vm354_vm2 = vcmp.le.s32.totalorder %v353_v6, %v349_v5  ;;  %s1010_s7 = sadd.s32 8, %s1209_s19 }
  0x11   : > { %v365_v1 = vld [vmem:[%s321_s23] sm:$0xf]  ;;  %v355_v8 = vsel %vm354_vm2, 0.0, %v1153_v7  ;;  %v996_v19 = vcombine.low %v364_v3, %v364_v3  ;;  %s331_s10 = scalar_lea.vmem %s1308_s2, %s1010_s7  ;;  %s992_s11 = sshll.u32 %s1316_s15, 2 }
  0x12   : > { %v372_v2 = vsel %vm367_vm1, %v365_v1, 0  ;;  %v1228_v10 = vadd.f32 %v993_v9, %v355_v8  ;;  %v997_v18 = vcombine.low %v365_v1, %v365_v1  ;;  %v1242_v25 = vld [vmem:[%s331_s10] sm:$0xf]  ;;  %s345_s14 = scalar_lea.vmem %s1310_s4, %s992_s11 }
  0x13   : > { %1028 = vmatpush3.bf16.xpose.msra.mxu0 %v372_v2  ;;  %v434_v26 = vsel %vm432_vm4, %v1242_v25, 0 }
  0x14   : > { %1045 = vmatprep.subr.bf16.mxu0 %v1151_v0  ;;  %485 = vrot.lane.b32.xlu1 %v997_v18, %s1154_s30 }
  0x15   : > { %1034 = vmatpush3.bf16.msra.mxu1 %v434_v26 }
  0x16   : > { %1039 = vmatprep.subr.bf16.mxu1 %v1151_v0 }
  0x18   : > { %480 = vrot.lane.b32.xlu1 %v996_v19, %s1154_s30 }
  0x1a   : > { %1030 = vmatmul.mubr.msk.bf16.vlgmr.msra.gmra.mxu0 %vm367_vm1, %v364_v3 }
  0x1b   : > { %1047 = vmatprep.mubr.msk.bf16.mxu0 %vm1152_vm0, %v1151_v0 }
  0x1c   : > { %604 = vrot.lane.b32.xlu1 %v996_v19, %s1155_s5 }
  0x20   : > { %724 = vrot.lane.b32.xlu1 %v997_v18, %s1156_s6 }
  0x24   : > { %722 = vrot.lane.b32.xlu1 %v996_v19, %s1156_s6 }
  0x86   : > { %v486_v29 = vpop.permute.xlu1 %485 }
  0x87   : > { %v491_v31 = vsel %vm367_vm1, %v486_v29, 0 }
  0x8a   : > { %v481_v33 = vpop.permute.xlu1 %480 }
  0x8e   : > { %v605_v35 = vpop.permute.xlu1 %604 }
  0x92   : > { %v725_v37 = vpop.permute.xlu1 %724 }
  0x93   : > { %v730_v38 = vsel %vm367_vm1, %v725_v37, 0 }
  0x96   : > { %v723_v39 = vpop.permute.xlu1 %722 }
  0xda   : > { %v408_v11 = vpop.f32.mrf.mxu0 }
  0xdb   : > { %v414_v12 = vmul.f32 0.17677669, %v408_v11 }
  0xdc   : > { %v1031_v13 = vpop.f32.mrf.mxu0 }
  0xdd   : > { %v415_v14 = vadd.f32 %v414_v12, %v1228_v10  ;;  %v999_v12 = vcombine.low %v1242_v25, %v1242_v25 }
  0xde   : > { %v411_v15 = vpop.f32.mrf.mxu0 }
  0xdf   : > { %v417_v16 = vsel %vm416_vm3, %v415_v14, -inf }
  0xe0   : > { %418 = vmax.xlane.f32.xlu0 %v417_v16  ;;  %v1032_v17 = vpop.f32.mrf.mxu0 }
 0x169   : > { %v419_v20 = vpop.xlane.xlu0 %418 }
 0x16a   : > { %v420_v21 = vsub.f32 %v415_v14, %v419_v20 }
 0x16c   : > { %v421_v22 = vmul.f32 1.442695, %v420_v21 }
 0x16e   : > { %1111 = vpow2.f32 %v421_v22 }
 0x17b   : > { %v1112_v23 = vpop.eup %1111 }
 0x17c   : > { %v423_v24 = vsel %vm416_vm3, %v1112_v23, 0.0 }
 0x17d   : > { %424 = vadd.xlane.f32.xlu0 %v423_v24 }
 0x193   : > { %606 = vrot.lane.b32.xlu0 %v997_v18, %s1155_s5 }
 0x206   : > { %v425_v27 = vpop.xlane.xlu0 %424 }
 0x207   : > { %1113 = vrcp.f32 %v425_v27 }
 0x20a   : > { %v607_v34 = vpop.permute.xlu0 %606 }
 0x20b   : > { %v612_v36 = vsel %vm367_vm1, %v607_v34, 0 }
 0x214   : > { %v1114_v28 = vpop.eup %1113 }
 0x215   : > { %v427_v30 = vmul.f32 %v1114_v28, %v1112_v23 }
 0x217   : > { %v428_v32 = vpack.c.bf16 %v427_v30, %v427_v30 }
 0x219   : > { %1036 = vmatmul.mubr.msk.bf16.vlgmr.msra.gmra.mxu1 %vm416_vm3, %v428_v32 }
 0x21a   : > { %1040 = vmatpush3.bf16.xpose.msra.mxu1 %v491_v31  ;;  %1041 = vmatprep.mubr.msk.bf16.mxu1 %vm1152_vm0, %v1151_v0 }
 0x21b   : > { %1051 = vmatprep.subr.bf16.mxu1 %v1151_v0 }
 0x221   : > { %1042 = vmatmul.mubr.msk.bf16.vlgmr.msra.gmra.mxu1 %vm367_vm1, %v481_v33 }
 0x222   : > { %1052 = vmatpush3.bf16.xpose.msra.mxu1 %v612_v36  ;;  %1053 = vmatprep.mubr.msk.bf16.mxu1 %vm1152_vm0, %v1151_v0 }
 0x223   : > { %1063 = vmatprep.subr.bf16.mxu1 %v1151_v0 }
 0x229   : > { %1054 = vmatmul.mubr.msk.bf16.vlgmr.msra.gmra.mxu1 %vm367_vm1, %v605_v35 }
 0x22a   : > { %1064 = vmatpush3.bf16.xpose.msra.mxu1 %v730_v38  ;;  %1065 = vmatprep.mubr.msk.bf16.mxu1 %vm1152_vm0, %v1151_v0 }
 0x231   : > { %1066 = vmatmul.mubr.msk.bf16.vlgmr.msra.gmra.mxu1 %vm367_vm1, %v723_v39 }
 0x2d9   : > { %v470_v40 = vpop.f32.mrf.mxu1 }
 0x2da   : > { %476 = vst.msk [vmem:[#allocation2] sm:$0xff] %vm367_vm1, %v470_v40 }
 0x2db   : > { %v1037_v41 = vpop.f32.mrf.mxu1 }
 0x2dd   : > { %v473_v42 = vpop.f32.mrf.mxu1 }
 0x2df   : > { %v1038_v43 = vpop.f32.mrf.mxu1 }
 0x2e1   : > { %v527_v44 = vpop.f32.mrf.mxu1 }
 0x2e2   : > { %v533_v45 = vmul.f32 0.17677669, %v527_v44 }
 0x2e3   : > { %v1043_v46 = vpop.f32.mrf.mxu1 }
 0x2e4   : > { %v534_v47 = vadd.f32 %v533_v45, %v1228_v10 }
 0x2e5   : > { %v530_v48 = vpop.f32.mrf.mxu1 }
 0x2e6   : > { %v535_v49 = vsel %vm416_vm3, %v534_v47, -inf }
 0x2e7   : > { %536 = vmax.xlane.f32.xlu1 %v535_v49  ;;  %v1044_v50 = vpop.f32.mrf.mxu1 }
 0x2e9   : > { %v648_v51 = vpop.f32.mrf.mxu1 }
 0x2ea   : > { %v654_v52 = vmul.f32 0.17677669, %v648_v51 }
 0x2eb   : > { %v1055_v53 = vpop.f32.mrf.mxu1 }
 0x2ec   : > { %v655_v54 = vadd.f32 %v654_v52, %v1228_v10 }
 0x2ed   : > { %v651_v55 = vpop.f32.mrf.mxu1 }
 0x2ee   : > { %v656_v56 = vsel %vm416_vm3, %v655_v54, -inf }
 0x2ef   : > { %657 = vmax.xlane.f32.xlu0 %v656_v56  ;;  %v1056_v57 = vpop.f32.mrf.mxu1 }
 0x2f1   : > { %v766_v58 = vpop.f32.mrf.mxu1 }
 0x2f2   : > { %v772_v59 = vmul.f32 0.17677669, %v766_v58 }
 0x2f3   : > { %v1067_v60 = vpop.f32.mrf.mxu1 }
 0x2f4   : > { %v773_v61 = vadd.f32 %v772_v59, %v1228_v10 }
 0x2f5   : > { %v769_v62 = vpop.f32.mrf.mxu1 }
 0x2f6   : > { %v774_v63 = vsel %vm416_vm3, %v773_v61, -inf }
 0x2f7   : > { %775 = vmax.xlane.f32.xlu1 %v774_v63  ;;  %v1068_v1 = vpop.f32.mrf.mxu1 }
 0x370   : > { %v537_v2 = vpop.xlane.xlu1 %536 }
 0x371   : > { %v538_v3 = vsub.f32 %v534_v47, %v537_v2 }
 0x373   : > { %v539_v4 = vmul.f32 1.442695, %v538_v3 }
 0x375   : > { %1115 = vpow2.f32 %v539_v4 }
 0x378   : > { %v658_v5 = vpop.xlane.xlu0 %657 }
 0x379   : > { %v659_v6 = vsub.f32 %v655_v54, %v658_v5 }
 0x37b   : > { %v660_v7 = vmul.f32 1.442695, %v659_v6 }
 0x37d   : > { %1117 = vpow2.f32 %v660_v7 }
 0x380   : > { %v776_v13 = vpop.xlane.xlu1 %775 }
 0x381   : > { %v777_v14 = vsub.f32 %v773_v61, %v776_v13 }
 0x382   : > { %v1116_v8 = vpop.eup %1115 }
 0x383   : > { %v541_v9 = vsel %vm416_vm3, %v1116_v8, 0.0  ;;  %v778_v15 = vmul.f32 1.442695, %v777_v14 }
 0x384   : > { %542 = vadd.xlane.f32.xlu1 %v541_v9 }
 0x385   : > { %1119 = vpow2.f32 %v778_v15 }
 0x38a   : > { %v1118_v11 = vpop.eup %1117 }
 0x38b   : > { %v662_v10 = vsel %vm416_vm3, %v1118_v11, 0.0 }
 0x38c   : > { %663 = vadd.xlane.f32.xlu0 %v662_v10 }
 0x392   : > { %v1120_v16 = vpop.eup %1119 }
 0x393   : > { %v780_v17 = vsel %vm416_vm3, %v1120_v16, 0.0 }
 0x395   : > { %668 = vrot.lane.b32.xlu1 %v999_v12, %s1155_s5 }
 0x3a2   : > { %550 = vrot.lane.b32.xlu0 %v999_v12, %s1154_s30 }
 0x3b9   : > { %781 = vadd.xlane.f32.xlu1 %v780_v17 }
 0x3ca   : > { %786 = vrot.lane.b32.xlu1 %v999_v12, %s1156_s6 }
 0x40d   : > { %v543_v18 = vpop.xlane.xlu1 %542 }
 0x40e   : > { %1121 = vrcp.f32 %v543_v18 }
 0x411   : > { %v669_v24 = vpop.permute.xlu1 %668 }
 0x412   : > { %v674_v26 = vsel %vm432_vm4, %v669_v24, 0 }
 0x415   : > { %v664_v19 = vpop.xlane.xlu0 %663 }
 0x416   : > { %1123 = vrcp.f32 %v664_v19 }
 0x419   : > { %v551_v20 = vpop.permute.xlu0 %550 }
 0x41a   : > { %v556_v21 = vsel %vm432_vm4, %v551_v20, 0 }
 0x41b   : > { %v1122_v22 = vpop.eup %1121  ;;  %1046 = vmatpush3.bf16.msra.mxu0 %v556_v21 }
 0x41c   : > { %1057 = vmatprep.subr.bf16.mxu0 %v1151_v0  ;;  %v545_v23 = vmul.f32 %v1122_v22, %v1116_v8 }
 0x41e   : > { %v546_v25 = vpack.c.bf16 %v545_v23, %v545_v23 }
 0x420   : > { %1048 = vmatmul.mubr.msk.bf16.vlgmr.msra.gmra.mxu0 %vm416_vm3, %v546_v25 }
 0x421   : > { %1058 = vmatpush3.bf16.msra.mxu0 %v674_v26  ;;  %1059 = vmatprep.mubr.msk.bf16.mxu0 %vm1152_vm0, %v1151_v0 }
 0x422   : > { %1069 = vmatprep.subr.bf16.mxu0 %v1151_v0 }
 0x423   : > { %v1124_v27 = vpop.eup %1123 }
 0x424   : > { %v666_v28 = vmul.f32 %v1124_v27, %v1118_v11 }
 0x426   : > { %v667_v29 = vpack.c.bf16 %v666_v28, %v666_v28 }
 0x428   : > { %1060 = vmatmul.mubr.msk.bf16.vlgmr.msra.gmra.mxu0 %vm416_vm3, %v667_v29 }
 0x429   : > { %1071 = vmatprep.mubr.msk.bf16.mxu0 %vm1152_vm0, %v1151_v0 }
 0x442   : > { %v782_v30 = vpop.xlane.xlu1 %781 }
 0x443   : > { %1125 = vrcp.f32 %v782_v30 }
 0x446   : > { %v787_v31 = vpop.permute.xlu1 %786 }
 0x447   : > { %v792_v32 = vsel %vm432_vm4, %v787_v31, 0 }
 0x448   : > { %1070 = vmatpush3.bf16.msra.mxu0 %v792_v32 }
 0x450   : > { %v1126_v33 = vpop.eup %1125 }
 0x451   : > { %v784_v34 = vmul.f32 %v1126_v33, %v1120_v16 }
 0x453   : > { %v785_v35 = vpack.c.bf16 %v784_v34, %v784_v34 }
 0x455   : > { %1072 = vmatmul.mubr.msk.bf16.vlgmr.msra.gmra.mxu0 %vm416_vm3, %v785_v35 }
 0x4e0   : > { %v592_v36 = vpop.f32.mrf.mxu0 }
 0x4e1   : > { %599 = vrot.lane.b32.xlu0 %v592_v36, %s1156_s6 }
 0x4e2   : > { %v1049_v37 = vpop.f32.mrf.mxu0 }
 0x4e4   : > { %v595_v38 = vpop.f32.mrf.mxu0 }
 0x4e6   : > { %v1050_v39 = vpop.f32.mrf.mxu0 }
 0x4e8   : > { %v710_v40 = vpop.f32.mrf.mxu0 }
 0x4e9   : > { %717 = vrot.lane.b32.xlu1 %v710_v40, %s1155_s5 }
 0x4ea   : > { %v1061_v0 = vpop.f32.mrf.mxu0 }
 0x4ec   : > { %v713_v41 = vpop.f32.mrf.mxu0 }
 0x4ee   : > { %v1062_v42 = vpop.f32.mrf.mxu0 }
 0x515   : > { %v828_v43 = vpop.f32.mrf.mxu0 }
 0x516   : > { %835 = vrot.lane.b32.xlu0 %v828_v43, %s1154_s30 }
 0x517   : > { %v1073_v44 = vpop.f32.mrf.mxu0 }
 0x519   : > { %v831_v45 = vpop.f32.mrf.mxu0 }
 0x51b   : > { %v1074_v46 = vpop.f32.mrf.mxu0 }
 0x553   : > { %v600_v47 = vpop.permute.xlu0 %599 }
 0x554   : > { %603 = vst.msk [vmem:[#allocation2] sm:$0xff] %vm602_vm5, %v600_v47 }
 0x55b   : > { %v718_v48 = vpop.permute.xlu1 %717 }
 0x55c   : > { %721 = vst.msk [vmem:[#allocation2] sm:$0xff] %vm720_vm6, %v718_v48 }
 0x588   : > { %v836_v49 = vpop.permute.xlu0 %835 }
 0x589   : > { %839 = vst.msk [vmem:[#allocation2] sm:$0xff] %vm838_vm7, %v836_v49 }
 0x590   : > { %v840_v50 = vld [vmem:[#allocation2] sm:$0xff] }
 0x591   : > { %v841_v51 = vpack.c.bf16 %v840_v50, %v840_v50 }
 0x593   : > { %842 = vst [vmem:[%s345_s14] sm:$0xf] %v841_v51 }
 0x594 PF: > { %s14_s17 = sadd.s32 1, %s1149_s17   ;;  %s1311_s15 = smov %s1145_s16 }
 0x595   : > { %p11_p5 = scmp.ge.s32.totalorder %s14_s17, 4   ;;  %s1312_s16 = smov %s1314_s18 }
 0x597   :  { %13 = sbr.rel (!%p11_p5) target bundleno = 2 (0x2), region = 75 }

// kernel: _lambda_.47
= control target key start
LH: loop header
LB: loop body
LE: loop exit
PB: predicated region body
PF: predicated region fallthrough
CT: control target
= control target key end

     0   :  { %vm22_vm0 = vcmask 1045504   ;;  %v231_v3 = vmov 0.0   ;;  %vm232_vm1 = vmmov 0   ;;  %vm170_vm2 = vcmask 523264   ;;  %s302_s0 = inlined_call_operand.vmem [shape: f32[14,128], index: 0, kind: input, shape index: {}]   ;;  %s303_s1 = inlined_call_operand.vmem [shape: bf16[128,64], index: 1, kind: input, shape index: {}]   ;;  %s304_s2 = inlined_call_operand.vmem [shape: f32[1,128], index: 2, kind: input, shape index: {}]   ;;  %s305_s3 = inlined_call_operand.vmem [shape: f32[1,128], index: 3, kind: input, shape index: {}]   ;;  %s306_s4 = inlined_call_operand.vmem [shape: f32[14,64], index: 4, kind: output, shape index: {}]  }
   0x1   :  { %v19_v0 = vld [vmem:[%s302_s0 + $0x8] sm:$0x3f]  ;;  %v18_v2 = vld [vmem:[%s302_s0] sm:$0xff]  ;;  %197 = vmatprep.subr.bf16.mxu0 %v231_v3  ;;  %v219_v4 = vld [vmem:[%s303_s1 + $0x38] sm:$0xff]   ;;  %213 = vmatprep.mubr.msk.bf16.mxu0 %vm232_vm1, %v231_v3  ;;  %vm172_vm3 = vcmask 521216  }
   0x2   :  { %v23_v1 = vsel %vm22_vm0, %v19_v0, 0.0  ;;  %198 = vmatpush3.bf16.msra.mxu0 %v219_v4  ;;  %v220_v14 = vld [vmem:[%s303_s1 + $0x30] sm:$0xff]   ;;  %v221_v15 = vld [vmem:[%s303_s1 + $0x28] sm:$0xff]   ;;  %v222_v16 = vld [vmem:[%s303_s1 + $0x20] sm:$0xff]  }
   0x3   :  { %24 = vadd.xlane.f32.xlu0 %v23_v1  ;;  %199 = vmatprep.subr.bf16.mxu0 %v231_v3  ;;  %v223_v17 = vld [vmem:[%s303_s1 + $0x18] sm:$0xff]   ;;  %v224_v18 = vld [vmem:[%s303_s1 + $0x10] sm:$0xff]   ;;  %v225_v19 = vld [vmem:[%s303_s1 + $0x8] sm:$0xff]  }
   0x4   :  { %v226_v20 = vld [vmem:[%s303_s1] sm:$0xff]  }
   0x5   :  { %v178_v29 = vld [vmem:[%s304_s2] ss:$0 sm:$0xff] }
   0x6   :  { %200 = vmatpush3.bf16.msra.mxu0 %v220_v14  ;;  %v179_v33 = vld [vmem:[%s305_s3] ss:$0 sm:$0xff] }
   0x7   :  { %20 = vadd.xlane.f32.xlu0 %v18_v2  ;;  %201 = vmatprep.subr.bf16.mxu0 %v231_v3 }
   0xa   :  { %202 = vmatpush3.bf16.msra.mxu0 %v221_v15 }
   0xb   :  { %203 = vmatprep.subr.bf16.mxu0 %v231_v3 }
   0xe   :  { %204 = vmatpush3.bf16.msra.mxu0 %v222_v16 }
   0xf   :  { %205 = vmatprep.subr.bf16.mxu0 %v231_v3 }
  0x12   :  { %206 = vmatpush3.bf16.msra.mxu0 %v223_v17 }
  0x13   :  { %207 = vmatprep.subr.bf16.mxu0 %v231_v3 }
  0x16   :  { %208 = vmatpush3.bf16.msra.mxu0 %v224_v18 }
  0x17   :  { %209 = vmatprep.subr.bf16.mxu0 %v231_v3 }
  0x1a   :  { %210 = vmatpush3.bf16.msra.mxu0 %v225_v19 }
  0x1b   :  { %211 = vmatprep.subr.bf16.mxu0 %v231_v3 }
  0x1e   :  { %212 = vmatpush3.bf16.msra.mxu0 %v226_v20 }
  0x8c   :  { %v25_v5 = vpop.xlane.xlu0 %24 }
  0x8d   :  { %v28_v6 = vmul.f32 0.0078125, %v25_v5 }
  0x8f   :  { %v30_v9 = vsub.f32 %v19_v0, %v28_v6 }
  0x90   :  { %v21_v7 = vpop.xlane.xlu0 %20 }
  0x91   :  { %v27_v8 = vmul.f32 0.0078125, %v21_v7  ;;  %v32_v12 = vmul.f32 %v30_v9, %v30_v9 }
  0x93   :  { %v29_v10 = vsub.f32 %v18_v2, %v27_v8  ;;  %v35_v13 = vsel %vm22_vm0, %v32_v12, 0.0 }
  0x95   :  { %v31_v11 = vmul.f32 %v29_v10, %v29_v10 }
  0x97   :  { %33 = vadd.xlane.f32.xlu1 %v31_v11 }
  0x9b   :  { %36 = vadd.xlane.f32.xlu1 %v35_v13 }
 0x120   :  { %v34_v21 = vpop.xlane.xlu1 %33 }
 0x121   :  { %v38_v22 = vmul.f32 0.0078125, %v34_v21 }
 0x123   :  { %v40_v23 = vadd.f32 1e-05, %v38_v22 }
 0x124   :  { %v37_v24 = vpop.xlane.xlu1 %36 }
 0x125   :  { %227 = vrsqrt.f32 %v40_v23  ;;  %v39_v25 = vmul.f32 0.0078125, %v37_v24 }
 0x127   :  { %v41_v26 = vadd.f32 1e-05, %v39_v25 }
 0x129   :  { %229 = vrsqrt.f32 %v41_v26 }
 0x132   :  { %v228_v27 = vpop.eup %227 }
 0x133   :  { %v44_v28 = vmul.f32 %v228_v27, %v29_v10 }
 0x135   :  { %v53_v32 = vmul.f32 %v178_v29, %v44_v28 }
 0x136   :  { %v230_v30 = vpop.eup %229 }
 0x137   :  { %v45_v31 = vmul.f32 %v230_v30, %v30_v9  ;;  %v62_v35 = vadd.f32 %v179_v33, %v53_v32 }
 0x139   :  { %v54_v34 = vmul.f32 %v178_v29, %v45_v31 }
 0x13b   :  { %v63_v36 = vadd.f32 %v179_v33, %v54_v34 }
 0x13d   :  { %v64_v37 = vpack.c.bf16 %v63_v36, %v62_v35 }
 0x13f   :  { %214 = vmatmul.mubr.bf16.vlgmr.msra.gmra.mxu0 %v64_v37 }
 0x1ff   :  { %v163_v38 = vpop.f32.mrf.mxu0 }
 0x200   :  { %171 = vst.msk [vmem:[%s306_s4] sm:$0xff] %vm170_vm2, %v163_v38 }
 0x201   :  { %v215_v39 = vpop.f32.mrf.mxu0 }
 0x203   :  { %v166_v40 = vpop.f32.mrf.mxu0 }
 0x204   :  { %173 = vst.msk [vmem:[%s306_s4 + $0x8] sm:$0x3f] %vm172_vm3, %v166_v40 }
 0x205   :  { %v216_v41 = vpop.f32.mrf.mxu0 }

</bundles_post_ra>
